<compile_context>
chip_gen: v7x
topology: tpu7x:2x2x1
jax: 0.10.0
libtpu: 0.0.40
codegen_flags: <defaults>
</compile_context>

<pallas_src>
import jax
import jax.numpy as jnp
import numpy as np
from jax import lax
from jax.experimental import pallas as pl
from jax.experimental.pallas import tpu as pltpu


# ----------------------------------- Pallas kernel --------------------------------------

def cab_kernel(x_ref, wb1_ref, wb2_ref, wd1_ref, wd2_ref, o_ref):
    """Fused CAB in lane-dense (H, W*C) layout.

    x_ref  : (Bb, H, W*C)   f32   input block (also the residual)
    wb1_ref: (W*C, 3*W*C)   bf16  banded conv1 weight (dx + W-padding folded into the band,
                                  dy indexed by the three 512-wide column groups)
    wb2_ref: (W*C, 3*W*C)   bf16  banded conv2 weight
    wd1_ref: (Cr, C)        f32   CA squeeze weight (C on the lane dim)
    wd2_ref: (Cr, C)        f32   CA excite  weight
    o_ref  : (Bb, H, W*C)   f32
    """
    Bb, H, WC = x_ref.shape
    Cr, C = wd2_ref.shape
    W = WC // C

    x = x_ref[...]                                    # f32, kept for the residual add

    def conv3x3(act_bf16, wb_ref):
        # One MXU matmul per conv (bf16 operands, f32 accumulation). The matmul output is
        # already in the (H, W*C) lane layout; only the dy taps need a 1-row shift.
        z = jnp.dot(act_bf16.reshape(Bb * H, WC), wb_ref[...],
                    preferred_element_type=jnp.float32)
        z = z.reshape(Bb, H, 3 * WC)
        z0 = z[:, :, 0 * WC:1 * WC]                   # dy=0 tap: needs row h-1
        z1 = z[:, :, 1 * WC:2 * WC]                   # dy=1 tap: aligned
        z2 = z[:, :, 2 * WC:3 * WC]                   # dy=2 tap: needs row h+1
        zrow = jnp.zeros((Bb, 1, WC), jnp.float32)
        up = jnp.concatenate([zrow, z0[:, :H - 1, :]], axis=1)   # z0[b, h-1], zero at h=0
        dn = jnp.concatenate([z2[:, 1:, :], zrow], axis=1)       # z2[b, h+1], zero at h=H-1
        return z1 + up + dn

    # ---- conv1 -> ReLU -> conv2 (activations fed to the MXU in bf16) ----
    a1 = jnp.maximum(conv3x3(x.astype(jnp.bfloat16), wb1_ref), 0.0)
    res = conv3x3(a1.astype(jnp.bfloat16), wb2_ref)               # (Bb, H, W*C) f32

    # ---- channel attention (CALayer) — VPU/XLU only, no tiny MXU matmuls ----
    s1 = jnp.sum(res, axis=1)                                     # (Bb, W*C): sublane reduce
    pooled = s1[:, 0:C]
    for w in range(1, W):                                         # fold the W lane-groups
        pooled = pooled + s1[:, w * C:(w + 1) * C]
    pooled = pooled * (1.0 / (H * W))                             # (Bb, C)

    hid = jnp.maximum(
        jnp.sum(pooled[:, None, :] * wd1_ref[...][None, :, :], axis=-1), 0.0)   # (Bb, Cr)
    scale = jax.nn.sigmoid(
        jnp.sum(hid[:, :, None] * wd2_ref[...][None, :, :], axis=1))            # (Bb, C)
    scale_wc = jnp.concatenate([scale] * W, axis=-1)              # (Bb, W*C)

    # ---- gate + residual (all lane-dense) ----
    o_ref[...] = (res * scale_wc[:, None, :] + x).astype(o_ref.dtype)


# ------------------------------------- wrapper ------------------------------------------

def _band_conv_weight(w_hwio, width):
    """(3, 3, C, C) HWIO -> (W*C, 3*W*C) banded weight for the lane-dense 3x3 conv.

    Column group dy in {0,1,2} holds M_dy with
        M_dy[w_in*C + ci, w_out*C + co] = w_hwio[dy, w_in - w_out + 1, ci, co]
    and zero when |w_in - w_out| > 1, so the 1-px zero padding along W is implicit.
    """
    C = w_hwio.shape[2]
    wi = np.arange(width)[:, None]
    wo = np.arange(width)[None, :]
    dx = wi - wo + 1                                              # (W, W)
    valid = ((dx >= 0) & (dx <= 2)).astype(np.float32)
    dxc = np.clip(dx, 0, 2)
    blocks = w_hwio[:, dxc, :, :]                                 # (3, W, W, C, C)
    blocks = blocks * jnp.asarray(valid, w_hwio.dtype)[None, :, :, None, None]
    # rows = (w_in, ci), cols = (dy, w_out, co)
    return blocks.transpose(1, 3, 0, 2, 4).reshape(width * C, 3 * width * C)


def _pick_batch_block(n, cap=8):
    """Largest divisor of n that is <= cap while keeping >= 2 grid steps (v7x megacore)."""
    best = 1
    for b in range(1, min(n, cap) + 1):
        if n % b == 0 and (n // b >= 2 or n <= 1):
            best = b
    return best


def cab_forward(x_nchw, w1, w2, wd1, wd2, *, batch_block=None):
    """x_nchw: (N, C, H, W) like PyTorch.  w1/w2: HWIO (3,3,C,C).  wd1: (C,Cr). wd2: (Cr,C)."""
    x = jnp.transpose(x_nchw, (0, 2, 3, 1))                       # NCHW -> NHWC (glue)
    N, H, W, C = x.shape
    Cr = wd1.shape[1]
    WC = W * C
    x2 = x.reshape(N, H, WC)                                      # lane-dense minor dim (free)

    Bb = _pick_batch_block(N) if batch_block is None else batch_block
    assert N % Bb == 0

    # Weight prep (glue, done once outside the kernel):
    wb1 = _band_conv_weight(w1, W).astype(jnp.bfloat16)           # (WC, 3*WC), bf16 for MXU
    wb2 = _band_conv_weight(w2, W).astype(jnp.bfloat16)
    wd1t = jnp.transpose(wd1).astype(jnp.float32)                 # (Cr, C): C on the lane dim
    wd2f = wd2.astype(jnp.float32)                                # (Cr, C)

    out = pl.pallas_call(
        cab_kernel,
        out_shape=jax.ShapeDtypeStruct((N, H, WC), x.dtype),
        grid_spec=pltpu.PrefetchScalarGridSpec(
            num_scalar_prefetch=0,
            grid=(N // Bb,),
            in_specs=[
                pl.BlockSpec((Bb, H, WC), lambda n: (n, 0, 0)),
                pl.BlockSpec((WC, 3 * WC), lambda n: (0, 0)),
                pl.BlockSpec((WC, 3 * WC), lambda n: (0, 0)),
                pl.BlockSpec((Cr, C), lambda n: (0, 0)),
                pl.BlockSpec((Cr, C), lambda n: (0, 0)),
            ],
            out_specs=pl.BlockSpec((Bb, H, WC), lambda n: (n, 0, 0)),
        ),
        compiler_params=pltpu.CompilerParams(
            dimension_semantics=("parallel",),                    # batch blocks -> both TCs on v7x
            vmem_limit_bytes=32 * 1024 * 1024,                    # few MiB used; safe on v5e..v7x
        ),
    )(x2, wb1, wb2, wd1t, wd2f)

    out = out.reshape(N, H, W, C)
    return jnp.transpose(out, (0, 3, 1, 2))                       # NHWC -> NCHW


# ------------------------------------ reference ------------------------------------------

def cab_reference(x_nchw, w1, w2, wd1, wd2):
    """Pure-JAX f32 reference (same math) for the correctness check."""
    x = jnp.transpose(x_nchw, (0, 2, 3, 1))
    dn = ("NHWC", "HWIO", "NHWC")
    r = lax.conv_general_dilated(x, w1, (1, 1), "SAME", dimension_numbers=dn)
    r = jnp.maximum(r, 0.0)
    r = lax.conv_general_dilated(r, w2, (1, 1), "SAME", dimension_numbers=dn)
    y = jnp.mean(r, axis=(1, 2), keepdims=True)                   # (N,1,1,C)
    y = jnp.maximum(jnp.einsum("nijc,cd->nijd", y, wd1), 0.0)
    y = jax.nn.sigmoid(jnp.einsum("nijd,dc->nijc", y, wd2))
    out = r * y + x
    return jnp.transpose(out, (0, 3, 1, 2))


if __name__ == "__main__":
    # Shapes consistent with the module's CAB(n_feat=32, reduction=8, bias=False).
    # N=4 so the auto-picked batch block (Bb=2) gives a grid of length 2 (both v7x cores busy).
    N, C, H, W = 4, 32, 16, 16
    R = 8
    Cr = C // R

    key = jax.random.PRNGKey(0)
    k1, k2, k3, k4, kx = jax.random.split(key, 5)
    w1 = jax.random.normal(k1, (3, 3, C, C), jnp.float32) * (1.0 / np.sqrt(9 * C))
    w2 = jax.random.normal(k2, (3, 3, C, C), jnp.float32) * (1.0 / np.sqrt(9 * C))
    wd1 = jax.random.normal(k3, (C, Cr), jnp.float32) * (1.0 / np.sqrt(C))
    wd2 = jax.random.normal(k4, (Cr, C), jnp.float32) * (1.0 / np.sqrt(Cr))
    x = jax.random.normal(kx, (N, C, H, W), jnp.float32)          # NCHW, like PyTorch

    out = jax.block_until_ready(cab_forward(x, w1, w2, wd1, wd2))
    ref = jax.block_until_ready(cab_reference(x, w1, w2, wd1, wd2))

    assert out.shape == (N, C, H, W)
    np.testing.assert_allclose(np.asarray(out), np.asarray(ref), rtol=5e-2, atol=5e-2)
    print("KERNEL_OK")
</pallas_src>

<mosaic_0001>
module attributes {stable_mosaic.version = 11 : i64} {
  func.func @cab_kernel(%arg0: i32, %arg1: memref<2x16x512xf32, #tpu.memory_space<vmem>>, %arg2: memref<512x1536xbf16, #tpu.memory_space<vmem>>, %arg3: memref<512x1536xbf16, #tpu.memory_space<vmem>>, %arg4: memref<4x32xf32, #tpu.memory_space<vmem>>, %arg5: memref<4x32xf32, #tpu.memory_space<vmem>>, %arg6: memref<2x16x512xf32, #tpu.memory_space<vmem>>) attributes {dimension_semantics = [#tpu.dimension_semantics<parallel>], iteration_bounds = array<i64: 2>, scalar_prefetch = 0 : i64, scratch_operands = 0 : i64, tpu.core_type = #tpu.core_type<tc>, window_params = [{transform_indices = @transform_0, window_bounds = array<i64: 2, 16, 512>}, {pipeline_mode = #tpu.pipeline_mode<synchronous>, transform_indices = @transform_1, window_bounds = array<i64: 512, 1536>}, {pipeline_mode = #tpu.pipeline_mode<synchronous>, transform_indices = @transform_2, window_bounds = array<i64: 512, 1536>}, {pipeline_mode = #tpu.pipeline_mode<synchronous>, transform_indices = @transform_3, window_bounds = array<i64: 4, 32>}, {pipeline_mode = #tpu.pipeline_mode<synchronous>, transform_indices = @transform_4, window_bounds = array<i64: 4, 32>}, {transform_indices = @transform_5, window_bounds = array<i64: 2, 16, 512>}]} {
    %c0 = arith.constant 0 : index
    %c0_0 = arith.constant 0 : index
    %c0_1 = arith.constant 0 : index
    %0 = vector.load %arg1[%c0, %c0_0, %c0_1] : memref<2x16x512xf32, #tpu.memory_space<vmem>>, vector<2x16x512xf32>
    %1 = arith.truncf %0 : vector<2x16x512xf32> to vector<2x16x512xbf16>
    %2 = vector.shape_cast %1 : vector<2x16x512xbf16> to vector<32x512xbf16>
    %c0_2 = arith.constant 0 : index
    %c0_3 = arith.constant 0 : index
    %3 = vector.load %arg2[%c0_2, %c0_3] : memref<512x1536xbf16, #tpu.memory_space<vmem>>, vector<512x1536xbf16>
    %cst = arith.constant dense<0.000000e+00> : vector<32x1536xf32>
    %4 = tpu.matmul %2, %3, %cst {dimension_numbers = #tpu.dot_dimension_numbers<[1], [0], [0], [1], [0, 0, 1, 1], [], []>} : vector<32x512xbf16>, vector<512x1536xbf16>, vector<32x1536xf32> -> vector<32x1536xf32>
    %5 = vector.shape_cast %4 : vector<32x1536xf32> to vector<2x16x1536xf32>
    %6 = vector.extract_strided_slice %5 {offsets = [0, 0, 0], sizes = [2, 16, 512], strides = [1, 1, 1]} : vector<2x16x1536xf32> to vector<2x16x512xf32>
    %7 = vector.extract_strided_slice %5 {offsets = [0, 0, 512], sizes = [2, 16, 512], strides = [1, 1, 1]} : vector<2x16x1536xf32> to vector<2x16x512xf32>
    %8 = vector.extract_strided_slice %5 {offsets = [0, 0, 1024], sizes = [2, 16, 512], strides = [1, 1, 1]} : vector<2x16x1536xf32> to vector<2x16x512xf32>
    %cst_4 = arith.constant 0.000000e+00 : f32
    %9 = vector.broadcast %cst_4 : f32 to vector<2x1x512xf32>
    %10 = vector.extract_strided_slice %6 {offsets = [0, 0, 0], sizes = [2, 15, 512], strides = [1, 1, 1]} : vector<2x16x512xf32> to vector<2x15x512xf32>
    %11 = tpu.concatenate %9, %10 in 1 : vector<2x1x512xf32>, vector<2x15x512xf32> -> vector<2x16x512xf32>
    %12 = vector.extract_strided_slice %8 {offsets = [0, 1, 0], sizes = [2, 15, 512], strides = [1, 1, 1]} : vector<2x16x512xf32> to vector<2x15x512xf32>
    %13 = tpu.concatenate %12, %9 in 1 : vector<2x15x512xf32>, vector<2x1x512xf32> -> vector<2x16x512xf32>
    %14 = arith.addf %7, %11 : vector<2x16x512xf32>
    %15 = arith.addf %14, %13 : vector<2x16x512xf32>
    %cst_5 = arith.constant 0.000000e+00 : f32
    %16 = vector.broadcast %cst_5 : f32 to vector<2x16x512xf32>
    %17 = arith.maximumf %15, %16 : vector<2x16x512xf32>
    %18 = arith.truncf %17 : vector<2x16x512xf32> to vector<2x16x512xbf16>
    %19 = vector.shape_cast %18 : vector<2x16x512xbf16> to vector<32x512xbf16>
    %c0_6 = arith.constant 0 : index
    %c0_7 = arith.constant 0 : index
    %20 = vector.load %arg3[%c0_6, %c0_7] : memref<512x1536xbf16, #tpu.memory_space<vmem>>, vector<512x1536xbf16>
    %cst_8 = arith.constant dense<0.000000e+00> : vector<32x1536xf32>
    %21 = tpu.matmul %19, %20, %cst_8 {dimension_numbers = #tpu.dot_dimension_numbers<[1], [0], [0], [1], [0, 0, 1, 1], [], []>} : vector<32x512xbf16>, vector<512x1536xbf16>, vector<32x1536xf32> -> vector<32x1536xf32>
    %22 = vector.shape_cast %21 : vector<32x1536xf32> to vector<2x16x1536xf32>
    %23 = vector.extract_strided_slice %22 {offsets = [0, 0, 0], sizes = [2, 16, 512], strides = [1, 1, 1]} : vector<2x16x1536xf32> to vector<2x16x512xf32>
    %24 = vector.extract_strided_slice %22 {offsets = [0, 0, 512], sizes = [2, 16, 512], strides = [1, 1, 1]} : vector<2x16x1536xf32> to vector<2x16x512xf32>
    %25 = vector.extract_strided_slice %22 {offsets = [0, 0, 1024], sizes = [2, 16, 512], strides = [1, 1, 1]} : vector<2x16x1536xf32> to vector<2x16x512xf32>
    %cst_9 = arith.constant 0.000000e+00 : f32
    %26 = vector.broadcast %cst_9 : f32 to vector<2x1x512xf32>
    %27 = vector.extract_strided_slice %23 {offsets = [0, 0, 0], sizes = [2, 15, 512], strides = [1, 1, 1]} : vector<2x16x512xf32> to vector<2x15x512xf32>
    %28 = tpu.concatenate %26, %27 in 1 : vector<2x1x512xf32>, vector<2x15x512xf32> -> vector<2x16x512xf32>
    %29 = vector.extract_strided_slice %25 {offsets = [0, 1, 0], sizes = [2, 15, 512], strides = [1, 1, 1]} : vector<2x16x512xf32> to vector<2x15x512xf32>
    %30 = tpu.concatenate %29, %26 in 1 : vector<2x15x512xf32>, vector<2x1x512xf32> -> vector<2x16x512xf32>
    %31 = arith.addf %24, %28 : vector<2x16x512xf32>
    %32 = arith.addf %31, %30 : vector<2x16x512xf32>
    %cst_10 = arith.constant dense<0.000000e+00> : vector<2x512xf32>
    %33 = vector.multi_reduction <add>, %32, %cst_10 [1] : vector<2x16x512xf32> to vector<2x512xf32>
    %34 = vector.extract_strided_slice %33 {offsets = [0, 0], sizes = [2, 32], strides = [1, 1]} : vector<2x512xf32> to vector<2x32xf32>
    %35 = vector.extract_strided_slice %33 {offsets = [0, 32], sizes = [2, 32], strides = [1, 1]} : vector<2x512xf32> to vector<2x32xf32>
    %36 = arith.addf %34, %35 : vector<2x32xf32>
    %37 = vector.extract_strided_slice %33 {offsets = [0, 64], sizes = [2, 32], strides = [1, 1]} : vector<2x512xf32> to vector<2x32xf32>
    %38 = arith.addf %36, %37 : vector<2x32xf32>
    %39 = vector.extract_strided_slice %33 {offsets = [0, 96], sizes = [2, 32], strides = [1, 1]} : vector<2x512xf32> to vector<2x32xf32>
    %40 = arith.addf %38, %39 : vector<2x32xf32>
    %41 = vector.extract_strided_slice %33 {offsets = [0, 128], sizes = [2, 32], strides = [1, 1]} : vector<2x512xf32> to vector<2x32xf32>
    %42 = arith.addf %40, %41 : vector<2x32xf32>
    %43 = vector.extract_strided_slice %33 {offsets = [0, 160], sizes = [2, 32], strides = [1, 1]} : vector<2x512xf32> to vector<2x32xf32>
    %44 = arith.addf %42, %43 : vector<2x32xf32>
    %45 = vector.extract_strided_slice %33 {offsets = [0, 192], sizes = [2, 32], strides = [1, 1]} : vector<2x512xf32> to vector<2x32xf32>
    %46 = arith.addf %44, %45 : vector<2x32xf32>
    %47 = vector.extract_strided_slice %33 {offsets = [0, 224], sizes = [2, 32], strides = [1, 1]} : vector<2x512xf32> to vector<2x32xf32>
    %48 = arith.addf %46, %47 : vector<2x32xf32>
    %49 = vector.extract_strided_slice %33 {offsets = [0, 256], sizes = [2, 32], strides = [1, 1]} : vector<2x512xf32> to vector<2x32xf32>
    %50 = arith.addf %48, %49 : vector<2x32xf32>
    %51 = vector.extract_strided_slice %33 {offsets = [0, 288], sizes = [2, 32], strides = [1, 1]} : vector<2x512xf32> to vector<2x32xf32>
    %52 = arith.addf %50, %51 : vector<2x32xf32>
    %53 = vector.extract_strided_slice %33 {offsets = [0, 320], sizes = [2, 32], strides = [1, 1]} : vector<2x512xf32> to vector<2x32xf32>
    %54 = arith.addf %52, %53 : vector<2x32xf32>
    %55 = vector.extract_strided_slice %33 {offsets = [0, 352], sizes = [2, 32], strides = [1, 1]} : vector<2x512xf32> to vector<2x32xf32>
    %56 = arith.addf %54, %55 : vector<2x32xf32>
    %57 = vector.extract_strided_slice %33 {offsets = [0, 384], sizes = [2, 32], strides = [1, 1]} : vector<2x512xf32> to vector<2x32xf32>
    %58 = arith.addf %56, %57 : vector<2x32xf32>
    %59 = vector.extract_strided_slice %33 {offsets = [0, 416], sizes = [2, 32], strides = [1, 1]} : vector<2x512xf32> to vector<2x32xf32>
    %60 = arith.addf %58, %59 : vector<2x32xf32>
    %61 = vector.extract_strided_slice %33 {offsets = [0, 448], sizes = [2, 32], strides = [1, 1]} : vector<2x512xf32> to vector<2x32xf32>
    %62 = arith.addf %60, %61 : vector<2x32xf32>
    %63 = vector.extract_strided_slice %33 {offsets = [0, 480], sizes = [2, 32], strides = [1, 1]} : vector<2x512xf32> to vector<2x32xf32>
    %64 = arith.addf %62, %63 : vector<2x32xf32>
    %cst_11 = arith.constant 3.906250e-03 : f32
    %65 = vector.broadcast %cst_11 : f32 to vector<2x32xf32>
    %66 = arith.mulf %64, %65 : vector<2x32xf32>
    %67 = vector.shape_cast %66 : vector<2x32xf32> to vector<2x1x32xf32>
    %c0_12 = arith.constant 0 : index
    %c0_13 = arith.constant 0 : index
    %68 = vector.load %arg4[%c0_12, %c0_13] : memref<4x32xf32, #tpu.memory_space<vmem>>, vector<4x32xf32>
    %69 = vector.shape_cast %68 : vector<4x32xf32> to vector<1x4x32xf32>
    %70 = vector.broadcast %67 : vector<2x1x32xf32> to vector<2x4x32xf32>
    %71 = vector.broadcast %69 : vector<1x4x32xf32> to vector<2x4x32xf32>
    %72 = arith.mulf %70, %71 : vector<2x4x32xf32>
    %cst_14 = arith.constant dense<0.000000e+00> : vector<2x4xf32>
    %73 = vector.multi_reduction <add>, %72, %cst_14 [2] : vector<2x4x32xf32> to vector<2x4xf32>
    %cst_15 = arith.constant 0.000000e+00 : f32
    %74 = vector.broadcast %cst_15 : f32 to vector<2x4xf32>
    %75 = arith.maximumf %73, %74 : vector<2x4xf32>
    %76 = vector.shape_cast %75 : vector<2x4xf32> to vector<2x4x1xf32>
    %c0_16 = arith.constant 0 : index
    %c0_17 = arith.constant 0 : index
    %77 = vector.load %arg5[%c0_16, %c0_17] : memref<4x32xf32, #tpu.memory_space<vmem>>, vector<4x32xf32>
    %78 = vector.shape_cast %77 : vector<4x32xf32> to vector<1x4x32xf32>
    %79 = vector.broadcast %76 : vector<2x4x1xf32> to vector<2x4x32xf32>
    %80 = vector.broadcast %78 : vector<1x4x32xf32> to vector<2x4x32xf32>
    %81 = arith.mulf %79, %80 : vector<2x4x32xf32>
    %cst_18 = arith.constant dense<0.000000e+00> : vector<2x32xf32>
    %82 = vector.multi_reduction <add>, %81, %cst_18 [1] : vector<2x4x32xf32> to vector<2x32xf32>
    %83 = arith.negf %82 : vector<2x32xf32>
    %84 = math.exp %83 : vector<2x32xf32>
    %cst_19 = arith.constant 1.000000e+00 : f32
    %85 = vector.broadcast %cst_19 : f32 to vector<2x32xf32>
    %86 = arith.addf %85, %84 : vector<2x32xf32>
    %87 = arith.divf %85, %86 : vector<2x32xf32>
    %88 = tpu.concatenate %87, %87, %87, %87, %87, %87, %87, %87, %87, %87, %87, %87, %87, %87, %87, %87 in 1 : vector<2x32xf32>, vector<2x32xf32>, vector<2x32xf32>, vector<2x32xf32>, vector<2x32xf32>, vector<2x32xf32>, vector<2x32xf32>, vector<2x32xf32>, vector<2x32xf32>, vector<2x32xf32>, vector<2x32xf32>, vector<2x32xf32>, vector<2x32xf32>, vector<2x32xf32>, vector<2x32xf32>, vector<2x32xf32> -> vector<2x512xf32>
    %89 = vector.shape_cast %88 : vector<2x512xf32> to vector<2x1x512xf32>
    %90 = vector.broadcast %89 : vector<2x1x512xf32> to vector<2x16x512xf32>
    %91 = arith.mulf %32, %90 : vector<2x16x512xf32>
    %92 = arith.addf %91, %0 : vector<2x16x512xf32>
    %c0_20 = arith.constant 0 : index
    %c0_21 = arith.constant 0 : index
    %c0_22 = arith.constant 0 : index
    %93 = vector.load %arg6[%c0_20, %c0_21, %c0_22] : memref<2x16x512xf32, #tpu.memory_space<vmem>>, vector<2x16x512xf32>
    tpu.vector_store %arg6[%c0_20, %c0_21, %c0_22], %92 {strides = array<i32>} : memref<2x16x512xf32, #tpu.memory_space<vmem>>, vector<2x16x512xf32>,
    return
  }
  func.func @transform_0(%arg0: i32) -> (i32, i32, i32) {
    %c0_i32 = arith.constant 0 : i32
    %c0_i32_0 = arith.constant 0 : i32
    %c0_i32_1 = arith.constant 0 : i32
    return %arg0, %c0_i32, %c0_i32_0 : i32, i32, i32
  }
  func.func @transform_1(%arg0: i32) -> (i32, i32) {
    %c0_i32 = arith.constant 0 : i32
    %c0_i32_0 = arith.constant 0 : i32
    %c0_i32_1 = arith.constant 0 : i32
    return %c0_i32, %c0_i32_0 : i32, i32
  }
  func.func @transform_2(%arg0: i32) -> (i32, i32) {
    %c0_i32 = arith.constant 0 : i32
    %c0_i32_0 = arith.constant 0 : i32
    %c0_i32_1 = arith.constant 0 : i32
    return %c0_i32, %c0_i32_0 : i32, i32
  }
  func.func @transform_3(%arg0: i32) -> (i32, i32) {
    %c0_i32 = arith.constant 0 : i32
    %c0_i32_0 = arith.constant 0 : i32
    %c0_i32_1 = arith.constant 0 : i32
    return %c0_i32, %c0_i32_0 : i32, i32
  }
  func.func @transform_4(%arg0: i32) -> (i32, i32) {
    %c0_i32 = arith.constant 0 : i32
    %c0_i32_0 = arith.constant 0 : i32
    %c0_i32_1 = arith.constant 0 : i32
    return %c0_i32, %c0_i32_0 : i32, i32
  }
  func.func @transform_5(%arg0: i32) -> (i32, i32, i32) {
    %c0_i32 = arith.constant 0 : i32
    %c0_i32_0 = arith.constant 0 : i32
    %c0_i32_1 = arith.constant 0 : i32
    return %arg0, %c0_i32, %c0_i32_0 : i32, i32, i32
  }
}

</mosaic_0001>

<bundles_post_ra>
// kernel: tpu_custom_call.1
= control target key start
LH: loop header
LB: loop body
LE: loop exit
PB: predicated region body
PF: predicated region fallthrough
CT: control target
= control target key end

     0   :  { %10 = vsyncpa [#allocation3], 0  ;;  %s10350_s0 = inlined_call_operand.hbm [shape: f32[4,16,512], index: 0, kind: input, shape index: {}]   ;;  %s10351_s1 = inlined_call_operand.hbm [shape: bf16[512,1536], index: 1, kind: input, shape index: {}]   ;;  %s10352_s2 = inlined_call_operand.hbm [shape: bf16[512,1536], index: 2, kind: input, shape index: {}]   ;;  %s10353_s3 = inlined_call_operand.hbm [shape: f32[4,32], index: 3, kind: input, shape index: {}]   ;;  %s10354_s4 = inlined_call_operand.hbm [shape: f32[4,32], index: 4, kind: input, shape index: {}]   ;;  %s10355_s5 = inlined_call_operand.hbm [shape: f32[4,16,512], index: 5, kind: output, shape index: {}]  }
   0x1   :  { %12 = vsyncpa [#allocation3 + $0x1], 0 }
   0x2   :  { %13 = vsyncpa [#allocation6], 0 }
   0x3   :  { %14 = vsyncpa [#allocation9], 0 }
   0x4   :  { %15 = vsyncpa [#allocation4], 0 }
   0x5   :  { %17 = vsyncpa [#allocation4 + $0x1], 0  ;;  %s9455_s18 = smov 0   ;;  %s9457_s19 = smov 0  }
   0x6   :  { %s9459_s20 = smov 0   ;;  %s9461_s21 = smov 0  }
   0x7 LB: > { %s9476_s22 = sadd.s32 4294967295, %s9408_s21   ;;  %s7026_s23 = sadd.s32 4294967294, %s9408_s21   ;;  %s9408_s21 = sphi %s9461_s21, %s10378_s21   ;;  %s9404_s20 = sphi %s9459_s20, %s10377_s20   ;;  %s9400_s19 = sphi %s9457_s19, %s10376_s19   ;;  %s9396_s18 = sphi %s9455_s18, %s10375_s18  }
   0x8   : > { %p43_p0 = scmp.ne.s32.totalorder %s9400_s19, %s9396_s18  ;;  %p10356_p1 = scmp.eq.s32.totalorder %s9476_s22, 0 }
   0x9   : > { %p157_p3 = scmp.eq.s32.totalorder %s7026_s23, 1  ;;  %p7027_p5 = scmp.ge.s32.totalorder %s9408_s21, 1 }
   0xa   : > { %p9485_p4 = por %p10356_p1, %p43_p0  ;;  %p164_p7 = scmp.lt.s32.totalorder %s9408_s21, 3 }
   0xb   : > { %p9490_p6 = por %p157_p3, %p43_p0  ;;  %s9410_s27 = smov [#allocation5]  }
   0xc   : > { %s10359_s24 = scalar_select %p9485_p4, 1, 0 }
   0xd   : > { %s10360_s25 = scalar_select %p9490_p6, 1, 0 }
   0xe   : > { %p9495_p8 = pnand %p7027_p5, %p164_p7  ;;  %s176_s28 = sshll.u32 %s9410_s27, 4  ;;  %s9499_s28 = int_to_ptr.vmem [resolvable:$true] %s176_s28 }
   0xf   : > { %s9411_s30 = smov [#allocation8]   ;;  %s9412_s7 = smov [#allocation7]  }
  0x10   : > { %s10361_s26 = scalar_select %p9495_p8, 1, 0 }
  0x11   : > { %p7940_p9 = pneg %p9495_p8  ;;  %s203_s6 = sshll.u32 %s9411_s30, 4  ;;  %s9510_s6 = int_to_ptr.vmem [resolvable:$true] %s203_s6 }
  0x12   : > { %s9512_s8 = sshll.u32 %s9412_s7, 4  ;;  %s9192_s11 = scalar_lea.hbm %s10351_s1, 49152  ;;  %s190_s8 = int_to_ptr.vmem [resolvable:$true] %s9512_s8 }
  0x13   : > { %p9506_p11 = pnand %p7940_p9, %p10356_p1  ;;  %p9193_p12 = scmp.ne.s32.totalorder %s10351_s1, %s9192_s11 }
  0x14   : > { %p9199_p5 = scmp.lt.u32.totalorder %s9192_s11, %s10351_s1 }
  0x15   : > { %p9522_p13 = pneg %p9506_p11 }
  0x17   : > { %p9195_p0 = pnand %p9522_p13, %p9193_p12 }
  0x19   : > { %p9196_p3 = pneg %p9195_p0 }
  0x1b   : > { %p9201_p7 = pnand %p9199_p5, %p9196_p3 }
  0x1d   : > { %9204 = shalt.err (!%p9201_p7)
}
  0x1e   : > { %s9205_s17 = scalar_lea.vmem %s9499_s28, 49152  ;;  %p9213_p2 = scmp.lt.s32.totalorder %s9499_s28, %s9499_s28 }
  0x1f   : > { %p9206_p9 = scmp.ne.s32.totalorder %s9499_s28, %s9205_s17  ;;  %p9214_p6 = scmp.lt.s32.totalorder %s9205_s17, %s9205_s17 }
  0x21   : > { %p9208_p10 = pnand %p9206_p9, %p9522_p13  ;;  %p9215_p12 = por %p9214_p6, %p9213_p2 }
  0x23   : > { %p9209_p1 = pneg %p9208_p10 }
  0x25   : > { %p9216_p0 = pnand %p9215_p12, %p9209_p1 }
  0x27   : > { %9219 = shalt.err (!%p9216_p0)
}
  0x28   : > { %s9413_s23 = smov 768   ;;  %s9414_s27 = smov 48  }
  0x29   : > { %7943 = dma.hbm_to_vmem [thread:$0]  (!%p9506_p11), %s10351_s1, 49152, %s9499_s28, [#allocation6], %s9413_s23, %s9413_s23, %s9414_s27  }
  0x2a   : > { %s9220_s11 = scalar_lea.hbm %s10353_s3, 64 }
  0x2b   : > { %p9221_p1 = scmp.ne.s32.totalorder %s10353_s3, %s9220_s11  ;;  %p9227_p10 = scmp.lt.u32.totalorder %s9220_s11, %s10353_s3 }
  0x2d   : > { %p9223_p2 = pnand %p9221_p1, %p9522_p13 }
  0x2f   : > { %p9224_p6 = pneg %p9223_p2 }
  0x31   : > { %p9229_p3 = pnand %p9227_p10, %p9224_p6 }
  0x33   : > { %9232 = shalt.err (!%p9229_p3)
}
  0x34   : > { %s9233_s28 = scalar_lea.vmem %s9510_s6, 64  ;;  %p9241_p12 = scmp.lt.s32.totalorder %s9510_s6, %s9510_s6 }
  0x35   : > { %p9234_p5 = scmp.ne.s32.totalorder %s9510_s6, %s9233_s28  ;;  %p9242_p0 = scmp.lt.s32.totalorder %s9233_s28, %s9233_s28 }
  0x37   : > { %p9236_p7 = pnand %p9234_p5, %p9522_p13  ;;  %p9243_p1 = por %p9242_p0, %p9241_p12 }
  0x39   : > { %p9237_p9 = pneg %p9236_p7 }
  0x3b   : > { %p9244_p2 = pnand %p9243_p1, %p9237_p9 }
  0x3d   : > { %9247 = shalt.err (!%p9244_p2)
}
  0x3e   : > { %7949 = dma.hbm_to_vmem [thread:$0]  (!%p9506_p11), %s10353_s3, 64, %s9510_s6, [#allocation9]  }
  0x3f   : > { %s9248_s10 = scalar_lea.hbm %s10352_s2, 49152 }
  0x40   : > { %p9249_p6 = scmp.ne.s32.totalorder %s10352_s2, %s9248_s10  ;;  %p9255_p5 = scmp.lt.u32.totalorder %s9248_s10, %s10352_s2 }
  0x42   : > { %p9251_p10 = pnand %p9249_p6, %p9522_p13 }
  0x44   : > { %p9252_p3 = pneg %p9251_p10 }
  0x46   : > { %p9257_p7 = pnand %p9255_p5, %p9252_p3 }
  0x48   : > { %9260 = shalt.err (!%p9257_p7)
}
  0x49   : > { %s9261_s16 = scalar_lea.vmem %s190_s8, 49152  ;;  %p9269_p1 = scmp.lt.s32.totalorder %s190_s8, %s190_s8 }
  0x4a   : > { %p9262_p9 = scmp.ne.s32.totalorder %s190_s8, %s9261_s16  ;;  %p9270_p2 = scmp.lt.s32.totalorder %s9261_s16, %s9261_s16 }
  0x4c   : > { %p9264_p12 = pnand %p9262_p9, %p9522_p13  ;;  %p9271_p4 = por %p9270_p2, %p9269_p1 }
  0x4e   : > { %p9265_p0 = pneg %p9264_p12 }
  0x50   : > { %p9272_p8 = pnand %p9271_p4, %p9265_p0 }
  0x52   : > { %9275 = shalt.err (!%p9272_p8)
}
  0x53   : > { %7946 = dma.hbm_to_vmem [thread:$0]  (!%p9506_p11), %s10352_s2, 49152, %s190_s8, [#allocation6], %s9413_s23, %s9413_s23, %s9414_s27  }
  0x54   : > { %s9415_s17 = smov [#allocation10]   ;;  %s9276_s10 = scalar_lea.hbm %s10354_s4, 64 }
  0x55   : > { %s214_s30 = sshll.u32 %s9415_s17, 4  ;;  %p9277_p4 = scmp.ne.s32.totalorder %s10354_s4, %s9276_s10  ;;  %s215_s30 = int_to_ptr.vmem [resolvable:$true] %s214_s30 }
  0x56   : > { %p9283_p10 = scmp.lt.u32.totalorder %s9276_s10, %s10354_s4 }
  0x57   : > { %p9279_p8 = pnand %p9277_p4, %p9522_p13 }
  0x59   : > { %p9280_p6 = pneg %p9279_p8 }
  0x5b   : > { %p9285_p3 = pnand %p9283_p10, %p9280_p6 }
  0x5d   : > { %9288 = shalt.err (!%p9285_p3)
}
  0x5e   : > { %s9289_s8 = scalar_lea.vmem %s215_s30, 64  ;;  %p9297_p12 = scmp.lt.s32.totalorder %s215_s30, %s215_s30 }
  0x5f   : > { %p9290_p5 = scmp.ne.s32.totalorder %s215_s30, %s9289_s8  ;;  %p9298_p0 = scmp.lt.s32.totalorder %s9289_s8, %s9289_s8 }
  0x61   : > { %p9292_p7 = pnand %p9290_p5, %p9522_p13  ;;  %p9299_p1 = por %p9298_p0, %p9297_p12 }
  0x63   : > { %p9293_p9 = pneg %p9292_p7 }
  0x65   : > { %p9300_p2 = pnand %p9299_p1, %p9293_p9 }
  0x67   : > { %9303 = shalt.err (!%p9300_p2)
}
  0x68   : > { %7952 = dma.hbm_to_vmem [thread:$0]  (!%p9506_p11), %s10354_s4, 64, %s215_s30, [#allocation9]  }
  0x69   : > { %s9610_s14 = sadd.s32 1, %s9408_s21   ;;  %s30_s16 = sadd.s32 1, %s9404_s20 }
  0x6a   : > { %s27_s29 = ssub.s32 %s9408_s21, %s9610_s14  ;;  %p37_p13 = scmp.ne.s32.totalorder %s9404_s20, %s9400_s19 }
  0x6b   : > { %p28_p4 = scmp.eq.s32.totalorder %s27_s29, 0  ;;  %p38_p8 = scmp.eq.s32.totalorder %s9408_s21, 0 }
  0x6c   : > { %p10364_p6 = scmp.eq.s32.totalorder %s9476_s22, 1  ;;  %p7965_p3 = scmp.lt.s32.totalorder %s9408_s21, 2 }
  0x6d   : > { %s9626_s28 = scalar_select %p28_p4, %s9404_s20, %s30_s16  }
  0x6e   : > { %p9620_p10 = por %p10364_p6, %p37_p13  ;;  %p39_p5 = por %p38_p8, %p37_p13 }
  0x6f   : > { %s225_s17 = sand.u32 1, %s9404_s20   ;;  %s7821_s30 = sshll.u32 %s9408_s21, 11 }
  0x70   : > { %s7033_s7 = sshll.u32 %s225_s17, 7  ;;  %s9633_s11 = scalar_lea.hbm %s10350_s0, %s7821_s30 }
  0x71   : > { %s229_s12 = scalar_lea.vmem [#allocation2], %s7033_s7  ;;  %p9637_p11 = pnand %p7965_p3, %p39_p5 }
  0x72   : > { %s237_s13 = sshll.u32 %s229_s12, 4  ;;  %s9641_s8 = scalar_lea.sflag [#allocation3], %s225_s17  ;;  %s9635_s13 = int_to_ptr.vmem [resolvable:$true] %s237_s13 }
  0x73   : > { %s9304_s23 = scalar_lea.hbm %s9633_s11, 2048  ;;  %p9306_p9 = pneg %p9637_p11 }
  0x74   : > { %p9305_p7 = scmp.ne.s32.totalorder %s9633_s11, %s9304_s23  ;;  %s9309_s29 = scalar_lea.hbm %s10350_s0, 4096 }
  0x75   : > { %p9310_p1 = scmp.lt.u32.totalorder %s9633_s11, %s10350_s0  ;;  %p9311_p2 = scmp.lt.u32.totalorder %s9309_s29, %s9304_s23 }
  0x76   : > { %p9307_p12 = pnand %p9306_p9, %p9305_p7  ;;  %p9313_p4 = scmp.lt.u32.totalorder %s9304_s23, %s9633_s11 }
  0x77   : > { %p9312_p13 = por %p9311_p2, %p9310_p1 }
  0x78   : > { %p9308_p0 = pneg %p9307_p12 }
  0x79   : > { %p9314_p8 = por %p9313_p4, %p9312_p13 }
  0x7b   : > { %p9315_p6 = pnand %p9314_p8, %p9308_p0 }
  0x7d   : > { %9318 = shalt.err (!%p9315_p6)
}
  0x7e   : > { %s9319_s17 = scalar_lea.vmem %s9635_s13, 2048  ;;  %s9416_s9 = smov [#allocation2]  }
  0x7f   : > { %p9320_p3 = scmp.ne.s32.totalorder %s9635_s13, %s9319_s17  ;;  %s9324_s10 = sshll.u32 %s9416_s9, 4  ;;  %s9325_s10 = int_to_ptr.vmem [resolvable:$false] %s9324_s10 }
  0x80   : > { %s9326_s12 = scalar_lea.vmem %s9325_s10, 4096  ;;  %p9327_p12 = scmp.lt.s32.totalorder %s9635_s13, %s9325_s10 }
  0x81   : > { %p9322_p5 = pnand %p9320_p3, %p9306_p9  ;;  %p9328_p1 = scmp.lt.s32.totalorder %s9326_s12, %s9319_s17 }
  0x83   : > { %p9323_p7 = pneg %p9322_p5  ;;  %p9329_p2 = por %p9328_p1, %p9327_p12 }
  0x85   : > { %p9330_p13 = pnand %p9329_p2, %p9323_p7 }
  0x87   : > { %9333 = shalt.err (!%p9330_p13)
}
  0x88   : > { %s9417_s23 = smov 512   ;;  %s9418_s27 = smov 32  }
  0x89   : > { %7956 = dma.hbm_to_vmem [thread:$0]  (!%p9637_p11), %s9633_s11, 2048, %s9635_s13, %s9641_s8, %s9417_s23, %s9417_s23, %s9418_s27  }
  0x8a   : > { %p10367_p9 = scmp.ne.s32.totalorder %s10361_s26, 0 }
  0x8b   : > { %s9672_s16 = sand.u32 (!%p10367_p9), 1, %s9400_s19   ;;  %p10368_p0 = scmp.ne.s32.totalorder (!%p10367_p9), %s10359_s24, 0 }
  0x8c   : > { %249 = sbr.rel (%p10367_p9) target bundleno = 1841 (0x731), region = 40  ;;  %s7038_s29 = sshll.u32 (!%p10367_p9), %s9672_s16, 7 }
  0x8d   : > { %s252_s7 = scalar_lea.sflag (!%p10367_p9), [#allocation3], %s9672_s16  ;;  %s9678_s30 = scalar_lea.vmem (!%p10367_p9), [#allocation2], %s7038_s29 }
  0x93   : > { %9379 = dma.done.wait (%p10368_p0), %s252_s7, 2048  }
  0x94   : > { %9381 = vsyncadd (%p10368_p0), %s252_s7, 4294965248  ;;  %p10369_p11 = scmp.eq.s32.totalorder %s9476_s22, 0 }
  0x96   : > { %9383 = dma.done.wait (%p10369_p11), [#allocation6], 98304   ;;  %p10370_p4 = pmov %p10369_p11 }
  0x98   : > { %9385 = vsyncadd (%p10370_p4), [#allocation6], 4294868992  ;;  %p10371_p8 = pmov %p10370_p4 }
  0x99   : > { %p10372_p6 = pmov %p10370_p4 }
  0x9a   : > { %9387 = dma.done.wait (%p10371_p8), [#allocation9], 128  }
  0x9b   : > { %9389 = vsyncadd (%p10372_p6), [#allocation9], 4294967168  ;;  %v8016_v0 = vld [vmem:[#allocation5 + $0x4] ss:$48 sps:$4 sm:$0xff]   ;;  %v8018_v1 = vld [vmem:[#allocation5 + $0xc] ss:$48 sps:$4 sm:$0xff]  }
  0x9c   : > { %2628 = vmatprep.subr.bf16.mxu0 %v8016_v0  ;;  %v8020_v2 = vld [vmem:[#allocation5] ss:$48 sps:$4 sm:$0xff]   ;;  %v8021_v3 = vld [vmem:[#allocation5 + $0x8] ss:$48 sps:$4 sm:$0xff]   ;;  %2734 = vmatprep.subr.bf16.mxu1 %v8018_v1  ;;  %v8022_v4 = vld [vmem:[#allocation5 + $0x64] ss:$48 sps:$4 sm:$0xff]  }
  0x9d   : > { %2629 = vmatpush1.bf16.msra.mxu0 %v8020_v2  ;;  %2735 = vmatpush1.bf16.msra.mxu1 %v8021_v3  ;;  %v8024_v5 = vld [vmem:[#allocation5 + $0x6c] ss:$48 sps:$4 sm:$0xff]   ;;  %v8026_v6 = vld [vmem:[#allocation5 + $0x60] ss:$48 sps:$4 sm:$0xff]   ;;  %v8027_v7 = vld [vmem:[#allocation5 + $0x68] ss:$48 sps:$4 sm:$0xff]  }
  0x9e   : > { %2630 = vmatprep.subr.bf16.mxu0 %v8022_v4  ;;  %2736 = vmatprep.subr.bf16.mxu1 %v8024_v5  ;;  %v8028_v8 = vld [vmem:[#allocation5 + $0xc4] ss:$48 sps:$4 sm:$0xff]   ;;  %v8030_v9 = vld [vmem:[#allocation5 + $0xcc] ss:$48 sps:$4 sm:$0xff]   ;;  %v8032_v10 = vld [vmem:[#allocation5 + $0xc0] ss:$48 sps:$4 sm:$0xff]  }
  0x9f   : > { %v8033_v11 = vld [vmem:[#allocation5 + $0xc8] ss:$48 sps:$4 sm:$0xff]   ;;  %v8034_v12 = vld [vmem:[#allocation5 + $0x124] ss:$48 sps:$4 sm:$0xff]   ;;  %v8036_v13 = vld [vmem:[#allocation5 + $0x12c] ss:$48 sps:$4 sm:$0xff]  }
  0xa0   : > { %v8038_v14 = vld [vmem:[#allocation5 + $0x120] ss:$48 sps:$4 sm:$0xff]   ;;  %v8039_v15 = vld [vmem:[#allocation5 + $0x128] ss:$48 sps:$4 sm:$0xff]   ;;  %v8040_v16 = vld [vmem:[#allocation5 + $0x184] ss:$48 sps:$4 sm:$0xff]  }
  0xa1   : > { %2631 = vmatpush1.bf16.msra.mxu0 %v8026_v6  ;;  %2737 = vmatpush1.bf16.msra.mxu1 %v8027_v7  ;;  %v8042_v17 = vld [vmem:[#allocation5 + $0x18c] ss:$48 sps:$4 sm:$0xff]   ;;  %v8044_v18 = vld [vmem:[#allocation5 + $0x180] ss:$48 sps:$4 sm:$0xff]   ;;  %v8045_v19 = vld [vmem:[#allocation5 + $0x188] ss:$48 sps:$4 sm:$0xff]  }
  0xa2   : > { %2632 = vmatprep.subr.bf16.mxu0 %v8028_v8  ;;  %2738 = vmatprep.subr.bf16.mxu1 %v8030_v9  ;;  %v8046_v20 = vld [vmem:[#allocation5 + $0x1e4] ss:$48 sps:$4 sm:$0xff]   ;;  %v8048_v21 = vld [vmem:[#allocation5 + $0x1ec] ss:$48 sps:$4 sm:$0xff]   ;;  %v8050_v22 = vld [vmem:[#allocation5 + $0x1e0] ss:$48 sps:$4 sm:$0xff]  }
  0xa3   : > { %v8051_v23 = vld [vmem:[#allocation5 + $0x1e8] ss:$48 sps:$4 sm:$0xff]   ;;  %v8052_v24 = vld [vmem:[#allocation5 + $0x244] ss:$48 sps:$4 sm:$0xff]   ;;  %v8054_v25 = vld [vmem:[#allocation5 + $0x24c] ss:$48 sps:$4 sm:$0xff]  }
  0xa4   : > { %v8056_v26 = vld [vmem:[#allocation5 + $0x240] ss:$48 sps:$4 sm:$0xff]   ;;  %v8057_v27 = vld [vmem:[#allocation5 + $0x248] ss:$48 sps:$4 sm:$0xff]   ;;  %v8058_v28 = vld [vmem:[#allocation5 + $0x2a4] ss:$48 sps:$4 sm:$0xff]  }
  0xa5   : > { %2633 = vmatpush1.bf16.msra.mxu0 %v8032_v10  ;;  %2739 = vmatpush1.bf16.msra.mxu1 %v8033_v11  ;;  %v8060_v29 = vld [vmem:[#allocation5 + $0x2ac] ss:$48 sps:$4 sm:$0xff]   ;;  %v8062_v30 = vld [vmem:[#allocation5 + $0x2a0] ss:$48 sps:$4 sm:$0xff]   ;;  %v8063_v31 = vld [vmem:[#allocation5 + $0x2a8] ss:$48 sps:$4 sm:$0xff]  }
  0xa6   : > { %2634 = vmatprep.subr.bf16.mxu0 %v8034_v12  ;;  %2740 = vmatprep.subr.bf16.mxu1 %v8036_v13  ;;  %v8064_v32 = vld [vmem:[#allocation5 + $0x304] ss:$48 sps:$4 sm:$0xff]   ;;  %v8066_v33 = vld [vmem:[#allocation5 + $0x30c] ss:$48 sps:$4 sm:$0xff]   ;;  %v8068_v34 = vld [vmem:[#allocation5 + $0x300] ss:$48 sps:$4 sm:$0xff]  }
  0xa7   : > { %v8069_v35 = vld [vmem:[#allocation5 + $0x308] ss:$48 sps:$4 sm:$0xff]   ;;  %v8070_v36 = vld [vmem:[#allocation5 + $0x364] ss:$48 sps:$4 sm:$0xff]   ;;  %v8072_v37 = vld [vmem:[#allocation5 + $0x36c] ss:$48 sps:$4 sm:$0xff]  }
  0xa8   : > { %v8074_v38 = vld [vmem:[#allocation5 + $0x360] ss:$48 sps:$4 sm:$0xff]   ;;  %v8075_v39 = vld [vmem:[#allocation5 + $0x368] ss:$48 sps:$4 sm:$0xff]   ;;  %v8076_v40 = vld [vmem:[#allocation5 + $0x3c4] ss:$48 sps:$4 sm:$0xff]  }
  0xa9   : > { %2635 = vmatpush1.bf16.msra.mxu0 %v8038_v14  ;;  %2741 = vmatpush1.bf16.msra.mxu1 %v8039_v15  ;;  %v8078_v41 = vld [vmem:[#allocation5 + $0x3cc] ss:$48 sps:$4 sm:$0xff]   ;;  %v8080_v42 = vld [vmem:[#allocation5 + $0x3c0] ss:$48 sps:$4 sm:$0xff]   ;;  %v8081_v43 = vld [vmem:[#allocation5 + $0x3c8] ss:$48 sps:$4 sm:$0xff]  }
  0xaa   : > { %2636 = vmatprep.subr.bf16.mxu0 %v8040_v16  ;;  %2742 = vmatprep.subr.bf16.mxu1 %v8042_v17  ;;  %v8082_v44 = vld [vmem:[#allocation5 + $0x424] ss:$48 sps:$4 sm:$0xff]   ;;  %v8084_v45 = vld [vmem:[#allocation5 + $0x42c] ss:$48 sps:$4 sm:$0xff]   ;;  %v8086_v48 = vld [vmem:[#allocation5 + $0x420] ss:$48 sps:$4 sm:$0xff]  }
  0xab   : > { %v301_v46 = vld [vmem:[%s9678_s30 + $0x8] sm:$0xff]  ;;  %v8088_v51 = vld [vmem:[#allocation5 + $0x484] ss:$48 sps:$4 sm:$0xff]   ;;  %v8092_v53 = vld [vmem:[#allocation5 + $0x480] ss:$48 sps:$4 sm:$0xff]   ;;  %vm3280_vm0 = vcmask 1040384  }
  0xac   : > { %v305_v47 = vld [vmem:[%s9678_s30 + $0x28] sm:$0xff]  ;;  %v8094_v55 = vld [vmem:[#allocation5 + $0x4e4] ss:$48 sps:$4 sm:$0xff]   ;;  %v8098_v57 = vld [vmem:[#allocation5 + $0x4e0] ss:$48 sps:$4 sm:$0xff]   ;;  %vm3345_vm1 = vcmask 1046528  }
  0xad   : > { %2637 = vmatpush1.bf16.msra.mxu0 %v8044_v18  ;;  %2743 = vmatpush1.bf16.msra.mxu1 %v8045_v19  ;;  %v8087_v49 = vld [vmem:[#allocation5 + $0x428] ss:$48 sps:$4 sm:$0xff]   ;;  %v9694_v50 = vpack.c.bf16 %v305_v47, %v301_v46  ;;  %v8090_v52 = vld [vmem:[#allocation5 + $0x48c] ss:$48 sps:$4 sm:$0xff]   ;;  %v8100_v59 = vld [vmem:[#allocation5 + $0x544] ss:$48 sps:$4 sm:$0xff]  }
  0xae   : > { %2638 = vmatprep.subr.bf16.mxu0 %v8046_v20  ;;  %2744 = vmatprep.subr.bf16.mxu1 %v8048_v21  ;;  %v8093_v54 = vld [vmem:[#allocation5 + $0x488] ss:$48 sps:$4 sm:$0xff]   ;;  %v8096_v56 = vld [vmem:[#allocation5 + $0x4ec] ss:$48 sps:$4 sm:$0xff]   ;;  %v8104_v61 = vld [vmem:[#allocation5 + $0x540] ss:$48 sps:$4 sm:$0xff]  }
  0xaf   : > { %2660 = vmatprep.mubr.bf16.mxu0 %v9694_v50  ;;  %2766 = vmatprep.mubr.bf16.mxu1 %v9694_v50  ;;  %v8099_v58 = vld [vmem:[#allocation5 + $0x4e8] ss:$48 sps:$4 sm:$0xff]   ;;  %v8102_v60 = vld [vmem:[#allocation5 + $0x54c] ss:$48 sps:$4 sm:$0xff]   ;;  %v8106_v63 = vld [vmem:[#allocation5 + $0x5a4] ss:$48 sps:$4 sm:$0xff]  }
  0xb0   : > { %v8105_v62 = vld [vmem:[#allocation5 + $0x548] ss:$48 sps:$4 sm:$0xff]   ;;  %v8108_v0 = vld [vmem:[#allocation5 + $0x5ac] ss:$48 sps:$4 sm:$0xff]   ;;  %v8110_v1 = vld [vmem:[#allocation5 + $0x5a0] ss:$48 sps:$4 sm:$0xff]  }
  0xb1   : > { %2639 = vmatpush1.bf16.msra.mxu0 %v8050_v22  ;;  %2745 = vmatpush1.bf16.msra.mxu1 %v8051_v23  ;;  %v8111_v2 = vld [vmem:[#allocation5 + $0x5a8] ss:$48 sps:$4 sm:$0xff]   ;;  %v8114_v3 = vld [vmem:[#allocation5 + $0x604] ss:$48 sps:$4 sm:$0xff]   ;;  %v8117_v6 = vld [vmem:[#allocation5 + $0x60c] ss:$48 sps:$4 sm:$0xff]  }
  0xb2   : > { %2640 = vmatprep.subr.bf16.mxu0 %v8052_v24  ;;  %2746 = vmatprep.subr.bf16.mxu1 %v8054_v25  ;;  %v300_v4 = vld [vmem:[%s9678_s30] sm:$0xff]  ;;  %v8115_v8 = vld [vmem:[#allocation5 + $0x608] ss:$48 sps:$4 sm:$0xff]   ;;  %v8123_v11 = vld [vmem:[#allocation5 + $0x66c] ss:$48 sps:$4 sm:$0xff]   ;;  %s9419_s24 = smov 64  }
  0xb3   : > { %v304_v5 = vld [vmem:[%s9678_s30 + $0x20] sm:$0xff]  ;;  %v8121_v13 = vld [vmem:[#allocation5 + $0x668] ss:$48 sps:$4 sm:$0xff]   ;;  %v8129_v15 = vld [vmem:[#allocation5 + $0x6cc] ss:$48 sps:$4 sm:$0xff]   ;;  %s9420_s26 = smov 96  }
  0xb4   : > { %v8112_v7 = vld [vmem:[#allocation5 + $0x600] ss:$48 sps:$4 sm:$0xff]   ;;  %v9700_v9 = vpack.c.bf16 %v304_v5, %v300_v4  ;;  %v8120_v10 = vld [vmem:[#allocation5 + $0x664] ss:$48 sps:$4 sm:$0xff]   ;;  %v8127_v17 = vld [vmem:[#allocation5 + $0x6c8] ss:$48 sps:$4 sm:$0xff]  }
  0xb5   : > { %2641 = vmatpush1.bf16.msra.mxu0 %v8056_v26  ;;  %2747 = vmatpush1.bf16.msra.mxu1 %v8057_v27  ;;  %v8118_v12 = vld [vmem:[#allocation5 + $0x660] ss:$48 sps:$4 sm:$0xff]   ;;  %v8126_v14 = vld [vmem:[#allocation5 + $0x6c4] ss:$48 sps:$4 sm:$0xff]   ;;  %v8135_v19 = vld [vmem:[#allocation5 + $0x72c] ss:$48 sps:$4 sm:$0xff]  }
  0xb6   : > { %2642 = vmatprep.subr.bf16.mxu0 %v8058_v28  ;;  %2748 = vmatprep.subr.bf16.mxu1 %v8060_v29  ;;  %v8124_v16 = vld [vmem:[#allocation5 + $0x6c0] ss:$48 sps:$4 sm:$0xff]   ;;  %v8132_v18 = vld [vmem:[#allocation5 + $0x724] ss:$48 sps:$4 sm:$0xff]   ;;  %v8133_v21 = vld [vmem:[#allocation5 + $0x728] ss:$48 sps:$4 sm:$0xff]  }
  0xb7   : > { %v8130_v20 = vld [vmem:[#allocation5 + $0x720] ss:$48 sps:$4 sm:$0xff]   ;;  %v8138_v22 = vld [vmem:[#allocation5 + $0x784] ss:$48 sps:$4 sm:$0xff]   ;;  %v8141_v23 = vld [vmem:[#allocation5 + $0x78c] ss:$48 sps:$4 sm:$0xff]  }
  0xb8   : > { %v8136_v24 = vld [vmem:[#allocation5 + $0x780] ss:$48 sps:$4 sm:$0xff]   ;;  %v8139_v25 = vld [vmem:[#allocation5 + $0x788] ss:$48 sps:$4 sm:$0xff]   ;;  %v8144_v26 = vld [vmem:[#allocation5 + $0x7e4] ss:$48 sps:$4 sm:$0xff]  }
  0xb9   : > { %2643 = vmatpush1.bf16.msra.mxu0 %v8062_v30  ;;  %2749 = vmatpush1.bf16.msra.mxu1 %v8063_v31  ;;  %v8147_v27 = vld [vmem:[#allocation5 + $0x7ec] ss:$48 sps:$4 sm:$0xff]   ;;  %v308_v31 = vld [vmem:[%s9678_s30 + $0x40] sm:$0xff]  ;;  %v8157_v46 = vld [vmem:[#allocation5 + $0x8a8] ss:$48 sps:$4 sm:$0xff]   ;;  %s9421_s11 = smov 32  }
  0xba   : > { %2644 = vmatprep.subr.bf16.mxu0 %v8064_v32  ;;  %2750 = vmatprep.subr.bf16.mxu1 %v8066_v33  ;;  %v309_v28 = vld [vmem:[%s9678_s30 + $0x48] sm:$0xff]  ;;  %v312_v32 = vld [vmem:[%s9678_s30 + $0x60] sm:$0xff]  ;;  %vm6729_vm2 = vcmask 257024   ;;  %vm6769_vm3 = vcmask 1041409   ;;  %vm6781_vm4 = vcmask 261120   ;;  %vm6783_vm5 = vcmask 523264  }
  0xbb   : > { %v313_v29 = vld [vmem:[%s9678_s30 + $0x68] sm:$0xff]  ;;  %v8142_v33 = vld [vmem:[#allocation5 + $0x7e0] ss:$48 sps:$4 sm:$0xff]   ;;  %v8162_v47 = vld [vmem:[#allocation5 + $0x904] ss:$48 sps:$4 sm:$0xff]   ;;  %vm6785_vm6 = vcmask 785408  }
  0xbc   : > { %v9706_v30 = vpack.c.bf16 %v313_v29, %v309_v28  ;;  %v8192_v4 = vld [vmem:[#allocation5 + $0xae4] ss:$48 sps:$4 sm:$0xff]   ;;  %v8195_v5 = vld [vmem:[#allocation5 + $0xaec] ss:$48 sps:$4 sm:$0xff]   ;;  %v8214_v28 = vld [vmem:[#allocation5 + $0x70] ss:$48 sps:$4 sm:$0xff]  }
  0xbd   : > { %2645 = vmatpush1.bf16.msra.mxu0 %v8068_v34  ;;  %2751 = vmatpush1.bf16.msra.mxu1 %v8069_v35  ;;  %v8145_v34 = vld [vmem:[#allocation5 + $0x7e8] ss:$48 sps:$4 sm:$0xff]   ;;  %v9710_v35 = vpack.c.bf16 %v312_v32, %v308_v31  ;;  %v310_v32 = vld [vmem:[%s9678_s30 + $0x50] sm:$0xff]  ;;  %s7823_s13 = sshll.u32 %s9476_s22, 11  ;;  %s10265_s15 = scalar_lea.vmem [#allocation11], %s7038_s29 }
  0xbe   : > { %2646 = vmatprep.subr.bf16.mxu0 %v8070_v36  ;;  %2752 = vmatprep.subr.bf16.mxu1 %v8072_v37  ;;  %v8150_v36 = vld [vmem:[#allocation5 + $0x844] ss:$48 sps:$4 sm:$0xff]   ;;  %v8153_v37 = vld [vmem:[#allocation5 + $0x84c] ss:$48 sps:$4 sm:$0xff]   ;;  %v8217_v29 = vld [vmem:[#allocation5 + $0x78] ss:$48 sps:$4 sm:$0xff]   ;;  %s10285_s10 = scalar_lea.hbm %s10355_s5, %s7823_s13 }
  0xbf   : > { %s6915_s8 = sshll.u32 %s10265_s15, 4  ;;  %s6901_s22 = scalar_lea.sflag [#allocation4], %s9672_s16  ;;  %s10297_s8 = int_to_ptr.vmem [resolvable:$true] %s6915_s8 }
  0xc0   : > { %s9334_s12 = scalar_lea.vmem %s10297_s8, 2048  ;;  %s9423_s23 = smov [#allocation11]  }
  0xc1   : > { %2647 = vmatpush1.bf16.msra.mxu0 %v8074_v38  ;;  %2753 = vmatpush1.bf16.msra.mxu1 %v8075_v39  ;;  %v8148_v38 = vld [vmem:[#allocation5 + $0x840] ss:$48 sps:$4 sm:$0xff]   ;;  %v8151_v39 = vld [vmem:[#allocation5 + $0x848] ss:$48 sps:$4 sm:$0xff]   ;;  %p9335_p3 = scmp.ne.s32.totalorder %s10297_s8, %s9334_s12  ;;  %s9338_s27 = sshll.u32 %s9423_s23, 4  ;;  %s9339_s27 = int_to_ptr.vmem [resolvable:$false] %s9338_s27 }
  0xc2   : > { %2648 = vmatprep.subr.bf16.mxu0 %v8076_v40  ;;  %2754 = vmatprep.subr.bf16.mxu1 %v8078_v41  ;;  %v8156_v40 = vld [vmem:[#allocation5 + $0x8a4] ss:$48 sps:$4 sm:$0xff]   ;;  %v303_v41 = vld [vmem:[%s9678_s30 + $0x18] sm:$0xff]  ;;  %s9340_s29 = scalar_lea.vmem %s9339_s27, 4096  ;;  %p9341_p12 = scmp.lt.s32.totalorder %s10297_s8, %s9339_s27 }
  0xc3   : > { %p9336_p5 = pnand %p9335_p3, %p9620_p10  ;;  %p9342_p1 = scmp.lt.s32.totalorder %s9340_s29, %s9334_s12 }
  0xc5   : > { %2649 = vmatpush1.bf16.msra.mxu0 %v8080_v42  ;;  %2755 = vmatpush1.bf16.msra.mxu1 %v8081_v43  ;;  %v307_v42 = vld [vmem:[%s9678_s30 + $0x38] sm:$0xff]  ;;  %p9337_p7 = pneg %p9336_p5  ;;  %p9343_p2 = por %p9342_p1, %p9341_p12 }
  0xc6   : > { %2650 = vmatprep.subr.bf16.mxu0 %v8082_v44  ;;  %2756 = vmatprep.subr.bf16.mxu1 %v8084_v45  ;;  %v8159_v43 = vld [vmem:[#allocation5 + $0x8ac] ss:$48 sps:$4 sm:$0xff]   ;;  %v9718_v44 = vpack.c.bf16 %v307_v42, %v303_v41  ;;  %v8154_v45 = vld [vmem:[#allocation5 + $0x8a0] ss:$48 sps:$4 sm:$0xff]  }
  0xc7   : > { %v8231_v41 = vld [vmem:[#allocation5 + $0x13c] ss:$48 sps:$4 sm:$0xff]   ;;  %v8226_v42 = vld [vmem:[#allocation5 + $0x130] ss:$48 sps:$4 sm:$0xff]   ;;  %p9344_p13 = pnand %p9343_p2, %p9337_p7 }
  0xc9   : > { %2651 = vmatpush1.bf16.msra.mxu0 %v8086_v48  ;;  %2757 = vmatpush1.bf16.msra.mxu1 %v8087_v49  ;;  %v8165_v48 = vld [vmem:[#allocation5 + $0x90c] ss:$48 sps:$4 sm:$0xff]   ;;  %v8160_v49 = vld [vmem:[#allocation5 + $0x900] ss:$48 sps:$4 sm:$0xff]  }
  0xca   : > { %2652 = vmatprep.subr.bf16.mxu0 %v8088_v51  ;;  %2758 = vmatprep.subr.bf16.mxu1 %v8090_v52  ;;  %v8163_v51 = vld [vmem:[#allocation5 + $0x908] ss:$48 sps:$4 sm:$0xff]   ;;  %v8168_v52 = vld [vmem:[#allocation5 + $0x964] ss:$48 sps:$4 sm:$0xff]  }
  0xcd   : > { %2653 = vmatpush1.bf16.msra.mxu0 %v8092_v53  ;;  %2759 = vmatpush1.bf16.msra.mxu1 %v8093_v54  ;;  %v8171_v53 = vld [vmem:[#allocation5 + $0x96c] ss:$48 sps:$4 sm:$0xff]   ;;  %v8166_v54 = vld [vmem:[#allocation5 + $0x960] ss:$48 sps:$4 sm:$0xff]  }
  0xce   : > { %2654 = vmatprep.subr.bf16.mxu0 %v8094_v55  ;;  %2760 = vmatprep.subr.bf16.mxu1 %v8096_v56  ;;  %v8169_v55 = vld [vmem:[#allocation5 + $0x968] ss:$48 sps:$4 sm:$0xff]   ;;  %v8174_v56 = vld [vmem:[#allocation5 + $0x9c4] ss:$48 sps:$4 sm:$0xff]  }
  0xd1   : > { %2655 = vmatpush1.bf16.msra.mxu0 %v8098_v57  ;;  %2761 = vmatpush1.bf16.msra.mxu1 %v8099_v58  ;;  %v8177_v57 = vld [vmem:[#allocation5 + $0x9cc] ss:$48 sps:$4 sm:$0xff]   ;;  %v8172_v58 = vld [vmem:[#allocation5 + $0x9c0] ss:$48 sps:$4 sm:$0xff]  }
  0xd2   : > { %2656 = vmatprep.subr.bf16.mxu0 %v8100_v59  ;;  %2762 = vmatprep.subr.bf16.mxu1 %v8102_v60  ;;  %v8175_v59 = vld [vmem:[#allocation5 + $0x9c8] ss:$48 sps:$4 sm:$0xff]   ;;  %v8180_v60 = vld [vmem:[#allocation5 + $0xa24] ss:$48 sps:$4 sm:$0xff]  }
  0xd5   : > { %2657 = vmatpush1.bf16.msra.mxu0 %v8104_v61  ;;  %2763 = vmatpush1.bf16.msra.mxu1 %v8105_v62  ;;  %v8183_v61 = vld [vmem:[#allocation5 + $0xa2c] ss:$48 sps:$4 sm:$0xff]   ;;  %v8178_v62 = vld [vmem:[#allocation5 + $0xa20] ss:$48 sps:$4 sm:$0xff]  }
  0xd6   : > { %2658 = vmatprep.subr.bf16.mxu0 %v8106_v63  ;;  %2764 = vmatprep.subr.bf16.mxu1 %v8108_v0  ;;  %v8181_v63 = vld [vmem:[#allocation5 + $0xa28] ss:$48 sps:$4 sm:$0xff]   ;;  %v8186_v0 = vld [vmem:[#allocation5 + $0xa84] ss:$48 sps:$4 sm:$0xff]  }
  0xd9   : > { %2659 = vmatpush1.bf16.msra.mxu0 %v8110_v1  ;;  %2765 = vmatpush1.bf16.msra.mxu1 %v8111_v2  ;;  %v8189_v1 = vld [vmem:[#allocation5 + $0xa8c] ss:$48 sps:$4 sm:$0xff]   ;;  %v8184_v2 = vld [vmem:[#allocation5 + $0xa80] ss:$48 sps:$4 sm:$0xff]  }
  0xda   : > { %2681 = vmatprep.subr.bf16.mxu0 %v8114_v3  ;;  %2787 = vmatprep.subr.bf16.mxu1 %v8117_v6  ;;  %v8187_v3 = vld [vmem:[#allocation5 + $0xa88] ss:$48 sps:$4 sm:$0xff]   ;;  %v8190_v6 = vld [vmem:[#allocation5 + $0xae0] ss:$48 sps:$4 sm:$0xff]  }
  0xdc   : > { %2661 = vmatmul.mubr.bf16.vlgmr.msra.gmra.mrb[0].mxu0 %v9700_v9  ;;  %2767 = vmatmul.mubr.bf16.vlgmr.msra.gmra.mrb[0].mxu1 %v9700_v9 }
  0xdd   : > { %2682 = vmatpush1.bf16.msra.mxu0 %v8112_v7  ;;  %2788 = vmatpush1.bf16.msra.mxu1 %v8115_v8  ;;  %v8193_v7 = vld [vmem:[#allocation5 + $0xae8] ss:$48 sps:$4 sm:$0xff]   ;;  %v8198_v8 = vld [vmem:[#allocation5 + $0xb44] ss:$48 sps:$4 sm:$0xff]  }
  0xde   : > { %2683 = vmatprep.subr.bf16.mxu0 %v8120_v10  ;;  %2789 = vmatprep.subr.bf16.mxu1 %v8123_v11  ;;  %v8201_v10 = vld [vmem:[#allocation5 + $0xb4c] ss:$48 sps:$4 sm:$0xff]   ;;  %v8196_v11 = vld [vmem:[#allocation5 + $0xb40] ss:$48 sps:$4 sm:$0xff]  }
  0xdf   : > { %2670 = vmatprep.mubr.bf16.mxu0 %v9706_v30  ;;  %2776 = vmatprep.mubr.bf16.mxu1 %v9706_v30 }
  0xe1   : > { %2684 = vmatpush1.bf16.msra.mxu0 %v8118_v12  ;;  %2790 = vmatpush1.bf16.msra.mxu1 %v8121_v13  ;;  %v8199_v12 = vld [vmem:[#allocation5 + $0xb48] ss:$48 sps:$4 sm:$0xff]   ;;  %v8204_v13 = vld [vmem:[#allocation5 + $0xba4] ss:$48 sps:$4 sm:$0xff]  }
  0xe2   : > { %2685 = vmatprep.subr.bf16.mxu0 %v8126_v14  ;;  %2791 = vmatprep.subr.bf16.mxu1 %v8129_v15  ;;  %v8207_v14 = vld [vmem:[#allocation5 + $0xbac] ss:$48 sps:$4 sm:$0xff]   ;;  %v8202_v15 = vld [vmem:[#allocation5 + $0xba0] ss:$48 sps:$4 sm:$0xff]  }
  0xe4   : > { %2671 = vmatmul.mubr.bf16.gmra.mrb[4].mxu0 %v9710_v35  ;;  %2777 = vmatmul.mubr.bf16.gmra.mrb[4].mxu1 %v9710_v35 }
  0xe5   : > { %2686 = vmatpush1.bf16.msra.mxu0 %v8124_v16  ;;  %2792 = vmatpush1.bf16.msra.mxu1 %v8127_v17  ;;  %v8205_v16 = vld [vmem:[#allocation5 + $0xba8] ss:$48 sps:$4 sm:$0xff]   ;;  %v302_v17 = vld [vmem:[%s9678_s30 + $0x10] sm:$0xff] }
  0xe6   : > { %2687 = vmatprep.subr.bf16.mxu0 %v8132_v18  ;;  %2793 = vmatprep.subr.bf16.mxu1 %v8135_v19  ;;  %v306_v18 = vld [vmem:[%s9678_s30 + $0x30] sm:$0xff] }
  0xe7   : > { %2713 = vmatprep.mubr.bf16.mxu0 %v9718_v44  ;;  %2819 = vmatprep.mubr.bf16.mxu1 %v9718_v44  ;;  %v8210_v19 = vld [vmem:[#allocation5 + $0x14] ss:$48 sps:$4 sm:$0xff]  }
  0xe9   : > { %2688 = vmatpush1.bf16.msra.mxu0 %v8130_v20  ;;  %2794 = vmatpush1.bf16.msra.mxu1 %v8133_v21  ;;  %v8213_v20 = vld [vmem:[#allocation5 + $0x1c] ss:$48 sps:$4 sm:$0xff]   ;;  %v8208_v21 = vld [vmem:[#allocation5 + $0x10] ss:$48 sps:$4 sm:$0xff]  }
  0xea   : > { %2689 = vmatprep.subr.bf16.mxu0 %v8138_v22  ;;  %2795 = vmatprep.subr.bf16.mxu1 %v8141_v23  ;;  %v8211_v22 = vld [vmem:[#allocation5 + $0x18] ss:$48 sps:$4 sm:$0xff]   ;;  %v9724_v23 = vpack.c.bf16 %v306_v18, %v302_v17  ;;  %v8280_v17 = vld [vmem:[#allocation5 + $0x490] ss:$48 sps:$4 sm:$0xff]  }
  0xeb   : > { %v8283_v18 = vld [vmem:[#allocation5 + $0x498] ss:$48 sps:$4 sm:$0xff]  }
  0xed   : > { %2690 = vmatpush1.bf16.msra.mxu0 %v8136_v24  ;;  %2796 = vmatpush1.bf16.msra.mxu1 %v8139_v25  ;;  %v311_v24 = vld [vmem:[%s9678_s30 + $0x58] sm:$0xff] }
  0xee   : > { %2691 = vmatprep.subr.bf16.mxu0 %v8144_v26  ;;  %2797 = vmatprep.subr.bf16.mxu1 %v8147_v27  ;;  %v315_v25 = vld [vmem:[%s9678_s30 + $0x78] sm:$0xff]  ;;  %v8216_v26 = vld [vmem:[#allocation5 + $0x74] ss:$48 sps:$4 sm:$0xff]  }
  0xef   : > { %v8219_v27 = vld [vmem:[#allocation5 + $0x7c] ss:$48 sps:$4 sm:$0xff]   ;;  %v9728_v31 = vpack.c.bf16 %v315_v25, %v311_v24  ;;  %v8294_v24 = vld [vmem:[#allocation5 + $0x554] ss:$48 sps:$4 sm:$0xff]  }
  0xf0   : > { %v8297_v25 = vld [vmem:[#allocation5 + $0x55c] ss:$48 sps:$4 sm:$0xff]  }
  0xf1   : > { %2692 = vmatpush1.bf16.msra.mxu0 %v8142_v33  ;;  %2798 = vmatpush1.bf16.msra.mxu1 %v8145_v34  ;;  %v314_v33 = vld [vmem:[%s9678_s30 + $0x70] sm:$0xff] }
  0xf2   : > { %2693 = vmatprep.subr.bf16.mxu0 %v8150_v36  ;;  %2799 = vmatprep.subr.bf16.mxu1 %v8153_v37  ;;  %v8222_v34 = vld [vmem:[#allocation5 + $0xd4] ss:$48 sps:$4 sm:$0xff]   ;;  %v8225_v36 = vld [vmem:[#allocation5 + $0xdc] ss:$48 sps:$4 sm:$0xff]   ;;  %v9736_v37 = vpack.c.bf16 %v314_v33, %v310_v32  ;;  %v8298_v32 = vld [vmem:[#allocation5 + $0x5b0] ss:$48 sps:$4 sm:$0xff]  }
  0xf3   : > { %v8301_v33 = vld [vmem:[#allocation5 + $0x5b8] ss:$48 sps:$4 sm:$0xff]  }
  0xf5   : > { %2694 = vmatpush1.bf16.msra.mxu0 %v8148_v38  ;;  %2800 = vmatpush1.bf16.msra.mxu1 %v8151_v39  ;;  %v8220_v38 = vld [vmem:[#allocation5 + $0xd0] ss:$48 sps:$4 sm:$0xff]   ;;  %v8223_v39 = vld [vmem:[#allocation5 + $0xd8] ss:$48 sps:$4 sm:$0xff]  }
  0xf6   : > { %2695 = vmatprep.subr.bf16.mxu0 %v8156_v40  ;;  %2801 = vmatprep.subr.bf16.mxu1 %v8159_v43  ;;  %v8228_v40 = vld [vmem:[#allocation5 + $0x134] ss:$48 sps:$4 sm:$0xff]   ;;  %v8229_v43 = vld [vmem:[#allocation5 + $0x138] ss:$48 sps:$4 sm:$0xff]  }
  0xf9   : > { %2696 = vmatpush1.bf16.msra.mxu0 %v8154_v45  ;;  %2802 = vmatpush1.bf16.msra.mxu1 %v8157_v46  ;;  %v8234_v45 = vld [vmem:[#allocation5 + $0x194] ss:$48 sps:$4 sm:$0xff]   ;;  %v8237_v46 = vld [vmem:[#allocation5 + $0x19c] ss:$48 sps:$4 sm:$0xff]  }
  0xfa   : > { %2697 = vmatprep.subr.bf16.mxu0 %v8162_v47  ;;  %2803 = vmatprep.subr.bf16.mxu1 %v8165_v48  ;;  %v8232_v47 = vld [vmem:[#allocation5 + $0x190] ss:$48 sps:$4 sm:$0xff]   ;;  %v8235_v48 = vld [vmem:[#allocation5 + $0x198] ss:$48 sps:$4 sm:$0xff]  }
  0xfd   : > { %2698 = vmatpush1.bf16.msra.mxu0 %v8160_v49  ;;  %2804 = vmatpush1.bf16.msra.mxu1 %v8163_v51  ;;  %v8240_v49 = vld [vmem:[#allocation5 + $0x1f4] ss:$48 sps:$4 sm:$0xff]   ;;  %v8243_v51 = vld [vmem:[#allocation5 + $0x1fc] ss:$48 sps:$4 sm:$0xff]  }
  0xfe   : > { %2699 = vmatprep.subr.bf16.mxu0 %v8168_v52  ;;  %2805 = vmatprep.subr.bf16.mxu1 %v8171_v53  ;;  %v8238_v52 = vld [vmem:[#allocation5 + $0x1f0] ss:$48 sps:$4 sm:$0xff]   ;;  %v8241_v53 = vld [vmem:[#allocation5 + $0x1f8] ss:$48 sps:$4 sm:$0xff]  }
 0x101   : > { %2700 = vmatpush1.bf16.msra.mxu0 %v8166_v54  ;;  %2806 = vmatpush1.bf16.msra.mxu1 %v8169_v55  ;;  %v8246_v54 = vld [vmem:[#allocation5 + $0x254] ss:$48 sps:$4 sm:$0xff]   ;;  %v8249_v55 = vld [vmem:[#allocation5 + $0x25c] ss:$48 sps:$4 sm:$0xff]  }
 0x102   : > { %2701 = vmatprep.subr.bf16.mxu0 %v8174_v56  ;;  %2807 = vmatprep.subr.bf16.mxu1 %v8177_v57  ;;  %v8244_v56 = vld [vmem:[#allocation5 + $0x250] ss:$48 sps:$4 sm:$0xff]   ;;  %v8247_v57 = vld [vmem:[#allocation5 + $0x258] ss:$48 sps:$4 sm:$0xff]  }
 0x105   : > { %2702 = vmatpush1.bf16.msra.mxu0 %v8172_v58  ;;  %2808 = vmatpush1.bf16.msra.mxu1 %v8175_v59  ;;  %v8252_v58 = vld [vmem:[#allocation5 + $0x2b4] ss:$48 sps:$4 sm:$0xff]   ;;  %v8255_v59 = vld [vmem:[#allocation5 + $0x2bc] ss:$48 sps:$4 sm:$0xff]  }
 0x106   : > { %2703 = vmatprep.subr.bf16.mxu0 %v8180_v60  ;;  %2809 = vmatprep.subr.bf16.mxu1 %v8183_v61  ;;  %v8250_v60 = vld [vmem:[#allocation5 + $0x2b0] ss:$48 sps:$4 sm:$0xff]   ;;  %v8253_v61 = vld [vmem:[#allocation5 + $0x2b8] ss:$48 sps:$4 sm:$0xff]  }
 0x109   : > { %2704 = vmatpush1.bf16.msra.mxu0 %v8178_v62  ;;  %2810 = vmatpush1.bf16.msra.mxu1 %v8181_v63  ;;  %v8258_v62 = vld [vmem:[#allocation5 + $0x314] ss:$48 sps:$4 sm:$0xff]   ;;  %v8261_v63 = vld [vmem:[#allocation5 + $0x31c] ss:$48 sps:$4 sm:$0xff]  }
 0x10a   : > { %2705 = vmatprep.subr.bf16.mxu0 %v8186_v0  ;;  %2811 = vmatprep.subr.bf16.mxu1 %v8189_v1  ;;  %v8256_v0 = vld [vmem:[#allocation5 + $0x310] ss:$48 sps:$4 sm:$0xff]   ;;  %v8259_v1 = vld [vmem:[#allocation5 + $0x318] ss:$48 sps:$4 sm:$0xff]  }
 0x10d   : > { %2706 = vmatpush1.bf16.msra.mxu0 %v8184_v2  ;;  %2812 = vmatpush1.bf16.msra.mxu1 %v8187_v3  ;;  %v8264_v2 = vld [vmem:[#allocation5 + $0x374] ss:$48 sps:$4 sm:$0xff]   ;;  %v8267_v3 = vld [vmem:[#allocation5 + $0x37c] ss:$48 sps:$4 sm:$0xff]  }
 0x10e   : > { %2707 = vmatprep.subr.bf16.mxu0 %v8192_v4  ;;  %2813 = vmatprep.subr.bf16.mxu1 %v8195_v5  ;;  %v8262_v4 = vld [vmem:[#allocation5 + $0x370] ss:$48 sps:$4 sm:$0xff]   ;;  %v8265_v5 = vld [vmem:[#allocation5 + $0x378] ss:$48 sps:$4 sm:$0xff]  }
 0x111   : > { %2708 = vmatpush1.bf16.msra.mxu0 %v8190_v6  ;;  %2814 = vmatpush1.bf16.msra.mxu1 %v8193_v7  ;;  %v8270_v6 = vld [vmem:[#allocation5 + $0x3d4] ss:$48 sps:$4 sm:$0xff]   ;;  %v8273_v7 = vld [vmem:[#allocation5 + $0x3dc] ss:$48 sps:$4 sm:$0xff]  }
 0x112   : > { %2709 = vmatprep.subr.bf16.mxu0 %v8198_v8  ;;  %2815 = vmatprep.subr.bf16.mxu1 %v8201_v10  ;;  %v8268_v8 = vld [vmem:[#allocation5 + $0x3d0] ss:$48 sps:$4 sm:$0xff]   ;;  %v8271_v10 = vld [vmem:[#allocation5 + $0x3d8] ss:$48 sps:$4 sm:$0xff]  }
 0x115   : > { %2710 = vmatpush1.bf16.msra.mxu0 %v8196_v11  ;;  %2816 = vmatpush1.bf16.msra.mxu1 %v8199_v12  ;;  %v8276_v11 = vld [vmem:[#allocation5 + $0x434] ss:$48 sps:$4 sm:$0xff]   ;;  %v8279_v12 = vld [vmem:[#allocation5 + $0x43c] ss:$48 sps:$4 sm:$0xff]  }
 0x116   : > { %2711 = vmatprep.subr.bf16.mxu0 %v8204_v13  ;;  %2817 = vmatprep.subr.bf16.mxu1 %v8207_v14  ;;  %v8274_v13 = vld [vmem:[#allocation5 + $0x430] ss:$48 sps:$4 sm:$0xff]   ;;  %v8277_v14 = vld [vmem:[#allocation5 + $0x438] ss:$48 sps:$4 sm:$0xff]  }
 0x119   : > { %2712 = vmatpush1.bf16.msra.mxu0 %v8202_v15  ;;  %2818 = vmatpush1.bf16.msra.mxu1 %v8205_v16  ;;  %v8282_v15 = vld [vmem:[#allocation5 + $0x494] ss:$48 sps:$4 sm:$0xff]   ;;  %v8285_v16 = vld [vmem:[#allocation5 + $0x49c] ss:$48 sps:$4 sm:$0xff]  }
 0x11a   : > { %2840 = vmatprep.subr.bf16.mxu0 %v8210_v19  ;;  %2946 = vmatprep.subr.bf16.mxu1 %v8213_v20  ;;  %v8288_v19 = vld [vmem:[#allocation5 + $0x4f4] ss:$48 sps:$4 sm:$0xff]   ;;  %v8291_v20 = vld [vmem:[#allocation5 + $0x4fc] ss:$48 sps:$4 sm:$0xff]  }
 0x11c   : > { %2714 = vmatmul.mubr.bf16.vlgmr.msra.gmra.mrb[0].mxu0 %v9724_v23  ;;  %2820 = vmatmul.mubr.bf16.vlgmr.msra.gmra.mrb[0].mxu1 %v9724_v23 }
 0x11d   : > { %2841 = vmatpush1.bf16.msra.mxu0 %v8208_v21  ;;  %2947 = vmatpush1.bf16.msra.mxu1 %v8211_v22  ;;  %v8286_v21 = vld [vmem:[#allocation5 + $0x4f0] ss:$48 sps:$4 sm:$0xff]   ;;  %v8289_v22 = vld [vmem:[#allocation5 + $0x4f8] ss:$48 sps:$4 sm:$0xff]  }
 0x11e   : > { %2842 = vmatprep.subr.bf16.mxu0 %v8216_v26  ;;  %2948 = vmatprep.subr.bf16.mxu1 %v8219_v27  ;;  %v8292_v26 = vld [vmem:[#allocation5 + $0x550] ss:$48 sps:$4 sm:$0xff]   ;;  %v8295_v27 = vld [vmem:[#allocation5 + $0x558] ss:$48 sps:$4 sm:$0xff]  }
 0x11f   : > { %2723 = vmatprep.mubr.bf16.mxu0 %v9728_v31  ;;  %2829 = vmatprep.mubr.bf16.mxu1 %v9728_v31 }
 0x121   : > { %2843 = vmatpush1.bf16.msra.mxu0 %v8214_v28  ;;  %2949 = vmatpush1.bf16.msra.mxu1 %v8217_v29  ;;  %v8300_v28 = vld [vmem:[#allocation5 + $0x5b4] ss:$48 sps:$4 sm:$0xff]   ;;  %v8303_v29 = vld [vmem:[#allocation5 + $0x5bc] ss:$48 sps:$4 sm:$0xff]  }
 0x122   : > { %2844 = vmatprep.subr.bf16.mxu0 %v8222_v34  ;;  %2950 = vmatprep.subr.bf16.mxu1 %v8225_v36  ;;  %v8306_v34 = vld [vmem:[#allocation5 + $0x614] ss:$48 sps:$4 sm:$0xff]   ;;  %v8309_v36 = vld [vmem:[#allocation5 + $0x61c] ss:$48 sps:$4 sm:$0xff]  }
 0x124   : > { %2724 = vmatmul.mubr.bf16.gmra.mrb[4].mxu0 %v9736_v37  ;;  %2830 = vmatmul.mubr.bf16.gmra.mrb[4].mxu1 %v9736_v37 }
 0x125   : > { %2845 = vmatpush1.bf16.msra.mxu0 %v8220_v38  ;;  %2951 = vmatpush1.bf16.msra.mxu1 %v8223_v39  ;;  %v8304_v38 = vld [vmem:[#allocation5 + $0x610] ss:$48 sps:$4 sm:$0xff]   ;;  %v8307_v39 = vld [vmem:[#allocation5 + $0x618] ss:$48 sps:$4 sm:$0xff]  }
 0x126   : > { %2846 = vmatprep.subr.bf16.mxu0 %v8228_v40  ;;  %2952 = vmatprep.subr.bf16.mxu1 %v8231_v41  ;;  %v8312_v40 = vld [vmem:[#allocation5 + $0x674] ss:$48 sps:$4 sm:$0xff]   ;;  %v8315_v41 = vld [vmem:[#allocation5 + $0x67c] ss:$48 sps:$4 sm:$0xff]  }
 0x127   : > { %2872 = vmatprep.mubr.bf16.mxu0 %v9694_v50  ;;  %2978 = vmatprep.mubr.bf16.mxu1 %v9694_v50 }
 0x129   : > { %2847 = vmatpush1.bf16.msra.mxu0 %v8226_v42  ;;  %2953 = vmatpush1.bf16.msra.mxu1 %v8229_v43  ;;  %v8310_v42 = vld [vmem:[#allocation5 + $0x670] ss:$48 sps:$4 sm:$0xff]   ;;  %v8313_v43 = vld [vmem:[#allocation5 + $0x678] ss:$48 sps:$4 sm:$0xff]  }
 0x12a   : > { %2848 = vmatprep.subr.bf16.mxu0 %v8234_v45  ;;  %2954 = vmatprep.subr.bf16.mxu1 %v8237_v46  ;;  %v8318_v45 = vld [vmem:[#allocation5 + $0x6d4] ss:$48 sps:$4 sm:$0xff]   ;;  %v8321_v46 = vld [vmem:[#allocation5 + $0x6dc] ss:$48 sps:$4 sm:$0xff]  }
 0x12d   : > { %2849 = vmatpush1.bf16.msra.mxu0 %v8232_v47  ;;  %2955 = vmatpush1.bf16.msra.mxu1 %v8235_v48  ;;  %v8316_v47 = vld [vmem:[#allocation5 + $0x6d0] ss:$48 sps:$4 sm:$0xff]   ;;  %v8319_v48 = vld [vmem:[#allocation5 + $0x6d8] ss:$48 sps:$4 sm:$0xff]  }
 0x12e   : > { %2850 = vmatprep.subr.bf16.mxu0 %v8240_v49  ;;  %2956 = vmatprep.subr.bf16.mxu1 %v8243_v51  ;;  %v8324_v49 = vld [vmem:[#allocation5 + $0x734] ss:$48 sps:$4 sm:$0xff]   ;;  %v8327_v51 = vld [vmem:[#allocation5 + $0x73c] ss:$48 sps:$4 sm:$0xff]  }
 0x131   : > { %2851 = vmatpush1.bf16.msra.mxu0 %v8238_v52  ;;  %2957 = vmatpush1.bf16.msra.mxu1 %v8241_v53  ;;  %v8322_v52 = vld [vmem:[#allocation5 + $0x730] ss:$48 sps:$4 sm:$0xff]   ;;  %v8325_v53 = vld [vmem:[#allocation5 + $0x738] ss:$48 sps:$4 sm:$0xff]  }
 0x132   : > { %2852 = vmatprep.subr.bf16.mxu0 %v8246_v54  ;;  %2958 = vmatprep.subr.bf16.mxu1 %v8249_v55  ;;  %v8330_v54 = vld [vmem:[#allocation5 + $0x794] ss:$48 sps:$4 sm:$0xff]   ;;  %v8333_v55 = vld [vmem:[#allocation5 + $0x79c] ss:$48 sps:$4 sm:$0xff]  }
 0x135   : > { %2853 = vmatpush1.bf16.msra.mxu0 %v8244_v56  ;;  %2959 = vmatpush1.bf16.msra.mxu1 %v8247_v57  ;;  %v8328_v56 = vld [vmem:[#allocation5 + $0x790] ss:$48 sps:$4 sm:$0xff]   ;;  %v8331_v57 = vld [vmem:[#allocation5 + $0x798] ss:$48 sps:$4 sm:$0xff]  }
 0x136   : > { %2854 = vmatprep.subr.bf16.mxu0 %v8252_v58  ;;  %2960 = vmatprep.subr.bf16.mxu1 %v8255_v59  ;;  %v8336_v58 = vld [vmem:[#allocation5 + $0x7f4] ss:$48 sps:$4 sm:$0xff]   ;;  %v8339_v59 = vld [vmem:[#allocation5 + $0x7fc] ss:$48 sps:$4 sm:$0xff]  }
 0x139   : > { %2855 = vmatpush1.bf16.msra.mxu0 %v8250_v60  ;;  %2961 = vmatpush1.bf16.msra.mxu1 %v8253_v61  ;;  %v8334_v60 = vld [vmem:[#allocation5 + $0x7f0] ss:$48 sps:$4 sm:$0xff]   ;;  %v8337_v61 = vld [vmem:[#allocation5 + $0x7f8] ss:$48 sps:$4 sm:$0xff]  }
 0x13a   : > { %2856 = vmatprep.subr.bf16.mxu0 %v8258_v62  ;;  %2962 = vmatprep.subr.bf16.mxu1 %v8261_v63  ;;  %v8342_v62 = vld [vmem:[#allocation5 + $0x854] ss:$48 sps:$4 sm:$0xff]   ;;  %v8345_v63 = vld [vmem:[#allocation5 + $0x85c] ss:$48 sps:$4 sm:$0xff]  }
 0x13d   : > { %2857 = vmatpush1.bf16.msra.mxu0 %v8256_v0  ;;  %2963 = vmatpush1.bf16.msra.mxu1 %v8259_v1  ;;  %v8340_v0 = vld [vmem:[#allocation5 + $0x850] ss:$48 sps:$4 sm:$0xff]   ;;  %v8343_v1 = vld [vmem:[#allocation5 + $0x858] ss:$48 sps:$4 sm:$0xff]  }
 0x13e   : > { %2858 = vmatprep.subr.bf16.mxu0 %v8264_v2  ;;  %2964 = vmatprep.subr.bf16.mxu1 %v8267_v3  ;;  %v8348_v2 = vld [vmem:[#allocation5 + $0x8b4] ss:$48 sps:$4 sm:$0xff]   ;;  %v8351_v3 = vld [vmem:[#allocation5 + $0x8bc] ss:$48 sps:$4 sm:$0xff]  }
 0x141   : > { %2859 = vmatpush1.bf16.msra.mxu0 %v8262_v4  ;;  %2965 = vmatpush1.bf16.msra.mxu1 %v8265_v5  ;;  %v8346_v4 = vld [vmem:[#allocation5 + $0x8b0] ss:$48 sps:$4 sm:$0xff]   ;;  %v8349_v5 = vld [vmem:[#allocation5 + $0x8b8] ss:$48 sps:$4 sm:$0xff]  }
 0x142   : > { %2860 = vmatprep.subr.bf16.mxu0 %v8270_v6  ;;  %2966 = vmatprep.subr.bf16.mxu1 %v8273_v7  ;;  %v8354_v6 = vld [vmem:[#allocation5 + $0x914] ss:$48 sps:$4 sm:$0xff]   ;;  %v8357_v7 = vld [vmem:[#allocation5 + $0x91c] ss:$48 sps:$4 sm:$0xff]  }
 0x145   : > { %2861 = vmatpush1.bf16.msra.mxu0 %v8268_v8  ;;  %2967 = vmatpush1.bf16.msra.mxu1 %v8271_v10  ;;  %v8352_v8 = vld [vmem:[#allocation5 + $0x910] ss:$48 sps:$4 sm:$0xff]   ;;  %v8355_v10 = vld [vmem:[#allocation5 + $0x918] ss:$48 sps:$4 sm:$0xff]  }
 0x146   : > { %2862 = vmatprep.subr.bf16.mxu0 %v8276_v11  ;;  %2968 = vmatprep.subr.bf16.mxu1 %v8279_v12  ;;  %v8360_v11 = vld [vmem:[#allocation5 + $0x974] ss:$48 sps:$4 sm:$0xff]   ;;  %v8363_v12 = vld [vmem:[#allocation5 + $0x97c] ss:$48 sps:$4 sm:$0xff]  }
 0x149   : > { %2863 = vmatpush1.bf16.msra.mxu0 %v8274_v13  ;;  %2969 = vmatpush1.bf16.msra.mxu1 %v8277_v14  ;;  %v8358_v13 = vld [vmem:[#allocation5 + $0x970] ss:$48 sps:$4 sm:$0xff]   ;;  %v8361_v14 = vld [vmem:[#allocation5 + $0x978] ss:$48 sps:$4 sm:$0xff]  }
 0x14a   : > { %2864 = vmatprep.subr.bf16.mxu0 %v8282_v15  ;;  %2970 = vmatprep.subr.bf16.mxu1 %v8285_v16  ;;  %v8366_v15 = vld [vmem:[#allocation5 + $0x9d4] ss:$48 sps:$4 sm:$0xff]   ;;  %v8369_v16 = vld [vmem:[#allocation5 + $0x9dc] ss:$48 sps:$4 sm:$0xff]  }
 0x14d   : > { %2865 = vmatpush1.bf16.msra.mxu0 %v8280_v17  ;;  %2971 = vmatpush1.bf16.msra.mxu1 %v8283_v18  ;;  %v8364_v17 = vld [vmem:[#allocation5 + $0x9d0] ss:$48 sps:$4 sm:$0xff]   ;;  %v8367_v18 = vld [vmem:[#allocation5 + $0x9d8] ss:$48 sps:$4 sm:$0xff]  }
 0x14e   : > { %2866 = vmatprep.subr.bf16.mxu0 %v8288_v19  ;;  %2972 = vmatprep.subr.bf16.mxu1 %v8291_v20  ;;  %v8372_v19 = vld [vmem:[#allocation5 + $0xa34] ss:$48 sps:$4 sm:$0xff]   ;;  %v8375_v20 = vld [vmem:[#allocation5 + $0xa3c] ss:$48 sps:$4 sm:$0xff]  }
 0x151   : > { %2867 = vmatpush1.bf16.msra.mxu0 %v8286_v21  ;;  %2973 = vmatpush1.bf16.msra.mxu1 %v8289_v22  ;;  %v8370_v21 = vld [vmem:[#allocation5 + $0xa30] ss:$48 sps:$4 sm:$0xff]   ;;  %v8373_v22 = vld [vmem:[#allocation5 + $0xa38] ss:$48 sps:$4 sm:$0xff]  }
 0x152   : > { %2868 = vmatprep.subr.bf16.mxu0 %v8294_v24  ;;  %2974 = vmatprep.subr.bf16.mxu1 %v8297_v25  ;;  %v8378_v24 = vld [vmem:[#allocation5 + $0xa94] ss:$48 sps:$4 sm:$0xff]   ;;  %v8381_v25 = vld [vmem:[#allocation5 + $0xa9c] ss:$48 sps:$4 sm:$0xff]  }
 0x155   : > { %2869 = vmatpush1.bf16.msra.mxu0 %v8292_v26  ;;  %2975 = vmatpush1.bf16.msra.mxu1 %v8295_v27  ;;  %v8376_v26 = vld [vmem:[#allocation5 + $0xa90] ss:$48 sps:$4 sm:$0xff]   ;;  %v8379_v27 = vld [vmem:[#allocation5 + $0xa98] ss:$48 sps:$4 sm:$0xff]  }
 0x156   : > { %2870 = vmatprep.subr.bf16.mxu0 %v8300_v28  ;;  %2976 = vmatprep.subr.bf16.mxu1 %v8303_v29  ;;  %v8384_v28 = vld [vmem:[#allocation5 + $0xaf4] ss:$48 sps:$4 sm:$0xff]   ;;  %v8387_v29 = vld [vmem:[#allocation5 + $0xafc] ss:$48 sps:$4 sm:$0xff]  }
 0x159   : > { %2871 = vmatpush1.bf16.msra.mxu0 %v8298_v32  ;;  %2977 = vmatpush1.bf16.msra.mxu1 %v8301_v33  ;;  %v8382_v32 = vld [vmem:[#allocation5 + $0xaf0] ss:$48 sps:$4 sm:$0xff]   ;;  %v8385_v33 = vld [vmem:[#allocation5 + $0xaf8] ss:$48 sps:$4 sm:$0xff]  }
 0x15a   : > { %2893 = vmatprep.subr.bf16.mxu0 %v8306_v34  ;;  %2999 = vmatprep.subr.bf16.mxu1 %v8309_v36  ;;  %v8390_v34 = vld [vmem:[#allocation5 + $0xb54] ss:$48 sps:$4 sm:$0xff]   ;;  %v8393_v36 = vld [vmem:[#allocation5 + $0xb5c] ss:$48 sps:$4 sm:$0xff]  }
 0x15c   : > { %2873 = vmatmul.mubr.bf16.vlgmr.msra.gmra.mrb[8].mxu0 %v9700_v9  ;;  %2979 = vmatmul.mubr.bf16.vlgmr.msra.gmra.mrb[8].mxu1 %v9700_v9 }
 0x15d   : > { %2894 = vmatpush1.bf16.msra.mxu0 %v8304_v38  ;;  %3000 = vmatpush1.bf16.msra.mxu1 %v8307_v39  ;;  %v8388_v38 = vld [vmem:[#allocation5 + $0xb50] ss:$48 sps:$4 sm:$0xff]   ;;  %v8391_v39 = vld [vmem:[#allocation5 + $0xb58] ss:$48 sps:$4 sm:$0xff]  }
 0x15e   : > { %2895 = vmatprep.subr.bf16.mxu0 %v8312_v40  ;;  %3001 = vmatprep.subr.bf16.mxu1 %v8315_v41  ;;  %v8396_v40 = vld [vmem:[#allocation5 + $0xbb4] ss:$48 sps:$4 sm:$0xff]   ;;  %v8399_v41 = vld [vmem:[#allocation5 + $0xbbc] ss:$48 sps:$4 sm:$0xff]  }
 0x15f   : > { %2882 = vmatprep.mubr.bf16.mxu0 %v9706_v30  ;;  %2988 = vmatprep.mubr.bf16.mxu1 %v9706_v30 }
 0x161   : > { %2896 = vmatpush1.bf16.msra.mxu0 %v8310_v42  ;;  %3002 = vmatpush1.bf16.msra.mxu1 %v8313_v43  ;;  %v8394_v42 = vld [vmem:[#allocation5 + $0xbb0] ss:$48 sps:$4 sm:$0xff]   ;;  %v8397_v43 = vld [vmem:[#allocation5 + $0xbb8] ss:$48 sps:$4 sm:$0xff]  }
 0x162   : > { %2897 = vmatprep.subr.bf16.mxu0 %v8318_v45  ;;  %3003 = vmatprep.subr.bf16.mxu1 %v8321_v46  ;;  %v8402_v45 = vld [vmem:[#allocation5 + $0x24] ss:$48 sps:$4 sm:$0xff]   ;;  %v8405_v46 = vld [vmem:[#allocation5 + $0x2c] ss:$48 sps:$4 sm:$0xff]  }
 0x164   : > { %2883 = vmatmul.mubr.bf16.gmra.mrb[12].mxu0 %v9710_v35  ;;  %2989 = vmatmul.mubr.bf16.gmra.mrb[12].mxu1 %v9710_v35 }
 0x165   : > { %2898 = vmatpush1.bf16.msra.mxu0 %v8316_v47  ;;  %3004 = vmatpush1.bf16.msra.mxu1 %v8319_v48  ;;  %v8400_v47 = vld [vmem:[#allocation5 + $0x20] ss:$48 sps:$4 sm:$0xff]   ;;  %v8403_v48 = vld [vmem:[#allocation5 + $0x28] ss:$48 sps:$4 sm:$0xff]  }
 0x166   : > { %2899 = vmatprep.subr.bf16.mxu0 %v8324_v49  ;;  %3005 = vmatprep.subr.bf16.mxu1 %v8327_v51  ;;  %v8408_v49 = vld [vmem:[#allocation5 + $0x84] ss:$48 sps:$4 sm:$0xff]   ;;  %v8411_v51 = vld [vmem:[#allocation5 + $0x8c] ss:$48 sps:$4 sm:$0xff]  }
 0x167   : > { %2925 = vmatprep.mubr.bf16.mxu0 %v9718_v44  ;;  %3031 = vmatprep.mubr.bf16.mxu1 %v9718_v44 }
 0x169   : > { %2900 = vmatpush1.bf16.msra.mxu0 %v8322_v52  ;;  %3006 = vmatpush1.bf16.msra.mxu1 %v8325_v53  ;;  %v8406_v52 = vld [vmem:[#allocation5 + $0x80] ss:$48 sps:$4 sm:$0xff]   ;;  %v8409_v53 = vld [vmem:[#allocation5 + $0x88] ss:$48 sps:$4 sm:$0xff]  }
 0x16a   : > { %2901 = vmatprep.subr.bf16.mxu0 %v8330_v54  ;;  %3007 = vmatprep.subr.bf16.mxu1 %v8333_v55  ;;  %v8414_v54 = vld [vmem:[#allocation5 + $0xe4] ss:$48 sps:$4 sm:$0xff]   ;;  %v8417_v55 = vld [vmem:[#allocation5 + $0xec] ss:$48 sps:$4 sm:$0xff]  }
 0x16d   : > { %2902 = vmatpush1.bf16.msra.mxu0 %v8328_v56  ;;  %3008 = vmatpush1.bf16.msra.mxu1 %v8331_v57  ;;  %v8412_v56 = vld [vmem:[#allocation5 + $0xe0] ss:$48 sps:$4 sm:$0xff]   ;;  %v8415_v57 = vld [vmem:[#allocation5 + $0xe8] ss:$48 sps:$4 sm:$0xff]  }
 0x16e   : > { %2903 = vmatprep.subr.bf16.mxu0 %v8336_v58  ;;  %3009 = vmatprep.subr.bf16.mxu1 %v8339_v59  ;;  %v8420_v58 = vld [vmem:[#allocation5 + $0x144] ss:$48 sps:$4 sm:$0xff]   ;;  %v8423_v59 = vld [vmem:[#allocation5 + $0x14c] ss:$48 sps:$4 sm:$0xff]  }
 0x171   : > { %2904 = vmatpush1.bf16.msra.mxu0 %v8334_v60  ;;  %3010 = vmatpush1.bf16.msra.mxu1 %v8337_v61  ;;  %v8418_v60 = vld [vmem:[#allocation5 + $0x140] ss:$48 sps:$4 sm:$0xff]   ;;  %v8421_v61 = vld [vmem:[#allocation5 + $0x148] ss:$48 sps:$4 sm:$0xff]  }
 0x172   : > { %2905 = vmatprep.subr.bf16.mxu0 %v8342_v62  ;;  %3011 = vmatprep.subr.bf16.mxu1 %v8345_v63  ;;  %v8426_v62 = vld [vmem:[#allocation5 + $0x1a4] ss:$48 sps:$4 sm:$0xff]   ;;  %v8429_v63 = vld [vmem:[#allocation5 + $0x1ac] ss:$48 sps:$4 sm:$0xff]  }
 0x175   : > { %2906 = vmatpush1.bf16.msra.mxu0 %v8340_v0  ;;  %3012 = vmatpush1.bf16.msra.mxu1 %v8343_v1  ;;  %v8424_v0 = vld [vmem:[#allocation5 + $0x1a0] ss:$48 sps:$4 sm:$0xff]   ;;  %v8427_v1 = vld [vmem:[#allocation5 + $0x1a8] ss:$48 sps:$4 sm:$0xff]  }
 0x176   : > { %2907 = vmatprep.subr.bf16.mxu0 %v8348_v2  ;;  %3013 = vmatprep.subr.bf16.mxu1 %v8351_v3  ;;  %v8432_v2 = vld [vmem:[#allocation5 + $0x204] ss:$48 sps:$4 sm:$0xff]   ;;  %v8435_v3 = vld [vmem:[#allocation5 + $0x20c] ss:$48 sps:$4 sm:$0xff]  }
 0x179   : > { %2908 = vmatpush1.bf16.msra.mxu0 %v8346_v4  ;;  %3014 = vmatpush1.bf16.msra.mxu1 %v8349_v5  ;;  %v8430_v4 = vld [vmem:[#allocation5 + $0x200] ss:$48 sps:$4 sm:$0xff]   ;;  %v8433_v5 = vld [vmem:[#allocation5 + $0x208] ss:$48 sps:$4 sm:$0xff]  }
 0x17a   : > { %2909 = vmatprep.subr.bf16.mxu0 %v8354_v6  ;;  %3015 = vmatprep.subr.bf16.mxu1 %v8357_v7  ;;  %v8438_v6 = vld [vmem:[#allocation5 + $0x264] ss:$48 sps:$4 sm:$0xff]   ;;  %v8441_v7 = vld [vmem:[#allocation5 + $0x26c] ss:$48 sps:$4 sm:$0xff]  }
 0x17d   : > { %2910 = vmatpush1.bf16.msra.mxu0 %v8352_v8  ;;  %3016 = vmatpush1.bf16.msra.mxu1 %v8355_v10  ;;  %v8436_v8 = vld [vmem:[#allocation5 + $0x260] ss:$48 sps:$4 sm:$0xff]   ;;  %v8439_v10 = vld [vmem:[#allocation5 + $0x268] ss:$48 sps:$4 sm:$0xff]  }
 0x17e   : > { %2911 = vmatprep.subr.bf16.mxu0 %v8360_v11  ;;  %3017 = vmatprep.subr.bf16.mxu1 %v8363_v12  ;;  %v8444_v11 = vld [vmem:[#allocation5 + $0x2c4] ss:$48 sps:$4 sm:$0xff]   ;;  %v8447_v12 = vld [vmem:[#allocation5 + $0x2cc] ss:$48 sps:$4 sm:$0xff]  }
 0x181   : > { %2912 = vmatpush1.bf16.msra.mxu0 %v8358_v13  ;;  %3018 = vmatpush1.bf16.msra.mxu1 %v8361_v14  ;;  %v8445_v13 = vld [vmem:[#allocation5 + $0x2c8] ss:$48 sps:$4 sm:$0xff]   ;;  %v8450_v14 = vld [vmem:[#allocation5 + $0x324] ss:$48 sps:$4 sm:$0xff]  }
 0x182   : > { %2913 = vmatprep.subr.bf16.mxu0 %v8366_v15  ;;  %3019 = vmatprep.subr.bf16.mxu1 %v8369_v16  ;;  %v8453_v15 = vld [vmem:[#allocation5 + $0x32c] ss:$48 sps:$4 sm:$0xff]   ;;  %v8448_v16 = vld [vmem:[#allocation5 + $0x320] ss:$48 sps:$4 sm:$0xff]  }
 0x185   : > { %2914 = vmatpush1.bf16.msra.mxu0 %v8364_v17  ;;  %3020 = vmatpush1.bf16.msra.mxu1 %v8367_v18  ;;  %v8451_v17 = vld [vmem:[#allocation5 + $0x328] ss:$48 sps:$4 sm:$0xff]   ;;  %v8456_v18 = vld [vmem:[#allocation5 + $0x384] ss:$48 sps:$4 sm:$0xff]  }
 0x186   : > { %2915 = vmatprep.subr.bf16.mxu0 %v8372_v19  ;;  %3021 = vmatprep.subr.bf16.mxu1 %v8375_v20  ;;  %v8459_v19 = vld [vmem:[#allocation5 + $0x38c] ss:$48 sps:$4 sm:$0xff]   ;;  %v8454_v20 = vld [vmem:[#allocation5 + $0x380] ss:$48 sps:$4 sm:$0xff]  }
 0x189   : > { %2916 = vmatpush1.bf16.msra.mxu0 %v8370_v21  ;;  %3022 = vmatpush1.bf16.msra.mxu1 %v8373_v22  ;;  %v8457_v21 = vld [vmem:[#allocation5 + $0x388] ss:$48 sps:$4 sm:$0xff]   ;;  %v8462_v22 = vld [vmem:[#allocation5 + $0x3e4] ss:$48 sps:$4 sm:$0xff]  }
 0x18a   : > { %2917 = vmatprep.subr.bf16.mxu0 %v8378_v24  ;;  %3023 = vmatprep.subr.bf16.mxu1 %v8381_v25  ;;  %v8465_v24 = vld [vmem:[#allocation5 + $0x3ec] ss:$48 sps:$4 sm:$0xff]   ;;  %v8460_v25 = vld [vmem:[#allocation5 + $0x3e0] ss:$48 sps:$4 sm:$0xff]  }
 0x18d   : > { %2918 = vmatpush1.bf16.msra.mxu0 %v8376_v26  ;;  %3024 = vmatpush1.bf16.msra.mxu1 %v8379_v27  ;;  %v8463_v26 = vld [vmem:[#allocation5 + $0x3e8] ss:$48 sps:$4 sm:$0xff]   ;;  %v8468_v27 = vld [vmem:[#allocation5 + $0x444] ss:$48 sps:$4 sm:$0xff]  }
 0x18e   : > { %2919 = vmatprep.subr.bf16.mxu0 %v8384_v28  ;;  %3025 = vmatprep.subr.bf16.mxu1 %v8387_v29  ;;  %v8471_v28 = vld [vmem:[#allocation5 + $0x44c] ss:$48 sps:$4 sm:$0xff]   ;;  %v8466_v29 = vld [vmem:[#allocation5 + $0x440] ss:$48 sps:$4 sm:$0xff]  }
 0x191   : > { %2920 = vmatpush1.bf16.msra.mxu0 %v8382_v32  ;;  %3026 = vmatpush1.bf16.msra.mxu1 %v8385_v33  ;;  %v8469_v32 = vld [vmem:[#allocation5 + $0x448] ss:$48 sps:$4 sm:$0xff]   ;;  %v8474_v33 = vld [vmem:[#allocation5 + $0x4a4] ss:$48 sps:$4 sm:$0xff]  }
 0x192   : > { %2921 = vmatprep.subr.bf16.mxu0 %v8390_v34  ;;  %3027 = vmatprep.subr.bf16.mxu1 %v8393_v36  ;;  %v8477_v34 = vld [vmem:[#allocation5 + $0x4ac] ss:$48 sps:$4 sm:$0xff]   ;;  %v8472_v36 = vld [vmem:[#allocation5 + $0x4a0] ss:$48 sps:$4 sm:$0xff]  }
 0x195   : > { %2922 = vmatpush1.bf16.msra.mxu0 %v8388_v38  ;;  %3028 = vmatpush1.bf16.msra.mxu1 %v8391_v39  ;;  %v8475_v38 = vld [vmem:[#allocation5 + $0x4a8] ss:$48 sps:$4 sm:$0xff]   ;;  %v8480_v39 = vld [vmem:[#allocation5 + $0x504] ss:$48 sps:$4 sm:$0xff]  }
 0x196   : > { %2923 = vmatprep.subr.bf16.mxu0 %v8396_v40  ;;  %3029 = vmatprep.subr.bf16.mxu1 %v8399_v41  ;;  %v8483_v40 = vld [vmem:[#allocation5 + $0x50c] ss:$48 sps:$4 sm:$0xff]   ;;  %v8478_v41 = vld [vmem:[#allocation5 + $0x500] ss:$48 sps:$4 sm:$0xff]  }
 0x199   : > { %2924 = vmatpush1.bf16.msra.mxu0 %v8394_v42  ;;  %3030 = vmatpush1.bf16.msra.mxu1 %v8397_v43  ;;  %v8481_v42 = vld [vmem:[#allocation5 + $0x508] ss:$48 sps:$4 sm:$0xff]   ;;  %v8486_v43 = vld [vmem:[#allocation5 + $0x564] ss:$48 sps:$4 sm:$0xff]  }
 0x19a   : > { %3052 = vmatprep.subr.bf16.mxu0 %v8402_v45  ;;  %3158 = vmatprep.subr.bf16.mxu1 %v8405_v46  ;;  %v8489_v45 = vld [vmem:[#allocation5 + $0x56c] ss:$48 sps:$4 sm:$0xff]   ;;  %v8484_v46 = vld [vmem:[#allocation5 + $0x560] ss:$48 sps:$4 sm:$0xff]  }
 0x19c   : > { %2926 = vmatmul.mubr.bf16.vlgmr.msra.gmra.mrb[8].mxu0 %v9724_v23  ;;  %3032 = vmatmul.mubr.bf16.vlgmr.msra.gmra.mrb[8].mxu1 %v9724_v23 }
 0x19d   : > { %3053 = vmatpush1.bf16.msra.mxu0 %v8400_v47  ;;  %3159 = vmatpush1.bf16.msra.mxu1 %v8403_v48  ;;  %v8487_v47 = vld [vmem:[#allocation5 + $0x568] ss:$48 sps:$4 sm:$0xff]   ;;  %v8492_v48 = vld [vmem:[#allocation5 + $0x5c4] ss:$48 sps:$4 sm:$0xff]  }
 0x19e   : > { %3054 = vmatprep.subr.bf16.mxu0 %v8408_v49  ;;  %3160 = vmatprep.subr.bf16.mxu1 %v8411_v51  ;;  %v8495_v49 = vld [vmem:[#allocation5 + $0x5cc] ss:$48 sps:$4 sm:$0xff]   ;;  %v8490_v51 = vld [vmem:[#allocation5 + $0x5c0] ss:$48 sps:$4 sm:$0xff]  }
 0x19f   : > { %2935 = vmatprep.mubr.bf16.mxu0 %v9728_v31  ;;  %3041 = vmatprep.mubr.bf16.mxu1 %v9728_v31 }
 0x1a1   : > { %3055 = vmatpush1.bf16.msra.mxu0 %v8406_v52  ;;  %3161 = vmatpush1.bf16.msra.mxu1 %v8409_v53  ;;  %v8493_v52 = vld [vmem:[#allocation5 + $0x5c8] ss:$48 sps:$4 sm:$0xff]   ;;  %v8498_v53 = vld [vmem:[#allocation5 + $0x624] ss:$48 sps:$4 sm:$0xff]  }
 0x1a2   : > { %3056 = vmatprep.subr.bf16.mxu0 %v8414_v54  ;;  %3162 = vmatprep.subr.bf16.mxu1 %v8417_v55  ;;  %v8501_v54 = vld [vmem:[#allocation5 + $0x62c] ss:$48 sps:$4 sm:$0xff]   ;;  %v8496_v55 = vld [vmem:[#allocation5 + $0x620] ss:$48 sps:$4 sm:$0xff]  }
 0x1a4   : > { %2936 = vmatmul.mubr.bf16.gmra.mrb[12].mxu0 %v9736_v37  ;;  %3042 = vmatmul.mubr.bf16.gmra.mrb[12].mxu1 %v9736_v37 }
 0x1a5   : > { %3057 = vmatpush1.bf16.msra.mxu0 %v8412_v56  ;;  %3163 = vmatpush1.bf16.msra.mxu1 %v8415_v57  ;;  %v8499_v56 = vld [vmem:[#allocation5 + $0x628] ss:$48 sps:$4 sm:$0xff]   ;;  %v8504_v57 = vld [vmem:[#allocation5 + $0x684] ss:$48 sps:$4 sm:$0xff]  }
 0x1a6   : > { %3058 = vmatprep.subr.bf16.mxu0 %v8420_v58  ;;  %3164 = vmatprep.subr.bf16.mxu1 %v8423_v59  ;;  %v8507_v58 = vld [vmem:[#allocation5 + $0x68c] ss:$48 sps:$4 sm:$0xff]   ;;  %v8502_v59 = vld [vmem:[#allocation5 + $0x680] ss:$48 sps:$4 sm:$0xff]  }
 0x1a7   : > { %3084 = vmatprep.mubr.bf16.mxu0 %v9694_v50  ;;  %3190 = vmatprep.mubr.bf16.mxu1 %v9694_v50  ;;  %v8442_v50 = vld [vmem:[#allocation5 + $0x2c0] ss:$48 sps:$4 sm:$0xff]  }
 0x1a9   : > { %3059 = vmatpush1.bf16.msra.mxu0 %v8418_v60  ;;  %3165 = vmatpush1.bf16.msra.mxu1 %v8421_v61  ;;  %v8505_v60 = vld [vmem:[#allocation5 + $0x688] ss:$48 sps:$4 sm:$0xff]   ;;  %v8510_v61 = vld [vmem:[#allocation5 + $0x6e4] ss:$48 sps:$4 sm:$0xff]  }
 0x1aa   : > { %3060 = vmatprep.subr.bf16.mxu0 %v8426_v62  ;;  %3166 = vmatprep.subr.bf16.mxu1 %v8429_v63  ;;  %v8513_v62 = vld [vmem:[#allocation5 + $0x6ec] ss:$48 sps:$4 sm:$0xff]   ;;  %v8508_v63 = vld [vmem:[#allocation5 + $0x6e0] ss:$48 sps:$4 sm:$0xff]  }
 0x1ad   : > { %3061 = vmatpush1.bf16.msra.mxu0 %v8424_v0  ;;  %3167 = vmatpush1.bf16.msra.mxu1 %v8427_v1  ;;  %v8511_v0 = vld [vmem:[#allocation5 + $0x6e8] ss:$48 sps:$4 sm:$0xff]   ;;  %v8516_v1 = vld [vmem:[#allocation5 + $0x744] ss:$48 sps:$4 sm:$0xff]  }
 0x1ae   : > { %3062 = vmatprep.subr.bf16.mxu0 %v8432_v2  ;;  %3168 = vmatprep.subr.bf16.mxu1 %v8435_v3  ;;  %v8519_v2 = vld [vmem:[#allocation5 + $0x74c] ss:$48 sps:$4 sm:$0xff]   ;;  %v8514_v3 = vld [vmem:[#allocation5 + $0x740] ss:$48 sps:$4 sm:$0xff]  }
 0x1b1   : > { %3063 = vmatpush1.bf16.msra.mxu0 %v8430_v4  ;;  %3169 = vmatpush1.bf16.msra.mxu1 %v8433_v5  ;;  %v8522_v4 = vld [vmem:[#allocation5 + $0x7a4] ss:$48 sps:$4 sm:$0xff]   ;;  %v8525_v5 = vld [vmem:[#allocation5 + $0x7ac] ss:$48 sps:$4 sm:$0xff]  }
 0x1b2   : > { %3064 = vmatprep.subr.bf16.mxu0 %v8438_v6  ;;  %3170 = vmatprep.subr.bf16.mxu1 %v8441_v7  ;;  %v8520_v6 = vld [vmem:[#allocation5 + $0x7a0] ss:$48 sps:$4 sm:$0xff]   ;;  %v8528_v7 = vld [vmem:[#allocation5 + $0x804] ss:$48 sps:$4 sm:$0xff]  }
 0x1b5   : > { %3065 = vmatpush1.bf16.msra.mxu0 %v8436_v8  ;;  %3171 = vmatpush1.bf16.msra.mxu1 %v8439_v10  ;;  %v8531_v8 = vld [vmem:[#allocation5 + $0x80c] ss:$48 sps:$4 sm:$0xff]   ;;  %v8526_v10 = vld [vmem:[#allocation5 + $0x800] ss:$48 sps:$4 sm:$0xff]  }
 0x1b6   : > { %3066 = vmatprep.subr.bf16.mxu0 %v8444_v11  ;;  %3172 = vmatprep.subr.bf16.mxu1 %v8447_v12  ;;  %v8529_v11 = vld [vmem:[#allocation5 + $0x808] ss:$48 sps:$4 sm:$0xff]   ;;  %v8534_v12 = vld [vmem:[#allocation5 + $0x864] ss:$48 sps:$4 sm:$0xff]  }
 0x1b9   : > { %3067 = vmatpush1.bf16.msra.mxu0 %v8442_v50  ;;  %3173 = vmatpush1.bf16.msra.mxu1 %v8445_v13 }
 0x1ba   : > { %3068 = vmatprep.subr.bf16.mxu0 %v8450_v14  ;;  %3174 = vmatprep.subr.bf16.mxu1 %v8453_v15  ;;  %v8532_v14 = vld [vmem:[#allocation5 + $0x860] ss:$48 sps:$4 sm:$0xff]  }
 0x1bd   : > { %3069 = vmatpush1.bf16.msra.mxu0 %v8448_v16  ;;  %3175 = vmatpush1.bf16.msra.mxu1 %v8451_v17 }
 0x1be   : > { %3070 = vmatprep.subr.bf16.mxu0 %v8456_v18  ;;  %3176 = vmatprep.subr.bf16.mxu1 %v8459_v19  ;;  %v8540_v18 = vld [vmem:[#allocation5 + $0x8c4] ss:$48 sps:$4 sm:$0xff]  }
 0x1c1   : > { %3071 = vmatpush1.bf16.msra.mxu0 %v8454_v20  ;;  %3177 = vmatpush1.bf16.msra.mxu1 %v8457_v21  ;;  %v8543_v21 = vld [vmem:[#allocation5 + $0x8cc] ss:$48 sps:$4 sm:$0xff]  }
 0x1c2   : > { %3072 = vmatprep.subr.bf16.mxu0 %v8462_v22  ;;  %3178 = vmatprep.subr.bf16.mxu1 %v8465_v24 }
 0x1c5   : > { %3073 = vmatpush1.bf16.msra.mxu0 %v8460_v25  ;;  %3179 = vmatpush1.bf16.msra.mxu1 %v8463_v26 }
 0x1c6   : > { %3074 = vmatprep.subr.bf16.mxu0 %v8468_v27  ;;  %3180 = vmatprep.subr.bf16.mxu1 %v8471_v28 }
 0x1c9   : > { %3075 = vmatpush1.bf16.msra.mxu0 %v8466_v29  ;;  %3181 = vmatpush1.bf16.msra.mxu1 %v8469_v32 }
 0x1ca   : > { %3076 = vmatprep.subr.bf16.mxu0 %v8474_v33  ;;  %3182 = vmatprep.subr.bf16.mxu1 %v8477_v34  ;;  %v8538_v34 = vld [vmem:[#allocation5 + $0x8c0] ss:$48 sps:$4 sm:$0xff]  }
 0x1cd   : > { %3077 = vmatpush1.bf16.msra.mxu0 %v8472_v36  ;;  %3183 = vmatpush1.bf16.msra.mxu1 %v8475_v38  ;;  %v8541_v36 = vld [vmem:[#allocation5 + $0x8c8] ss:$48 sps:$4 sm:$0xff]   ;;  %v8546_v38 = vld [vmem:[#allocation5 + $0x924] ss:$48 sps:$4 sm:$0xff]  }
 0x1ce   : > { %3078 = vmatprep.subr.bf16.mxu0 %v8480_v39  ;;  %3184 = vmatprep.subr.bf16.mxu1 %v8483_v40  ;;  %v8549_v39 = vld [vmem:[#allocation5 + $0x92c] ss:$48 sps:$4 sm:$0xff]  }
 0x1d1   : > { %3079 = vmatpush1.bf16.msra.mxu0 %v8478_v41  ;;  %3185 = vmatpush1.bf16.msra.mxu1 %v8481_v42 }
 0x1d2   : > { %3080 = vmatprep.subr.bf16.mxu0 %v8486_v43  ;;  %3186 = vmatprep.subr.bf16.mxu1 %v8489_v45 }
 0x1d5   : > { %3081 = vmatpush1.bf16.msra.mxu0 %v8484_v46  ;;  %3187 = vmatpush1.bf16.msra.mxu1 %v8487_v47  ;;  %v8544_v46 = vld [vmem:[#allocation5 + $0x920] ss:$48 sps:$4 sm:$0xff]   ;;  %v8547_v47 = vld [vmem:[#allocation5 + $0x928] ss:$48 sps:$4 sm:$0xff]  }
 0x1d6   : > { %3082 = vmatprep.subr.bf16.mxu0 %v8492_v48  ;;  %3188 = vmatprep.subr.bf16.mxu1 %v8495_v49 }
 0x1d9   : > { %3083 = vmatpush1.bf16.msra.mxu0 %v8490_v51  ;;  %3189 = vmatpush1.bf16.msra.mxu1 %v8493_v52  ;;  %v8552_v51 = vld [vmem:[#allocation5 + $0x984] ss:$48 sps:$4 sm:$0xff]   ;;  %v8555_v52 = vld [vmem:[#allocation5 + $0x98c] ss:$48 sps:$4 sm:$0xff]  }
 0x1da   : > { %3105 = vmatprep.subr.bf16.mxu0 %v8498_v53  ;;  %3211 = vmatprep.subr.bf16.mxu1 %v8501_v54 }
 0x1dc   : > { %3085 = vmatmul.mubr.bf16.vlgmr.msra.gmra.mrb[16].mxu0 %v9700_v9  ;;  %3191 = vmatmul.mubr.bf16.vlgmr.msra.gmra.mrb[16].mxu1 %v9700_v9  ;;  %v8517_v9 = vld [vmem:[#allocation5 + $0x748] ss:$48 sps:$4 sm:$0xff]  }
 0x1dd   : > { %3106 = vmatpush1.bf16.msra.mxu0 %v8496_v55  ;;  %3212 = vmatpush1.bf16.msra.mxu1 %v8499_v56 }
 0x1de   : > { %3107 = vmatprep.subr.bf16.mxu0 %v8504_v57  ;;  %3213 = vmatprep.subr.bf16.mxu1 %v8507_v58 }
 0x1df   : > { %3094 = vmatprep.mubr.bf16.mxu0 %v9706_v30  ;;  %3200 = vmatprep.mubr.bf16.mxu1 %v9706_v30  ;;  %v8523_v30 = vld [vmem:[#allocation5 + $0x7a8] ss:$48 sps:$4 sm:$0xff]  }
 0x1e1   : > { %3108 = vmatpush1.bf16.msra.mxu0 %v8502_v59  ;;  %3214 = vmatpush1.bf16.msra.mxu1 %v8505_v60 }
 0x1e2   : > { %3109 = vmatprep.subr.bf16.mxu0 %v8510_v61  ;;  %3215 = vmatprep.subr.bf16.mxu1 %v8513_v62 }
 0x1e4   : > { %3095 = vmatmul.mubr.bf16.gmra.mrb[20].mxu0 %v9710_v35  ;;  %3201 = vmatmul.mubr.bf16.gmra.mrb[20].mxu1 %v9710_v35  ;;  %v8537_v35 = vld [vmem:[#allocation5 + $0x86c] ss:$48 sps:$4 sm:$0xff]  }
 0x1e5   : > { %3110 = vmatpush1.bf16.msra.mxu0 %v8508_v63  ;;  %3216 = vmatpush1.bf16.msra.mxu1 %v8511_v0 }
 0x1e6   : > { %3111 = vmatprep.subr.bf16.mxu0 %v8516_v1  ;;  %3217 = vmatprep.subr.bf16.mxu1 %v8519_v2 }
 0x1e7   : > { %3137 = vmatprep.mubr.bf16.mxu0 %v9718_v44  ;;  %3243 = vmatprep.mubr.bf16.mxu1 %v9718_v44  ;;  %v8535_v44 = vld [vmem:[#allocation5 + $0x868] ss:$48 sps:$4 sm:$0xff]  }
 0x1e9   : > { %3112 = vmatpush1.bf16.msra.mxu0 %v8514_v3  ;;  %3218 = vmatpush1.bf16.msra.mxu1 %v8517_v9  ;;  %v8550_v9 = vld [vmem:[#allocation5 + $0x980] ss:$48 sps:$4 sm:$0xff]  }
 0x1ea   : > { %3113 = vmatprep.subr.bf16.mxu0 %v8522_v4  ;;  %3219 = vmatprep.subr.bf16.mxu1 %v8525_v5  ;;  %v8553_v4 = vld [vmem:[#allocation5 + $0x988] ss:$48 sps:$4 sm:$0xff]  }
 0x1ed   : > { %3114 = vmatpush1.bf16.msra.mxu0 %v8520_v6  ;;  %3220 = vmatpush1.bf16.msra.mxu1 %v8523_v30  ;;  %v8558_v30 = vld [vmem:[#allocation5 + $0x9e4] ss:$48 sps:$4 sm:$0xff]  }
 0x1ee   : > { %3115 = vmatprep.subr.bf16.mxu0 %v8528_v7  ;;  %3221 = vmatprep.subr.bf16.mxu1 %v8531_v8  ;;  %v8561_v7 = vld [vmem:[#allocation5 + $0x9ec] ss:$48 sps:$4 sm:$0xff]   ;;  %v8556_v8 = vld [vmem:[#allocation5 + $0x9e0] ss:$48 sps:$4 sm:$0xff]  }
 0x1ef   : > { %v9766_v50 = vpop.f32.mrb[0].mxu0  ;;  %v9768_v13 = vpop.f32.mrb[0].mxu1 }
 0x1f0   : > { %v3283_v15 = vrot.slane %v9768_v13, 7  ;;  %v9771_v16 = vpop.f32.mrb[1].mxu0  ;;  %v9773_v17 = vpop.f32.mrb[1].mxu1  ;;  %v3281_v22 = vrot.slane %v9766_v50, 7 }
 0x1f1   : > { %v2719_v19 = vpop.f32.mrb[2].mxu0  ;;  %v2825_v20 = vpop.f32.mrb[2].mxu1  ;;  %3116 = vmatpush1.bf16.msra.mxu0 %v8526_v10  ;;  %3222 = vmatpush1.bf16.msra.mxu1 %v8529_v11  ;;  %v3282_v28 = vrot.slane %v9771_v16, 7  ;;  %v3284_v29 = vrot.slane %v9773_v17, 7  ;;  %v8559_v10 = vld [vmem:[#allocation5 + $0x9e8] ss:$48 sps:$4 sm:$0xff]  }
 0x1f2   : > { %v3285_v24 = vrot.slane %v2719_v19, 7  ;;  %v3289_v25 = vrot.slane %v2825_v20, 7  ;;  %v2721_v26 = vpop.f32.mrb[3].mxu0  ;;  %v2827_v27 = vpop.f32.mrb[3].mxu1  ;;  %3117 = vmatprep.subr.bf16.mxu0 %v8534_v12  ;;  %3223 = vmatprep.subr.bf16.mxu1 %v8537_v35  ;;  %v8564_v11 = vld [vmem:[#allocation5 + $0xa44] ss:$48 sps:$4 sm:$0xff]  }
 0x1f3   : > { %v3287_v32 = vrot.slane %v2721_v26, 7  ;;  %v3291_v33 = vrot.slane %v2827_v27, 7  ;;  %v8567_v12 = vld [vmem:[#allocation5 + $0xa4c] ss:$48 sps:$4 sm:$0xff]   ;;  %v8562_v35 = vld [vmem:[#allocation5 + $0xa40] ss:$48 sps:$4 sm:$0xff]  }
 0x1f4   : > { %v9781_v40 = vsel %vm3280_vm0, %v3281_v22, %v3285_v24  ;;  %v9786_v41 = vsel %vm3280_vm0, %v3283_v15, %v3289_v25  ;;  %v8568_v19 = vld [vmem:[#allocation5 + $0xaa0] ss:$48 sps:$4 sm:$0xff]   ;;  %v8571_v20 = vld [vmem:[#allocation5 + $0xaa8] ss:$48 sps:$4 sm:$0xff]   ;;  %v8579_v24 = vld [vmem:[#allocation5 + $0xb0c] ss:$48 sps:$4 sm:$0xff]  }
 0x1f5   : > { %3118 = vmatpush1.bf16.msra.mxu0 %v8532_v14  ;;  %3224 = vmatpush1.bf16.msra.mxu1 %v8535_v44  ;;  %v9791_v42 = vsel %vm3280_vm0, %v3282_v28, %v3287_v32  ;;  %v9796_v43 = vsel %vm3280_vm0, %v3284_v29, %v3291_v33  ;;  %v8565_v14 = vld [vmem:[#allocation5 + $0xa48] ss:$48 sps:$4 sm:$0xff]   ;;  %v8570_v44 = vld [vmem:[#allocation5 + $0xaa4] ss:$48 sps:$4 sm:$0xff]   ;;  %v8574_v25 = vld [vmem:[#allocation5 + $0xb00] ss:$48 sps:$4 sm:$0xff]  }
 0x1f6   : > { %3119 = vmatprep.subr.bf16.mxu0 %v8540_v18  ;;  %3225 = vmatprep.subr.bf16.mxu1 %v8543_v21  ;;  %v8573_v18 = vld [vmem:[#allocation5 + $0xaac] ss:$48 sps:$4 sm:$0xff]   ;;  %v8576_v21 = vld [vmem:[#allocation5 + $0xb04] ss:$48 sps:$4 sm:$0xff]   ;;  %v8577_v26 = vld [vmem:[#allocation5 + $0xb08] ss:$48 sps:$4 sm:$0xff]  }
 0x1f7   : > { %v9798_v45 = vpop.f32.mrb[4].mxu0  ;;  %v9800_v48 = vpop.f32.mrb[4].mxu1  ;;  %v8582_v27 = vld [vmem:[#allocation5 + $0xb64] ss:$48 sps:$4 sm:$0xff]   ;;  %v8585_v32 = vld [vmem:[#allocation5 + $0xb6c] ss:$48 sps:$4 sm:$0xff]  }
 0x1f8   : > { %v9802_v49 = vpop.f32.mrb[5].mxu0  ;;  %v3295_v53 = vrot.slane %v9800_v48, 7  ;;  %v9805_v54 = vpop.f32.mrb[5].mxu1  ;;  %v3293_v58 = vrot.slane %v9798_v45, 7  ;;  %v8580_v33 = vld [vmem:[#allocation5 + $0xb60] ss:$48 sps:$4 sm:$0xff]  }
 0x1f9   : > { %v2729_v55 = vpop.f32.mrb[6].mxu0  ;;  %3120 = vmatpush1.bf16.msra.mxu0 %v8538_v34  ;;  %3226 = vmatpush1.bf16.msra.mxu1 %v8541_v36  ;;  %v3296_v56 = vrot.slane %v9805_v54, 7  ;;  %v2835_v57 = vpop.f32.mrb[6].mxu1  ;;  %v3294_v63 = vrot.slane %v9802_v49, 7  ;;  %v8583_v34 = vld [vmem:[#allocation5 + $0xb68] ss:$48 sps:$4 sm:$0xff]  }
 0x1fa   : > { %v3297_v59 = vrot.slane %v2729_v55, 7  ;;  %v2731_v60 = vpop.f32.mrb[7].mxu0  ;;  %3121 = vmatprep.subr.bf16.mxu0 %v8546_v38  ;;  %3227 = vmatprep.subr.bf16.mxu1 %v8549_v39  ;;  %v3301_v61 = vrot.slane %v2835_v57, 7  ;;  %v2837_v62 = vpop.f32.mrb[7].mxu1  ;;  %v8588_v36 = vld [vmem:[#allocation5 + $0xbc4] ss:$48 sps:$4 sm:$0xff]  }
 0x1fb   : > { %v3299_v0 = vrot.slane %v2731_v60, 7  ;;  %v3303_v1 = vrot.slane %v2837_v62, 7  ;;  %v8591_v38 = vld [vmem:[#allocation5 + $0xbcc] ss:$48 sps:$4 sm:$0xff]   ;;  %v8586_v39 = vld [vmem:[#allocation5 + $0xbc0] ss:$48 sps:$4 sm:$0xff]  }
 0x1fc   : > { %v9813_v2 = vsel %vm3280_vm0, %v3293_v58, %v3297_v59  ;;  %v9818_v3 = vsel %vm3280_vm0, %v3295_v53, %v3301_v61  ;;  %v8595_v55 = vld [vmem:[#allocation7 + $0x8] ss:$48 sps:$4 sm:$0xff]   ;;  %v8600_v57 = vld [vmem:[#allocation7 + $0x64] ss:$48 sps:$4 sm:$0xff]   ;;  %v8603_v59 = vld [vmem:[#allocation7 + $0x6c] ss:$48 sps:$4 sm:$0xff]  }
 0x1fd   : > { %3122 = vmatpush1.bf16.msra.mxu0 %v8544_v46  ;;  %3228 = vmatpush1.bf16.msra.mxu1 %v8547_v47  ;;  %v9823_v5 = vsel %vm3280_vm0, %v3294_v63, %v3299_v0  ;;  %v9828_v6 = vsel %vm3280_vm0, %v3296_v56, %v3303_v1  ;;  %v8589_v46 = vld [vmem:[#allocation5 + $0xbc8] ss:$48 sps:$4 sm:$0xff]   ;;  %v8594_v47 = vld [vmem:[#allocation7 + $0x4] ss:$48 sps:$4 sm:$0xff]   ;;  %v8598_v60 = vld [vmem:[#allocation7 + $0x60] ss:$48 sps:$4 sm:$0xff]  }
 0x1fe   : > { %3123 = vmatprep.subr.bf16.mxu0 %v8552_v51  ;;  %3229 = vmatprep.subr.bf16.mxu1 %v8555_v52  ;;  %v8597_v51 = vld [vmem:[#allocation7 + $0xc] ss:$48 sps:$4 sm:$0xff]   ;;  %v8592_v52 = vld [vmem:[#allocation7] ss:$48 sps:$4 sm:$0xff]   ;;  %v8601_v61 = vld [vmem:[#allocation7 + $0x68] ss:$48 sps:$4 sm:$0xff]  }
 0x1ff   : > { %v8606_v62 = vld [vmem:[#allocation7 + $0xc4] ss:$48 sps:$4 sm:$0xff]   ;;  %v8609_v0 = vld [vmem:[#allocation7 + $0xcc] ss:$48 sps:$4 sm:$0xff]   ;;  %v8604_v1 = vld [vmem:[#allocation7 + $0xc0] ss:$48 sps:$4 sm:$0xff]  }
 0x200   : > { %v3322_v50 = vsel %vm3280_vm0, 0.0, %v3282_v28  ;;  %v3324_v13 = vsel %vm3280_vm0, 0.0, %v3284_v29  ;;  %v8687_v48 = vld [vmem:[#allocation7 + $0x5ac] ss:$48 sps:$4 sm:$0xff]   ;;  %v8685_v54 = vld [vmem:[#allocation7 + $0x5a8] ss:$48 sps:$4 sm:$0xff]  }
 0x201   : > { %3124 = vmatpush1.bf16.msra.mxu0 %v8550_v9  ;;  %3230 = vmatpush1.bf16.msra.mxu1 %v8553_v4  ;;  %v8607_v9 = vld [vmem:[#allocation7 + $0xc8] ss:$48 sps:$4 sm:$0xff]   ;;  %v8612_v4 = vld [vmem:[#allocation7 + $0x124] ss:$48 sps:$4 sm:$0xff]  }
 0x202   : > { %3125 = vmatprep.subr.bf16.mxu0 %v8558_v30  ;;  %3231 = vmatprep.subr.bf16.mxu1 %v8561_v7  ;;  %v8615_v30 = vld [vmem:[#allocation7 + $0x12c] ss:$48 sps:$4 sm:$0xff]   ;;  %v8618_v7 = vld [vmem:[#allocation7 + $0x184] ss:$48 sps:$4 sm:$0xff]  }
 0x205   : > { %3126 = vmatpush1.bf16.msra.mxu0 %v8556_v8  ;;  %3232 = vmatpush1.bf16.msra.mxu1 %v8559_v10  ;;  %v8621_v8 = vld [vmem:[#allocation7 + $0x18c] ss:$48 sps:$4 sm:$0xff]   ;;  %v8616_v10 = vld [vmem:[#allocation7 + $0x180] ss:$48 sps:$4 sm:$0xff]  }
 0x206   : > { %3127 = vmatprep.subr.bf16.mxu0 %v8564_v11  ;;  %3233 = vmatprep.subr.bf16.mxu1 %v8567_v12  ;;  %v8619_v11 = vld [vmem:[#allocation7 + $0x188] ss:$48 sps:$4 sm:$0xff]   ;;  %v8624_v12 = vld [vmem:[#allocation7 + $0x1e4] ss:$48 sps:$4 sm:$0xff]  }
 0x209   : > { %3128 = vmatpush1.bf16.msra.mxu0 %v8562_v35  ;;  %3234 = vmatpush1.bf16.msra.mxu1 %v8565_v14  ;;  %v8627_v35 = vld [vmem:[#allocation7 + $0x1ec] ss:$48 sps:$4 sm:$0xff]   ;;  %v8622_v14 = vld [vmem:[#allocation7 + $0x1e0] ss:$48 sps:$4 sm:$0xff]  }
 0x20a   : > { %3129 = vmatprep.subr.bf16.mxu0 %v8570_v44  ;;  %3235 = vmatprep.subr.bf16.mxu1 %v8573_v18  ;;  %v8625_v44 = vld [vmem:[#allocation7 + $0x1e8] ss:$48 sps:$4 sm:$0xff]   ;;  %v8630_v18 = vld [vmem:[#allocation7 + $0x244] ss:$48 sps:$4 sm:$0xff]  }
 0x20d   : > { %3130 = vmatpush1.bf16.msra.mxu0 %v8568_v19  ;;  %3236 = vmatpush1.bf16.msra.mxu1 %v8571_v20  ;;  %v8628_v19 = vld [vmem:[#allocation7 + $0x240] ss:$48 sps:$4 sm:$0xff]   ;;  %v8631_v20 = vld [vmem:[#allocation7 + $0x248] ss:$48 sps:$4 sm:$0xff]  }
 0x20e   : > { %3131 = vmatprep.subr.bf16.mxu0 %v8576_v21  ;;  %3237 = vmatprep.subr.bf16.mxu1 %v8579_v24  ;;  %v8636_v21 = vld [vmem:[#allocation7 + $0x2a4] ss:$48 sps:$4 sm:$0xff]   ;;  %v8639_v24 = vld [vmem:[#allocation7 + $0x2ac] ss:$48 sps:$4 sm:$0xff]  }
 0x211   : > { %3132 = vmatpush1.bf16.msra.mxu0 %v8574_v25  ;;  %3238 = vmatpush1.bf16.msra.mxu1 %v8577_v26  ;;  %v8634_v25 = vld [vmem:[#allocation7 + $0x2a0] ss:$48 sps:$4 sm:$0xff]   ;;  %v8637_v26 = vld [vmem:[#allocation7 + $0x2a8] ss:$48 sps:$4 sm:$0xff]  }
 0x212   : > { %3133 = vmatprep.subr.bf16.mxu0 %v8582_v27  ;;  %3239 = vmatprep.subr.bf16.mxu1 %v8585_v32  ;;  %v8642_v27 = vld [vmem:[#allocation7 + $0x304] ss:$48 sps:$4 sm:$0xff]   ;;  %v8645_v32 = vld [vmem:[#allocation7 + $0x30c] ss:$48 sps:$4 sm:$0xff]  }
 0x215   : > { %3134 = vmatpush1.bf16.msra.mxu0 %v8580_v33  ;;  %3240 = vmatpush1.bf16.msra.mxu1 %v8583_v34  ;;  %v8640_v33 = vld [vmem:[#allocation7 + $0x300] ss:$48 sps:$4 sm:$0xff]   ;;  %v8643_v34 = vld [vmem:[#allocation7 + $0x308] ss:$48 sps:$4 sm:$0xff]  }
 0x216   : > { %3135 = vmatprep.subr.bf16.mxu0 %v8588_v36  ;;  %3241 = vmatprep.subr.bf16.mxu1 %v8591_v38  ;;  %v8648_v36 = vld [vmem:[#allocation7 + $0x364] ss:$48 sps:$4 sm:$0xff]   ;;  %v8651_v38 = vld [vmem:[#allocation7 + $0x36c] ss:$48 sps:$4 sm:$0xff]  }
 0x219   : > { %3136 = vmatpush1.bf16.msra.mxu0 %v8586_v39  ;;  %3242 = vmatpush1.bf16.msra.mxu1 %v8589_v46  ;;  %v8646_v39 = vld [vmem:[#allocation7 + $0x360] ss:$48 sps:$4 sm:$0xff]   ;;  %v8649_v46 = vld [vmem:[#allocation7 + $0x368] ss:$48 sps:$4 sm:$0xff]  }
 0x21a   : > { %5754 = vmatprep.subr.bf16.mxu0 %v8594_v47  ;;  %5860 = vmatprep.subr.bf16.mxu1 %v8597_v51  ;;  %v8654_v47 = vld [vmem:[#allocation7 + $0x3c4] ss:$48 sps:$4 sm:$0xff]   ;;  %v8657_v51 = vld [vmem:[#allocation7 + $0x3cc] ss:$48 sps:$4 sm:$0xff]  }
 0x21c   : > { %3138 = vmatmul.mubr.bf16.vlgmr.msra.gmra.mrb[16].mxu0 %v9724_v23  ;;  %3244 = vmatmul.mubr.bf16.vlgmr.msra.gmra.mrb[16].mxu1 %v9724_v23  ;;  %v8610_v23 = vld [vmem:[#allocation7 + $0x120] ss:$48 sps:$4 sm:$0xff]  }
 0x21d   : > { %3147 = vmatprep.mubr.bf16.mxu0 %v9728_v31  ;;  %3253 = vmatprep.mubr.bf16.mxu1 %v9728_v31  ;;  %v8613_v31 = vld [vmem:[#allocation7 + $0x128] ss:$48 sps:$4 sm:$0xff]  }
 0x21e   : > { %5755 = vmatpush1.bf16.msra.mxu0 %v8592_v52  ;;  %5861 = vmatpush1.bf16.msra.mxu1 %v8595_v55  ;;  %v8652_v52 = vld [vmem:[#allocation7 + $0x3c0] ss:$48 sps:$4 sm:$0xff]   ;;  %v8655_v55 = vld [vmem:[#allocation7 + $0x3c8] ss:$48 sps:$4 sm:$0xff]  }
 0x21f   : > { %5756 = vmatprep.subr.bf16.mxu0 %v8600_v57  ;;  %5862 = vmatprep.subr.bf16.mxu1 %v8603_v59  ;;  %v8660_v57 = vld [vmem:[#allocation7 + $0x424] ss:$48 sps:$4 sm:$0xff]   ;;  %v8663_v59 = vld [vmem:[#allocation7 + $0x42c] ss:$48 sps:$4 sm:$0xff]  }
 0x222   : > { %5757 = vmatpush1.bf16.msra.mxu0 %v8598_v60  ;;  %5863 = vmatpush1.bf16.msra.mxu1 %v8601_v61  ;;  %v8658_v60 = vld [vmem:[#allocation7 + $0x420] ss:$48 sps:$4 sm:$0xff]   ;;  %v8661_v61 = vld [vmem:[#allocation7 + $0x428] ss:$48 sps:$4 sm:$0xff]  }
 0x223   : > { %5758 = vmatprep.subr.bf16.mxu0 %v8606_v62  ;;  %5864 = vmatprep.subr.bf16.mxu1 %v8609_v0  ;;  %v8666_v62 = vld [vmem:[#allocation7 + $0x484] ss:$48 sps:$4 sm:$0xff]   ;;  %v8669_v0 = vld [vmem:[#allocation7 + $0x48c] ss:$48 sps:$4 sm:$0xff]  }
 0x224   : > { %3148 = vmatmul.mubr.bf16.gmra.mrb[20].mxu0 %v9736_v37  ;;  %3254 = vmatmul.mubr.bf16.gmra.mrb[20].mxu1 %v9736_v37  ;;  %v8633_v37 = vld [vmem:[#allocation7 + $0x24c] ss:$48 sps:$4 sm:$0xff]  }
 0x226   : > { %5759 = vmatpush1.bf16.msra.mxu0 %v8604_v1  ;;  %5865 = vmatpush1.bf16.msra.mxu1 %v8607_v9  ;;  %v8664_v1 = vld [vmem:[#allocation7 + $0x480] ss:$48 sps:$4 sm:$0xff]   ;;  %v8667_v9 = vld [vmem:[#allocation7 + $0x488] ss:$48 sps:$4 sm:$0xff]  }
 0x227   : > { %5760 = vmatprep.subr.bf16.mxu0 %v8612_v4  ;;  %5866 = vmatprep.subr.bf16.mxu1 %v8615_v30  ;;  %v3321_v4 = vsel %vm3280_vm0, 0.0, %v3281_v22  ;;  %v3323_v30 = vsel %vm3280_vm0, 0.0, %v3283_v15 }
 0x22a   : > { %5761 = vmatpush1.bf16.msra.mxu0 %v8610_v23  ;;  %5867 = vmatpush1.bf16.msra.mxu1 %v8613_v31  ;;  %v8672_v23 = vld [vmem:[#allocation7 + $0x4e4] ss:$48 sps:$4 sm:$0xff]   ;;  %v8675_v31 = vld [vmem:[#allocation7 + $0x4ec] ss:$48 sps:$4 sm:$0xff]  }
 0x22b   : > { %5762 = vmatprep.subr.bf16.mxu0 %v8618_v7  ;;  %5868 = vmatprep.subr.bf16.mxu1 %v8621_v8 }
 0x22e   : > { %5763 = vmatpush1.bf16.msra.mxu0 %v8616_v10  ;;  %5869 = vmatpush1.bf16.msra.mxu1 %v8619_v11  ;;  %v8670_v10 = vld [vmem:[#allocation7 + $0x4e0] ss:$48 sps:$4 sm:$0xff]   ;;  %v8673_v11 = vld [vmem:[#allocation7 + $0x4e8] ss:$48 sps:$4 sm:$0xff]  }
 0x22f   : > { %5764 = vmatprep.subr.bf16.mxu0 %v8624_v12  ;;  %5870 = vmatprep.subr.bf16.mxu1 %v8627_v35 }
 0x232   : > { %5765 = vmatpush1.bf16.msra.mxu0 %v8622_v14  ;;  %5871 = vmatpush1.bf16.msra.mxu1 %v8625_v44 }
 0x233   : > { %5766 = vmatprep.subr.bf16.mxu0 %v8630_v18  ;;  %5872 = vmatprep.subr.bf16.mxu1 %v8633_v37 }
 0x236   : > { %5767 = vmatpush1.bf16.msra.mxu0 %v8628_v19  ;;  %5873 = vmatpush1.bf16.msra.mxu1 %v8631_v20 }
 0x237   : > { %5768 = vmatprep.subr.bf16.mxu0 %v8636_v21  ;;  %5874 = vmatprep.subr.bf16.mxu1 %v8639_v24  ;;  %v8678_v21 = vld [vmem:[#allocation7 + $0x544] ss:$48 sps:$4 sm:$0xff]   ;;  %v8681_v24 = vld [vmem:[#allocation7 + $0x54c] ss:$48 sps:$4 sm:$0xff]  }
 0x23a   : > { %5769 = vmatpush1.bf16.msra.mxu0 %v8634_v25  ;;  %5875 = vmatpush1.bf16.msra.mxu1 %v8637_v26  ;;  %v8676_v25 = vld [vmem:[#allocation7 + $0x540] ss:$48 sps:$4 sm:$0xff]   ;;  %v8679_v26 = vld [vmem:[#allocation7 + $0x548] ss:$48 sps:$4 sm:$0xff]  }
 0x23b   : > { %5770 = vmatprep.subr.bf16.mxu0 %v8642_v27  ;;  %5876 = vmatprep.subr.bf16.mxu1 %v8645_v32  ;;  %v3328_v32 = vsel %vm3280_vm0, 0.0, %v3296_v56 }
 0x23e   : > { %5771 = vmatpush1.bf16.msra.mxu0 %v8640_v33  ;;  %5877 = vmatpush1.bf16.msra.mxu1 %v8643_v34 }
 0x23f   : > { %5772 = vmatprep.subr.bf16.mxu0 %v8648_v36  ;;  %5878 = vmatprep.subr.bf16.mxu1 %v8651_v38  ;;  %v8684_v36 = vld [vmem:[#allocation7 + $0x5a4] ss:$48 sps:$4 sm:$0xff]  }
 0x242   : > { %5773 = vmatpush1.bf16.msra.mxu0 %v8646_v39  ;;  %5879 = vmatpush1.bf16.msra.mxu1 %v8649_v46  ;;  %v8682_v39 = vld [vmem:[#allocation7 + $0x5a0] ss:$48 sps:$4 sm:$0xff]  }
 0x243   : > { %5774 = vmatprep.subr.bf16.mxu0 %v8654_v47  ;;  %5880 = vmatprep.subr.bf16.mxu1 %v8657_v51 }
 0x246   : > { %5775 = vmatpush1.bf16.msra.mxu0 %v8652_v52  ;;  %5881 = vmatpush1.bf16.msra.mxu1 %v8655_v55 }
 0x247   : > { %5776 = vmatprep.subr.bf16.mxu0 %v8660_v57  ;;  %5882 = vmatprep.subr.bf16.mxu1 %v8663_v59  ;;  %v8690_v57 = vld [vmem:[#allocation7 + $0x604] ss:$48 sps:$4 sm:$0xff]   ;;  %v8693_v59 = vld [vmem:[#allocation7 + $0x60c] ss:$48 sps:$4 sm:$0xff]  }
 0x24a   : > { %5777 = vmatpush1.bf16.msra.mxu0 %v8658_v60  ;;  %5883 = vmatpush1.bf16.msra.mxu1 %v8661_v61 }
 0x24b   : > { %5778 = vmatprep.subr.bf16.mxu0 %v8666_v62  ;;  %5884 = vmatprep.subr.bf16.mxu1 %v8669_v0 }
 0x24e   : > { %5779 = vmatpush1.bf16.msra.mxu0 %v8664_v1  ;;  %5885 = vmatpush1.bf16.msra.mxu1 %v8667_v9 }
 0x24f   : > { %5780 = vmatprep.subr.bf16.mxu0 %v8672_v23  ;;  %5886 = vmatprep.subr.bf16.mxu1 %v8675_v31 }
 0x252   : > { %5781 = vmatpush1.bf16.msra.mxu0 %v8670_v10  ;;  %5887 = vmatpush1.bf16.msra.mxu1 %v8673_v11 }
 0x253   : > { %5782 = vmatprep.subr.bf16.mxu0 %v8678_v21  ;;  %5888 = vmatprep.subr.bf16.mxu1 %v8681_v24 }
 0x256   : > { %5783 = vmatpush1.bf16.msra.mxu0 %v8676_v25  ;;  %5889 = vmatpush1.bf16.msra.mxu1 %v8679_v26 }
 0x257   : > { %5784 = vmatprep.subr.bf16.mxu0 %v8684_v36  ;;  %5890 = vmatprep.subr.bf16.mxu1 %v8687_v48 }
 0x25a   : > { %5785 = vmatpush1.bf16.msra.mxu0 %v8682_v39  ;;  %5891 = vmatpush1.bf16.msra.mxu1 %v8685_v54 }
 0x25b   : > { %5807 = vmatprep.subr.bf16.mxu0 %v8690_v57  ;;  %5913 = vmatprep.subr.bf16.mxu1 %v8693_v59 }
 0x26f   : > { %v2927_v7 = vpop.f32.mrb[8].mxu0  ;;  %v3033_v8 = vpop.f32.mrb[8].mxu1 }
 0x270   : > { %v9842_v12 = vadd.f32 %v3321_v4, %v2927_v7  ;;  %v9844_v35 = vadd.f32 %v3323_v30, %v3033_v8  ;;  %v2929_v14 = vpop.f32.mrb[9].mxu0  ;;  %v3035_v22 = vpop.f32.mrb[9].mxu1 }
 0x271   : > { %v9852_v15 = vadd.f32 %v3322_v50, %v2929_v14  ;;  %v9854_v44 = vadd.f32 %v3324_v13, %v3035_v22  ;;  %v2931_v18 = vpop.f32.mrb[10].mxu0  ;;  %v3037_v37 = vpop.f32.mrb[10].mxu1 }
 0x272   : > { %v9857_v19 = vadd.f32 %v9781_v40, %v2931_v18  ;;  %v9860_v16 = vadd.f32 %v9786_v41, %v3037_v37  ;;  %v2933_v28 = vpop.f32.mrb[11].mxu0  ;;  %v3039_v17 = vpop.f32.mrb[11].mxu1  ;;  %v3325_v40 = vsel %vm3280_vm0, 0.0, %v3293_v58 }
 0x273   : > { %v9863_v29 = vadd.f32 %v9791_v42, %v2933_v28  ;;  %v9866_v20 = vadd.f32 %v9796_v43, %v3039_v17  ;;  %v3327_v42 = vsel %vm3280_vm0, 0.0, %v3295_v53  ;;  %v3326_v43 = vsel %vm3280_vm0, 0.0, %v3294_v63 }
 0x277   : > { %v2937_v27 = vpop.f32.mrb[12].mxu0  ;;  %v3043_v41 = vpop.f32.mrb[12].mxu1 }
 0x278   : > { %v9880_v33 = vadd.f32 %v3325_v40, %v2937_v27  ;;  %v9882_v45 = vadd.f32 %v3327_v42, %v3043_v41  ;;  %v2939_v58 = vpop.f32.mrb[13].mxu0  ;;  %v3045_v34 = vpop.f32.mrb[13].mxu1 }
 0x279   : > { %v9884_v38 = vadd.f32 %v3326_v43, %v2939_v58  ;;  %v9886_v53 = vadd.f32 %v3328_v32, %v3045_v34  ;;  %v2941_v49 = vpop.f32.mrb[14].mxu0  ;;  %v3047_v63 = vpop.f32.mrb[14].mxu1 }
 0x27a   : > { %v9889_v56 = vadd.f32 %v9813_v2, %v2941_v49  ;;  %v9892_v46 = vadd.f32 %v9818_v3, %v3047_v63  ;;  %v2943_v47 = vpop.f32.mrb[15].mxu0  ;;  %v3049_v51 = vpop.f32.mrb[15].mxu1 }
 0x27b   : > { %v9895_v52 = vadd.f32 %v9823_v5, %v2943_v47  ;;  %v9898_v55 = vadd.f32 %v9828_v6, %v3049_v51 }
 0x2ef   : > { %v3139_v2 = vpop.f32.mrb[16].mxu0  ;;  %v3245_v60 = vpop.f32.mrb[16].mxu1 }
 0x2f0   : > { %v3352_v3 = vrot.slane %v3245_v60, 1  ;;  %v3141_v61 = vpop.f32.mrb[17].mxu0  ;;  %v3247_v62 = vpop.f32.mrb[17].mxu1  ;;  %v3346_v9 = vrot.slane %v3139_v2, 1 }
 0x2f1   : > { %v3143_v0 = vpop.f32.mrb[18].mxu0  ;;  %v3249_v1 = vpop.f32.mrb[18].mxu1  ;;  %v3349_v23 = vrot.slane %v3141_v61, 1  ;;  %v3355_v31 = vrot.slane %v3247_v62, 1  ;;  %v8688_v62 = vld [vmem:[#allocation7 + $0x600] ss:$48 sps:$4 sm:$0xff]  }
 0x2f2   : > { %v3347_v5 = vrot.slane %v3143_v0, 1  ;;  %v3353_v4 = vrot.slane %v3249_v1, 1  ;;  %v3145_v30 = vpop.f32.mrb[19].mxu0  ;;  %v3251_v6 = vpop.f32.mrb[19].mxu1 }
 0x2f3   : > { %v3350_v7 = vrot.slane %v3145_v30, 1  ;;  %v3356_v8 = vrot.slane %v3251_v6, 1 }
 0x2f4   : > { %v3348_v10 = vsel %vm3345_vm1, %v3346_v9, %v3347_v5  ;;  %v3386_v11 = vsel %vm3345_vm1, %v3347_v5, 0.0  ;;  %v3354_v14 = vsel %vm3345_vm1, %v3352_v3, %v3353_v4  ;;  %v3388_v50 = vsel %vm3345_vm1, %v3353_v4, 0.0  ;;  %v8691_v4 = vld [vmem:[#allocation7 + $0x608] ss:$48 sps:$4 sm:$0xff]  }
 0x2f5   : > { %v3410_v22 = vadd.f32 %v9842_v12, %v3348_v10  ;;  %v3414_v13 = vadd.f32 %v9857_v19, %v3386_v11  ;;  %v3412_v18 = vadd.f32 %v9844_v35, %v3354_v14  ;;  %v3416_v37 = vadd.f32 %v9860_v16, %v3388_v50 }
 0x2f6   : > { %v3351_v28 = vsel %vm3345_vm1, %v3349_v23, %v3350_v7  ;;  %v3387_v17 = vsel %vm3345_vm1, %v3350_v7, 0.0  ;;  %v3357_v21 = vsel %vm3345_vm1, %v3355_v31, %v3356_v8  ;;  %v3389_v24 = vsel %vm3345_vm1, %v3356_v8, 0.0  ;;  %v8696_v7 = vld [vmem:[#allocation7 + $0x664] ss:$48 sps:$4 sm:$0xff]   ;;  %v8699_v8 = vld [vmem:[#allocation7 + $0x66c] ss:$48 sps:$4 sm:$0xff]  }
 0x2f7   : > { %v3426_v25 = vmax.f32 %v3410_v22, 0.0  ;;  %v3430_v26 = vmax.f32 %v3414_v13, 0.0  ;;  %v3428_v27 = vmax.f32 %v3412_v18, 0.0  ;;  %v3432_v40 = vmax.f32 %v3416_v37, 0.0  ;;  %v3149_v41 = vpop.f32.mrb[20].mxu0  ;;  %v3255_v12 = vpop.f32.mrb[20].mxu1 }
 0x2f8   : > { %v3411_v19 = vadd.f32 %v9852_v15, %v3351_v28  ;;  %v3415_v35 = vadd.f32 %v9863_v29, %v3387_v17  ;;  %v3413_v16 = vadd.f32 %v9854_v44, %v3357_v21  ;;  %v3417_v42 = vadd.f32 %v9866_v20, %v3389_v24  ;;  %v3151_v43 = vpop.f32.mrb[21].mxu0  ;;  %v3257_v32 = vpop.f32.mrb[21].mxu1  ;;  %v8694_v22 = vld [vmem:[#allocation7 + $0x660] ss:$48 sps:$4 sm:$0xff]   ;;  %v8697_v17 = vld [vmem:[#allocation7 + $0x668] ss:$48 sps:$4 sm:$0xff]  }
 0x2f9   : > { %v9916_v58 = vpack.c.bf16 %v3430_v26, %v3426_v25  ;;  %v9918_v34 = vpack.c.bf16 %v3432_v40, %v3428_v27  ;;  %v3358_v36 = vrot.slane %v3149_v41, 1  ;;  %v3364_v48 = vrot.slane %v3255_v12, 1  ;;  %v3153_v49 = vpop.f32.mrb[22].mxu0  ;;  %v3259_v63 = vpop.f32.mrb[22].mxu1  ;;  %v8702_v21 = vld [vmem:[#allocation7 + $0x6c4] ss:$48 sps:$4 sm:$0xff]  }
 0x2fa   : > { %v3427_v39 = vmax.f32 %v3411_v19, 0.0  ;;  %v3431_v54 = vmax.f32 %v3415_v35, 0.0  ;;  %v3429_v47 = vmax.f32 %v3413_v16, 0.0  ;;  %v3433_v15 = vmax.f32 %v3417_v42, 0.0  ;;  %v3155_v51 = vpop.f32.mrb[23].mxu0  ;;  %v3261_v29 = vpop.f32.mrb[23].mxu1 }
 0x2fb   : > { %v3361_v57 = vrot.slane %v3151_v43, 1  ;;  %v3367_v44 = vrot.slane %v3257_v32, 1  ;;  %v3359_v59 = vrot.slane %v3153_v49, 1  ;;  %v3365_v20 = vrot.slane %v3259_v63, 1  ;;  %v8705_v26 = vld [vmem:[#allocation7 + $0x6cc] ss:$48 sps:$4 sm:$0xff]  }
 0x2fc   : > { %v9920_v2 = vpack.c.bf16 %v3431_v54, %v3427_v39  ;;  %v9922_v60 = vpack.c.bf16 %v3433_v15, %v3429_v47  ;;  %v3362_v3 = vrot.slane %v3155_v51, 1  ;;  %v3368_v61 = vrot.slane %v3261_v29, 1  ;;  %v8703_v12 = vld [vmem:[#allocation7 + $0x6c8] ss:$48 sps:$4 sm:$0xff]   ;;  %v8708_v19 = vld [vmem:[#allocation7 + $0x724] ss:$48 sps:$4 sm:$0xff]  }
 0x2fd   : > { %v3360_v0 = vsel %vm3345_vm1, %v3358_v36, %v3359_v59  ;;  %v3390_v1 = vsel %vm3345_vm1, %v3359_v59, 0.0  ;;  %v3366_v9 = vsel %vm3345_vm1, %v3364_v48, %v3365_v20  ;;  %v3392_v5 = vsel %vm3345_vm1, %v3365_v20, 0.0  ;;  %v8711_v35 = vld [vmem:[#allocation7 + $0x72c] ss:$48 sps:$4 sm:$0xff]   ;;  %v8706_v16 = vld [vmem:[#allocation7 + $0x720] ss:$48 sps:$4 sm:$0xff]  }
 0x2fe   : > { %v3418_v30 = vadd.f32 %v9880_v33, %v3360_v0  ;;  %v3422_v6 = vadd.f32 %v9889_v56, %v3390_v1  ;;  %v3420_v23 = vadd.f32 %v9882_v45, %v3366_v9  ;;  %v3424_v31 = vadd.f32 %v9892_v46, %v3392_v5  ;;  %5786 = vmatprep.mubr.bf16.mxu0 %v9920_v2  ;;  %v8709_v42 = vld [vmem:[#allocation7 + $0x728] ss:$48 sps:$4 sm:$0xff]   ;;  %v8714_v43 = vld [vmem:[#allocation7 + $0x784] ss:$48 sps:$4 sm:$0xff]   ;;  %v8717_v32 = vld [vmem:[#allocation7 + $0x78c] ss:$48 sps:$4 sm:$0xff]  }
 0x2ff   : > { %v3363_v10 = vsel %vm3345_vm1, %v3361_v57, %v3362_v3  ;;  %v3391_v11 = vsel %vm3345_vm1, %v3362_v3, 0.0  ;;  %v3369_v14 = vsel %vm3345_vm1, %v3367_v44, %v3368_v61  ;;  %v3393_v50 = vsel %vm3345_vm1, %v3368_v61, 0.0  ;;  %5892 = vmatprep.mubr.bf16.mxu1 %v9920_v2  ;;  %5787 = vmatmul.mubr.bf16.vlgmr.msra.gmra.mrb[24].mxu0 %v9916_v58  ;;  %v8712_v36 = vld [vmem:[#allocation7 + $0x780] ss:$48 sps:$4 sm:$0xff]   ;;  %v8715_v48 = vld [vmem:[#allocation7 + $0x788] ss:$48 sps:$4 sm:$0xff]  }
 0x300   : > { %v3434_v33 = vmax.f32 %v3418_v30, 0.0  ;;  %v3438_v45 = vmax.f32 %v3422_v6, 0.0  ;;  %v3436_v56 = vmax.f32 %v3420_v23, 0.0  ;;  %v3440_v46 = vmax.f32 %v3424_v31, 0.0  ;;  %5808 = vmatpush1.bf16.msra.mxu0 %v8688_v62  ;;  %5893 = vmatmul.mubr.bf16.vlgmr.msra.gmra.mrb[24].mxu1 %v9916_v58  ;;  %v8720_v49 = vld [vmem:[#allocation7 + $0x7e4] ss:$48 sps:$4 sm:$0xff]  }
 0x301   : > { %v3419_v13 = vadd.f32 %v9884_v38, %v3363_v10  ;;  %v3423_v18 = vadd.f32 %v9895_v52, %v3391_v11  ;;  %v3421_v37 = vadd.f32 %v9886_v53, %v3369_v14  ;;  %v3425_v28 = vadd.f32 %v9898_v55, %v3393_v50  ;;  %5914 = vmatpush1.bf16.msra.mxu1 %v8691_v4  ;;  %v8700_v55 = vld [vmem:[#allocation7 + $0x6c0] ss:$48 sps:$4 sm:$0xff]   ;;  %v8723_v63 = vld [vmem:[#allocation7 + $0x7ec] ss:$48 sps:$4 sm:$0xff]   ;;  %v8721_v54 = vld [vmem:[#allocation7 + $0x7e8] ss:$48 sps:$4 sm:$0xff]  }
 0x302   : > { %v9944_v24 = vpack.c.bf16 %v3438_v45, %v3434_v33  ;;  %v9946_v25 = vpack.c.bf16 %v3440_v46, %v3436_v56  ;;  %5809 = vmatprep.subr.bf16.mxu0 %v8696_v7  ;;  %5915 = vmatprep.subr.bf16.mxu1 %v8699_v8  ;;  %v8718_v39 = vld [vmem:[#allocation7 + $0x7e0] ss:$48 sps:$4 sm:$0xff]   ;;  %v8726_v47 = vld [vmem:[#allocation7 + $0x844] ss:$48 sps:$4 sm:$0xff]   ;;  %v8729_v15 = vld [vmem:[#allocation7 + $0x84c] ss:$48 sps:$4 sm:$0xff]  }
 0x303   : > { %v3435_v27 = vmax.f32 %v3419_v13, 0.0  ;;  %v3439_v40 = vmax.f32 %v3423_v18, 0.0  ;;  %v3437_v41 = vmax.f32 %v3421_v37, 0.0  ;;  %v3441_v38 = vmax.f32 %v3425_v28, 0.0  ;;  %v8724_v51 = vld [vmem:[#allocation7 + $0x840] ss:$48 sps:$4 sm:$0xff]  }
 0x304   : > { %5810 = vmatpush1.bf16.msra.mxu0 %v8694_v22  ;;  %v8727_v29 = vld [vmem:[#allocation7 + $0x848] ss:$48 sps:$4 sm:$0xff]   ;;  %v8732_v57 = vld [vmem:[#allocation7 + $0x8a4] ss:$48 sps:$4 sm:$0xff]   ;;  %v8735_v44 = vld [vmem:[#allocation7 + $0x8ac] ss:$48 sps:$4 sm:$0xff]  }
 0x305   : > { %v9948_v52 = vpack.c.bf16 %v3439_v40, %v3435_v27  ;;  %v9950_v53 = vpack.c.bf16 %v3441_v38, %v3437_v41  ;;  %5916 = vmatpush1.bf16.msra.mxu1 %v8697_v17  ;;  %5811 = vmatprep.subr.bf16.mxu0 %v8702_v21  ;;  %v8730_v59 = vld [vmem:[#allocation7 + $0x8a0] ss:$48 sps:$4 sm:$0xff]   ;;  %v8733_v20 = vld [vmem:[#allocation7 + $0x8a8] ss:$48 sps:$4 sm:$0xff]   ;;  %v8738_v3 = vld [vmem:[#allocation7 + $0x904] ss:$48 sps:$4 sm:$0xff]  }
 0x306   : > { %5917 = vmatprep.subr.bf16.mxu1 %v8705_v26  ;;  %v8741_v61 = vld [vmem:[#allocation7 + $0x90c] ss:$48 sps:$4 sm:$0xff]   ;;  %v8736_v62 = vld [vmem:[#allocation7 + $0x900] ss:$48 sps:$4 sm:$0xff]   ;;  %v8739_v0 = vld [vmem:[#allocation7 + $0x908] ss:$48 sps:$4 sm:$0xff]  }
 0x307   : > { %5796 = vmatprep.mubr.bf16.mxu0 %v9948_v52  ;;  %5902 = vmatprep.mubr.bf16.mxu1 %v9948_v52  ;;  %v8744_v1 = vld [vmem:[#allocation7 + $0x964] ss:$48 sps:$4 sm:$0xff]   ;;  %v8747_v9 = vld [vmem:[#allocation7 + $0x96c] ss:$48 sps:$4 sm:$0xff]   ;;  %v8742_v5 = vld [vmem:[#allocation7 + $0x960] ss:$48 sps:$4 sm:$0xff]  }
 0x308   : > { %5797 = vmatmul.mubr.bf16.gmra.mrb[28].mxu0 %v9944_v24  ;;  %5903 = vmatmul.mubr.bf16.gmra.mrb[28].mxu1 %v9944_v24  ;;  %v8745_v4 = vld [vmem:[#allocation7 + $0x968] ss:$48 sps:$4 sm:$0xff]   ;;  %v8750_v30 = vld [vmem:[#allocation7 + $0x9c4] ss:$48 sps:$4 sm:$0xff]   ;;  %v8753_v6 = vld [vmem:[#allocation7 + $0x9cc] ss:$48 sps:$4 sm:$0xff]  }
 0x309   : > { %5812 = vmatpush1.bf16.msra.mxu0 %v8700_v55  ;;  %5918 = vmatpush1.bf16.msra.mxu1 %v8703_v12  ;;  %v8748_v23 = vld [vmem:[#allocation7 + $0x9c0] ss:$48 sps:$4 sm:$0xff]   ;;  %v8751_v31 = vld [vmem:[#allocation7 + $0x9c8] ss:$48 sps:$4 sm:$0xff]   ;;  %v8756_v7 = vld [vmem:[#allocation7 + $0xa24] ss:$48 sps:$4 sm:$0xff]  }
 0x30a   : > { %5839 = vmatprep.mubr.bf16.mxu0 %v9922_v60  ;;  %5945 = vmatprep.mubr.bf16.mxu1 %v9922_v60  ;;  %v8759_v8 = vld [vmem:[#allocation7 + $0xa2c] ss:$48 sps:$4 sm:$0xff]   ;;  %v8754_v10 = vld [vmem:[#allocation7 + $0xa20] ss:$48 sps:$4 sm:$0xff]   ;;  %v8757_v11 = vld [vmem:[#allocation7 + $0xa28] ss:$48 sps:$4 sm:$0xff]  }
 0x30b   : > { %5813 = vmatprep.subr.bf16.mxu0 %v8708_v19  ;;  %5919 = vmatprep.subr.bf16.mxu1 %v8711_v35  ;;  %v8762_v14 = vld [vmem:[#allocation7 + $0xa84] ss:$48 sps:$4 sm:$0xff]   ;;  %v8765_v50 = vld [vmem:[#allocation7 + $0xa8c] ss:$48 sps:$4 sm:$0xff]   ;;  %v8760_v33 = vld [vmem:[#allocation7 + $0xa80] ss:$48 sps:$4 sm:$0xff]  }
 0x30c   : > { %v8763_v45 = vld [vmem:[#allocation7 + $0xa88] ss:$48 sps:$4 sm:$0xff]   ;;  %v8768_v56 = vld [vmem:[#allocation7 + $0xae4] ss:$48 sps:$4 sm:$0xff]   ;;  %v8771_v46 = vld [vmem:[#allocation7 + $0xaec] ss:$48 sps:$4 sm:$0xff]  }
 0x30d   : > { %5814 = vmatpush1.bf16.msra.mxu0 %v8706_v16  ;;  %5920 = vmatpush1.bf16.msra.mxu1 %v8709_v42  ;;  %v8766_v22 = vld [vmem:[#allocation7 + $0xae0] ss:$48 sps:$4 sm:$0xff]   ;;  %v8769_v13 = vld [vmem:[#allocation7 + $0xae8] ss:$48 sps:$4 sm:$0xff]   ;;  %v8774_v18 = vld [vmem:[#allocation7 + $0xb44] ss:$48 sps:$4 sm:$0xff]  }
 0x30e   : > { %5815 = vmatprep.subr.bf16.mxu0 %v8714_v43  ;;  %5921 = vmatprep.subr.bf16.mxu1 %v8717_v32  ;;  %v8777_v37 = vld [vmem:[#allocation7 + $0xb4c] ss:$48 sps:$4 sm:$0xff]   ;;  %v8772_v28 = vld [vmem:[#allocation7 + $0xb40] ss:$48 sps:$4 sm:$0xff]   ;;  %v8775_v17 = vld [vmem:[#allocation7 + $0xb48] ss:$48 sps:$4 sm:$0xff]  }
 0x30f   : > { %v8780_v21 = vld [vmem:[#allocation7 + $0xba4] ss:$48 sps:$4 sm:$0xff]   ;;  %v8783_v26 = vld [vmem:[#allocation7 + $0xbac] ss:$48 sps:$4 sm:$0xff]   ;;  %v8778_v27 = vld [vmem:[#allocation7 + $0xba0] ss:$48 sps:$4 sm:$0xff]  }
 0x310   : > { %v8781_v40 = vld [vmem:[#allocation7 + $0xba8] ss:$48 sps:$4 sm:$0xff]   ;;  %v8786_v41 = vld [vmem:[#allocation7 + $0x14] ss:$48 sps:$4 sm:$0xff]   ;;  %v8789_v38 = vld [vmem:[#allocation7 + $0x1c] ss:$48 sps:$4 sm:$0xff]  }
 0x311   : > { %5816 = vmatpush1.bf16.msra.mxu0 %v8712_v36  ;;  %5922 = vmatpush1.bf16.msra.mxu1 %v8715_v48  ;;  %v8784_v55 = vld [vmem:[#allocation7 + $0x10] ss:$48 sps:$4 sm:$0xff]   ;;  %v8787_v12 = vld [vmem:[#allocation7 + $0x18] ss:$48 sps:$4 sm:$0xff]   ;;  %v8792_v19 = vld [vmem:[#allocation7 + $0x74] ss:$48 sps:$4 sm:$0xff]  }
 0x312   : > { %5817 = vmatprep.subr.bf16.mxu0 %v8720_v49  ;;  %5923 = vmatprep.subr.bf16.mxu1 %v8723_v63  ;;  %v8795_v35 = vld [vmem:[#allocation7 + $0x7c] ss:$48 sps:$4 sm:$0xff]   ;;  %v8790_v16 = vld [vmem:[#allocation7 + $0x70] ss:$48 sps:$4 sm:$0xff]   ;;  %v8793_v42 = vld [vmem:[#allocation7 + $0x78] ss:$48 sps:$4 sm:$0xff]  }
 0x313   : > { %v8798_v43 = vld [vmem:[#allocation7 + $0xd4] ss:$48 sps:$4 sm:$0xff]   ;;  %v8801_v32 = vld [vmem:[#allocation7 + $0xdc] ss:$48 sps:$4 sm:$0xff]   ;;  %v8796_v36 = vld [vmem:[#allocation7 + $0xd0] ss:$48 sps:$4 sm:$0xff]  }
 0x314   : > { %v8799_v48 = vld [vmem:[#allocation7 + $0xd8] ss:$48 sps:$4 sm:$0xff]   ;;  %v8804_v49 = vld [vmem:[#allocation7 + $0x134] ss:$48 sps:$4 sm:$0xff]   ;;  %v8807_v63 = vld [vmem:[#allocation7 + $0x13c] ss:$48 sps:$4 sm:$0xff]  }
 0x315   : > { %5818 = vmatpush1.bf16.msra.mxu0 %v8718_v39  ;;  %5924 = vmatpush1.bf16.msra.mxu1 %v8721_v54  ;;  %v8802_v39 = vld [vmem:[#allocation7 + $0x130] ss:$48 sps:$4 sm:$0xff]   ;;  %v8805_v54 = vld [vmem:[#allocation7 + $0x138] ss:$48 sps:$4 sm:$0xff]  }
 0x316   : > { %5819 = vmatprep.subr.bf16.mxu0 %v8726_v47  ;;  %5925 = vmatprep.subr.bf16.mxu1 %v8729_v15  ;;  %v8810_v47 = vld [vmem:[#allocation7 + $0x194] ss:$48 sps:$4 sm:$0xff]   ;;  %v8813_v15 = vld [vmem:[#allocation7 + $0x19c] ss:$48 sps:$4 sm:$0xff]  }
 0x319   : > { %5820 = vmatpush1.bf16.msra.mxu0 %v8724_v51  ;;  %5926 = vmatpush1.bf16.msra.mxu1 %v8727_v29  ;;  %v8808_v51 = vld [vmem:[#allocation7 + $0x190] ss:$48 sps:$4 sm:$0xff]   ;;  %v8811_v29 = vld [vmem:[#allocation7 + $0x198] ss:$48 sps:$4 sm:$0xff]  }
 0x31a   : > { %5821 = vmatprep.subr.bf16.mxu0 %v8732_v57  ;;  %5927 = vmatprep.subr.bf16.mxu1 %v8735_v44  ;;  %v8816_v57 = vld [vmem:[#allocation7 + $0x1f4] ss:$48 sps:$4 sm:$0xff]   ;;  %v8819_v44 = vld [vmem:[#allocation7 + $0x1fc] ss:$48 sps:$4 sm:$0xff]  }
 0x31d   : > { %5822 = vmatpush1.bf16.msra.mxu0 %v8730_v59  ;;  %5928 = vmatpush1.bf16.msra.mxu1 %v8733_v20  ;;  %v8814_v59 = vld [vmem:[#allocation7 + $0x1f0] ss:$48 sps:$4 sm:$0xff]   ;;  %v8817_v20 = vld [vmem:[#allocation7 + $0x1f8] ss:$48 sps:$4 sm:$0xff]  }
 0x31e   : > { %5823 = vmatprep.subr.bf16.mxu0 %v8738_v3  ;;  %5929 = vmatprep.subr.bf16.mxu1 %v8741_v61  ;;  %v8822_v3 = vld [vmem:[#allocation7 + $0x254] ss:$48 sps:$4 sm:$0xff]   ;;  %v8825_v61 = vld [vmem:[#allocation7 + $0x25c] ss:$48 sps:$4 sm:$0xff]  }
 0x321   : > { %5824 = vmatpush1.bf16.msra.mxu0 %v8736_v62  ;;  %5930 = vmatpush1.bf16.msra.mxu1 %v8739_v0  ;;  %v8820_v62 = vld [vmem:[#allocation7 + $0x250] ss:$48 sps:$4 sm:$0xff]   ;;  %v8823_v0 = vld [vmem:[#allocation7 + $0x258] ss:$48 sps:$4 sm:$0xff]  }
 0x322   : > { %5825 = vmatprep.subr.bf16.mxu0 %v8744_v1  ;;  %5931 = vmatprep.subr.bf16.mxu1 %v8747_v9  ;;  %v8828_v1 = vld [vmem:[#allocation7 + $0x2b4] ss:$48 sps:$4 sm:$0xff]   ;;  %v8831_v9 = vld [vmem:[#allocation7 + $0x2bc] ss:$48 sps:$4 sm:$0xff]  }
 0x325   : > { %5826 = vmatpush1.bf16.msra.mxu0 %v8742_v5  ;;  %5932 = vmatpush1.bf16.msra.mxu1 %v8745_v4  ;;  %v8826_v5 = vld [vmem:[#allocation7 + $0x2b0] ss:$48 sps:$4 sm:$0xff]   ;;  %v8829_v4 = vld [vmem:[#allocation7 + $0x2b8] ss:$48 sps:$4 sm:$0xff]  }
 0x326   : > { %5827 = vmatprep.subr.bf16.mxu0 %v8750_v30  ;;  %5933 = vmatprep.subr.bf16.mxu1 %v8753_v6  ;;  %v8834_v30 = vld [vmem:[#allocation7 + $0x314] ss:$48 sps:$4 sm:$0xff]   ;;  %v8837_v6 = vld [vmem:[#allocation7 + $0x31c] ss:$48 sps:$4 sm:$0xff]  }
 0x329   : > { %5828 = vmatpush1.bf16.msra.mxu0 %v8748_v23  ;;  %5934 = vmatpush1.bf16.msra.mxu1 %v8751_v31  ;;  %v8832_v23 = vld [vmem:[#allocation7 + $0x310] ss:$48 sps:$4 sm:$0xff]   ;;  %v8835_v31 = vld [vmem:[#allocation7 + $0x318] ss:$48 sps:$4 sm:$0xff]  }
 0x32a   : > { %5829 = vmatprep.subr.bf16.mxu0 %v8756_v7  ;;  %5935 = vmatprep.subr.bf16.mxu1 %v8759_v8  ;;  %v8840_v7 = vld [vmem:[#allocation7 + $0x374] ss:$48 sps:$4 sm:$0xff]   ;;  %v8843_v8 = vld [vmem:[#allocation7 + $0x37c] ss:$48 sps:$4 sm:$0xff]  }
 0x32d   : > { %5830 = vmatpush1.bf16.msra.mxu0 %v8754_v10  ;;  %5936 = vmatpush1.bf16.msra.mxu1 %v8757_v11  ;;  %v8838_v10 = vld [vmem:[#allocation7 + $0x370] ss:$48 sps:$4 sm:$0xff]   ;;  %v8841_v11 = vld [vmem:[#allocation7 + $0x378] ss:$48 sps:$4 sm:$0xff]  }
 0x32e   : > { %5831 = vmatprep.subr.bf16.mxu0 %v8762_v14  ;;  %5937 = vmatprep.subr.bf16.mxu1 %v8765_v50  ;;  %v8846_v14 = vld [vmem:[#allocation7 + $0x3d4] ss:$48 sps:$4 sm:$0xff]   ;;  %v8849_v50 = vld [vmem:[#allocation7 + $0x3dc] ss:$48 sps:$4 sm:$0xff]  }
 0x331   : > { %5832 = vmatpush1.bf16.msra.mxu0 %v8760_v33  ;;  %5938 = vmatpush1.bf16.msra.mxu1 %v8763_v45  ;;  %v8844_v33 = vld [vmem:[#allocation7 + $0x3d0] ss:$48 sps:$4 sm:$0xff]   ;;  %v8847_v45 = vld [vmem:[#allocation7 + $0x3d8] ss:$48 sps:$4 sm:$0xff]  }
 0x332   : > { %5833 = vmatprep.subr.bf16.mxu0 %v8768_v56  ;;  %5939 = vmatprep.subr.bf16.mxu1 %v8771_v46  ;;  %v8852_v56 = vld [vmem:[#allocation7 + $0x434] ss:$48 sps:$4 sm:$0xff]   ;;  %v8855_v46 = vld [vmem:[#allocation7 + $0x43c] ss:$48 sps:$4 sm:$0xff]  }
 0x335   : > { %5834 = vmatpush1.bf16.msra.mxu0 %v8766_v22  ;;  %5940 = vmatpush1.bf16.msra.mxu1 %v8769_v13  ;;  %v8850_v22 = vld [vmem:[#allocation7 + $0x430] ss:$48 sps:$4 sm:$0xff]   ;;  %v8853_v13 = vld [vmem:[#allocation7 + $0x438] ss:$48 sps:$4 sm:$0xff]  }
 0x336   : > { %5835 = vmatprep.subr.bf16.mxu0 %v8774_v18  ;;  %5941 = vmatprep.subr.bf16.mxu1 %v8777_v37  ;;  %v8858_v18 = vld [vmem:[#allocation7 + $0x494] ss:$48 sps:$4 sm:$0xff]   ;;  %v8861_v37 = vld [vmem:[#allocation7 + $0x49c] ss:$48 sps:$4 sm:$0xff]  }
 0x339   : > { %5836 = vmatpush1.bf16.msra.mxu0 %v8772_v28  ;;  %5942 = vmatpush1.bf16.msra.mxu1 %v8775_v17  ;;  %v8856_v28 = vld [vmem:[#allocation7 + $0x490] ss:$48 sps:$4 sm:$0xff]   ;;  %v8859_v17 = vld [vmem:[#allocation7 + $0x498] ss:$48 sps:$4 sm:$0xff]  }
 0x33a   : > { %5837 = vmatprep.subr.bf16.mxu0 %v8780_v21  ;;  %5943 = vmatprep.subr.bf16.mxu1 %v8783_v26  ;;  %v8864_v21 = vld [vmem:[#allocation7 + $0x4f4] ss:$48 sps:$4 sm:$0xff]   ;;  %v8867_v26 = vld [vmem:[#allocation7 + $0x4fc] ss:$48 sps:$4 sm:$0xff]  }
 0x33d   : > { %5838 = vmatpush1.bf16.msra.mxu0 %v8778_v27  ;;  %5944 = vmatpush1.bf16.msra.mxu1 %v8781_v40  ;;  %v8862_v27 = vld [vmem:[#allocation7 + $0x4f0] ss:$48 sps:$4 sm:$0xff]   ;;  %v8865_v40 = vld [vmem:[#allocation7 + $0x4f8] ss:$48 sps:$4 sm:$0xff]  }
 0x33e   : > { %5966 = vmatprep.subr.bf16.mxu0 %v8786_v41  ;;  %6072 = vmatprep.subr.bf16.mxu1 %v8789_v38  ;;  %v8870_v41 = vld [vmem:[#allocation7 + $0x554] ss:$48 sps:$4 sm:$0xff]   ;;  %v8873_v38 = vld [vmem:[#allocation7 + $0x55c] ss:$48 sps:$4 sm:$0xff]  }
 0x340   : > { %5840 = vmatmul.mubr.bf16.vlgmr.msra.gmra.mrb[24].mxu0 %v9918_v34  ;;  %5946 = vmatmul.mubr.bf16.vlgmr.msra.gmra.mrb[24].mxu1 %v9918_v34 }
 0x341   : > { %5849 = vmatprep.mubr.bf16.mxu0 %v9950_v53  ;;  %5955 = vmatprep.mubr.bf16.mxu1 %v9950_v53 }
 0x342   : > { %5967 = vmatpush1.bf16.msra.mxu0 %v8784_v55  ;;  %6073 = vmatpush1.bf16.msra.mxu1 %v8787_v12  ;;  %v8868_v55 = vld [vmem:[#allocation7 + $0x550] ss:$48 sps:$4 sm:$0xff]   ;;  %v8871_v12 = vld [vmem:[#allocation7 + $0x558] ss:$48 sps:$4 sm:$0xff]  }
 0x343   : > { %5968 = vmatprep.subr.bf16.mxu0 %v8792_v19  ;;  %6074 = vmatprep.subr.bf16.mxu1 %v8795_v35  ;;  %v8876_v19 = vld [vmem:[#allocation7 + $0x5b4] ss:$48 sps:$4 sm:$0xff]   ;;  %v8879_v35 = vld [vmem:[#allocation7 + $0x5bc] ss:$48 sps:$4 sm:$0xff]  }
 0x346   : > { %5969 = vmatpush1.bf16.msra.mxu0 %v8790_v16  ;;  %6075 = vmatpush1.bf16.msra.mxu1 %v8793_v42  ;;  %v8874_v16 = vld [vmem:[#allocation7 + $0x5b0] ss:$48 sps:$4 sm:$0xff]   ;;  %v8877_v42 = vld [vmem:[#allocation7 + $0x5b8] ss:$48 sps:$4 sm:$0xff]  }
 0x347   : > { %5970 = vmatprep.subr.bf16.mxu0 %v8798_v43  ;;  %6076 = vmatprep.subr.bf16.mxu1 %v8801_v32  ;;  %v8882_v43 = vld [vmem:[#allocation7 + $0x614] ss:$48 sps:$4 sm:$0xff]   ;;  %v8885_v32 = vld [vmem:[#allocation7 + $0x61c] ss:$48 sps:$4 sm:$0xff]  }
 0x348   : > { %5850 = vmatmul.mubr.bf16.gmra.mrb[28].mxu0 %v9946_v25  ;;  %5956 = vmatmul.mubr.bf16.gmra.mrb[28].mxu1 %v9946_v25 }
 0x349   : > { %5998 = vmatprep.mubr.bf16.mxu0 %v9920_v2  ;;  %6104 = vmatprep.mubr.bf16.mxu1 %v9920_v2 }
 0x34a   : > { %5971 = vmatpush1.bf16.msra.mxu0 %v8796_v36  ;;  %6077 = vmatpush1.bf16.msra.mxu1 %v8799_v48  ;;  %v8880_v36 = vld [vmem:[#allocation7 + $0x610] ss:$48 sps:$4 sm:$0xff]   ;;  %v8883_v48 = vld [vmem:[#allocation7 + $0x618] ss:$48 sps:$4 sm:$0xff]  }
 0x34b   : > { %5972 = vmatprep.subr.bf16.mxu0 %v8804_v49  ;;  %6078 = vmatprep.subr.bf16.mxu1 %v8807_v63  ;;  %v8888_v49 = vld [vmem:[#allocation7 + $0x674] ss:$48 sps:$4 sm:$0xff]   ;;  %v8891_v63 = vld [vmem:[#allocation7 + $0x67c] ss:$48 sps:$4 sm:$0xff]  }
 0x34e   : > { %5973 = vmatpush1.bf16.msra.mxu0 %v8802_v39  ;;  %6079 = vmatpush1.bf16.msra.mxu1 %v8805_v54  ;;  %v8886_v39 = vld [vmem:[#allocation7 + $0x670] ss:$48 sps:$4 sm:$0xff]   ;;  %v8889_v54 = vld [vmem:[#allocation7 + $0x678] ss:$48 sps:$4 sm:$0xff]  }
 0x34f   : > { %5974 = vmatprep.subr.bf16.mxu0 %v8810_v47  ;;  %6080 = vmatprep.subr.bf16.mxu1 %v8813_v15  ;;  %v8894_v47 = vld [vmem:[#allocation7 + $0x6d4] ss:$48 sps:$4 sm:$0xff]   ;;  %v8897_v15 = vld [vmem:[#allocation7 + $0x6dc] ss:$48 sps:$4 sm:$0xff]  }
 0x352   : > { %5975 = vmatpush1.bf16.msra.mxu0 %v8808_v51  ;;  %6081 = vmatpush1.bf16.msra.mxu1 %v8811_v29  ;;  %v8892_v51 = vld [vmem:[#allocation7 + $0x6d0] ss:$48 sps:$4 sm:$0xff]   ;;  %v8895_v29 = vld [vmem:[#allocation7 + $0x6d8] ss:$48 sps:$4 sm:$0xff]  }
 0x353   : > { %5976 = vmatprep.subr.bf16.mxu0 %v8816_v57  ;;  %6082 = vmatprep.subr.bf16.mxu1 %v8819_v44  ;;  %v8900_v57 = vld [vmem:[#allocation7 + $0x734] ss:$48 sps:$4 sm:$0xff]   ;;  %v8903_v44 = vld [vmem:[#allocation7 + $0x73c] ss:$48 sps:$4 sm:$0xff]  }
 0x356   : > { %5977 = vmatpush1.bf16.msra.mxu0 %v8814_v59  ;;  %6083 = vmatpush1.bf16.msra.mxu1 %v8817_v20  ;;  %v8898_v59 = vld [vmem:[#allocation7 + $0x730] ss:$48 sps:$4 sm:$0xff]   ;;  %v8901_v20 = vld [vmem:[#allocation7 + $0x738] ss:$48 sps:$4 sm:$0xff]  }
 0x357   : > { %5978 = vmatprep.subr.bf16.mxu0 %v8822_v3  ;;  %6084 = vmatprep.subr.bf16.mxu1 %v8825_v61  ;;  %v8906_v3 = vld [vmem:[#allocation7 + $0x794] ss:$48 sps:$4 sm:$0xff]   ;;  %v8909_v61 = vld [vmem:[#allocation7 + $0x79c] ss:$48 sps:$4 sm:$0xff]  }
 0x35a   : > { %5979 = vmatpush1.bf16.msra.mxu0 %v8820_v62  ;;  %6085 = vmatpush1.bf16.msra.mxu1 %v8823_v0  ;;  %v8904_v62 = vld [vmem:[#allocation7 + $0x790] ss:$48 sps:$4 sm:$0xff]   ;;  %v8907_v0 = vld [vmem:[#allocation7 + $0x798] ss:$48 sps:$4 sm:$0xff]  }
 0x35b   : > { %5980 = vmatprep.subr.bf16.mxu0 %v8828_v1  ;;  %6086 = vmatprep.subr.bf16.mxu1 %v8831_v9  ;;  %v8912_v1 = vld [vmem:[#allocation7 + $0x7f4] ss:$48 sps:$4 sm:$0xff]   ;;  %v8915_v9 = vld [vmem:[#allocation7 + $0x7fc] ss:$48 sps:$4 sm:$0xff]  }
 0x35e   : > { %5981 = vmatpush1.bf16.msra.mxu0 %v8826_v5  ;;  %6087 = vmatpush1.bf16.msra.mxu1 %v8829_v4  ;;  %v8910_v5 = vld [vmem:[#allocation7 + $0x7f0] ss:$48 sps:$4 sm:$0xff]   ;;  %v8913_v4 = vld [vmem:[#allocation7 + $0x7f8] ss:$48 sps:$4 sm:$0xff]  }
 0x35f   : > { %5982 = vmatprep.subr.bf16.mxu0 %v8834_v30  ;;  %6088 = vmatprep.subr.bf16.mxu1 %v8837_v6  ;;  %v8918_v30 = vld [vmem:[#allocation7 + $0x854] ss:$48 sps:$4 sm:$0xff]   ;;  %v8921_v6 = vld [vmem:[#allocation7 + $0x85c] ss:$48 sps:$4 sm:$0xff]  }
 0x362   : > { %5983 = vmatpush1.bf16.msra.mxu0 %v8832_v23  ;;  %6089 = vmatpush1.bf16.msra.mxu1 %v8835_v31  ;;  %v8916_v23 = vld [vmem:[#allocation7 + $0x850] ss:$48 sps:$4 sm:$0xff]   ;;  %v8919_v31 = vld [vmem:[#allocation7 + $0x858] ss:$48 sps:$4 sm:$0xff]  }
 0x363   : > { %5984 = vmatprep.subr.bf16.mxu0 %v8840_v7  ;;  %6090 = vmatprep.subr.bf16.mxu1 %v8843_v8  ;;  %v8924_v7 = vld [vmem:[#allocation7 + $0x8b4] ss:$48 sps:$4 sm:$0xff]   ;;  %v8927_v8 = vld [vmem:[#allocation7 + $0x8bc] ss:$48 sps:$4 sm:$0xff]  }
 0x366   : > { %5985 = vmatpush1.bf16.msra.mxu0 %v8838_v10  ;;  %6091 = vmatpush1.bf16.msra.mxu1 %v8841_v11  ;;  %v8922_v10 = vld [vmem:[#allocation7 + $0x8b0] ss:$48 sps:$4 sm:$0xff]   ;;  %v8925_v11 = vld [vmem:[#allocation7 + $0x8b8] ss:$48 sps:$4 sm:$0xff]  }
 0x367   : > { %5986 = vmatprep.subr.bf16.mxu0 %v8846_v14  ;;  %6092 = vmatprep.subr.bf16.mxu1 %v8849_v50  ;;  %v8930_v14 = vld [vmem:[#allocation7 + $0x914] ss:$48 sps:$4 sm:$0xff]   ;;  %v8933_v50 = vld [vmem:[#allocation7 + $0x91c] ss:$48 sps:$4 sm:$0xff]  }
 0x36a   : > { %5987 = vmatpush1.bf16.msra.mxu0 %v8844_v33  ;;  %6093 = vmatpush1.bf16.msra.mxu1 %v8847_v45  ;;  %v8928_v33 = vld [vmem:[#allocation7 + $0x910] ss:$48 sps:$4 sm:$0xff]   ;;  %v8931_v45 = vld [vmem:[#allocation7 + $0x918] ss:$48 sps:$4 sm:$0xff]  }
 0x36b   : > { %5988 = vmatprep.subr.bf16.mxu0 %v8852_v56  ;;  %6094 = vmatprep.subr.bf16.mxu1 %v8855_v46  ;;  %v8936_v56 = vld [vmem:[#allocation7 + $0x974] ss:$48 sps:$4 sm:$0xff]   ;;  %v8939_v46 = vld [vmem:[#allocation7 + $0x97c] ss:$48 sps:$4 sm:$0xff]  }
 0x36e   : > { %5989 = vmatpush1.bf16.msra.mxu0 %v8850_v22  ;;  %6095 = vmatpush1.bf16.msra.mxu1 %v8853_v13  ;;  %v8934_v22 = vld [vmem:[#allocation7 + $0x970] ss:$48 sps:$4 sm:$0xff]   ;;  %v8937_v13 = vld [vmem:[#allocation7 + $0x978] ss:$48 sps:$4 sm:$0xff]  }
 0x36f   : > { %5990 = vmatprep.subr.bf16.mxu0 %v8858_v18  ;;  %6096 = vmatprep.subr.bf16.mxu1 %v8861_v37  ;;  %v8942_v18 = vld [vmem:[#allocation7 + $0x9d4] ss:$48 sps:$4 sm:$0xff]   ;;  %v8945_v37 = vld [vmem:[#allocation7 + $0x9dc] ss:$48 sps:$4 sm:$0xff]  }
 0x372   : > { %5991 = vmatpush1.bf16.msra.mxu0 %v8856_v28  ;;  %6097 = vmatpush1.bf16.msra.mxu1 %v8859_v17  ;;  %v8940_v28 = vld [vmem:[#allocation7 + $0x9d0] ss:$48 sps:$4 sm:$0xff]   ;;  %v8943_v17 = vld [vmem:[#allocation7 + $0x9d8] ss:$48 sps:$4 sm:$0xff]  }
 0x373   : > { %5992 = vmatprep.subr.bf16.mxu0 %v8864_v21  ;;  %6098 = vmatprep.subr.bf16.mxu1 %v8867_v26  ;;  %v8948_v21 = vld [vmem:[#allocation7 + $0xa34] ss:$48 sps:$4 sm:$0xff]   ;;  %v8951_v26 = vld [vmem:[#allocation7 + $0xa3c] ss:$48 sps:$4 sm:$0xff]  }
 0x376   : > { %5993 = vmatpush1.bf16.msra.mxu0 %v8862_v27  ;;  %6099 = vmatpush1.bf16.msra.mxu1 %v8865_v40  ;;  %v8946_v27 = vld [vmem:[#allocation7 + $0xa30] ss:$48 sps:$4 sm:$0xff]   ;;  %v8949_v40 = vld [vmem:[#allocation7 + $0xa38] ss:$48 sps:$4 sm:$0xff]  }
 0x377   : > { %5994 = vmatprep.subr.bf16.mxu0 %v8870_v41  ;;  %6100 = vmatprep.subr.bf16.mxu1 %v8873_v38  ;;  %v8954_v41 = vld [vmem:[#allocation7 + $0xa94] ss:$48 sps:$4 sm:$0xff]   ;;  %v8957_v38 = vld [vmem:[#allocation7 + $0xa9c] ss:$48 sps:$4 sm:$0xff]  }
 0x37a   : > { %5995 = vmatpush1.bf16.msra.mxu0 %v8868_v55  ;;  %6101 = vmatpush1.bf16.msra.mxu1 %v8871_v12  ;;  %v8952_v55 = vld [vmem:[#allocation7 + $0xa90] ss:$48 sps:$4 sm:$0xff]   ;;  %v8955_v12 = vld [vmem:[#allocation7 + $0xa98] ss:$48 sps:$4 sm:$0xff]  }
 0x37b   : > { %5996 = vmatprep.subr.bf16.mxu0 %v8876_v19  ;;  %6102 = vmatprep.subr.bf16.mxu1 %v8879_v35  ;;  %v8960_v19 = vld [vmem:[#allocation7 + $0xaf4] ss:$48 sps:$4 sm:$0xff]   ;;  %v8963_v35 = vld [vmem:[#allocation7 + $0xafc] ss:$48 sps:$4 sm:$0xff]  }
 0x37e   : > { %5997 = vmatpush1.bf16.msra.mxu0 %v8874_v16  ;;  %6103 = vmatpush1.bf16.msra.mxu1 %v8877_v42  ;;  %v8958_v16 = vld [vmem:[#allocation7 + $0xaf0] ss:$48 sps:$4 sm:$0xff]   ;;  %v8961_v42 = vld [vmem:[#allocation7 + $0xaf8] ss:$48 sps:$4 sm:$0xff]  }
 0x37f   : > { %6019 = vmatprep.subr.bf16.mxu0 %v8882_v43  ;;  %6125 = vmatprep.subr.bf16.mxu1 %v8885_v32  ;;  %v8966_v43 = vld [vmem:[#allocation7 + $0xb54] ss:$48 sps:$4 sm:$0xff]   ;;  %v8969_v32 = vld [vmem:[#allocation7 + $0xb5c] ss:$48 sps:$4 sm:$0xff]  }
 0x381   : > { %5999 = vmatmul.mubr.bf16.vlgmr.msra.gmra.mrb[32].mxu0 %v9916_v58  ;;  %6105 = vmatmul.mubr.bf16.vlgmr.msra.gmra.mrb[32].mxu1 %v9916_v58 }
 0x382   : > { %6008 = vmatprep.mubr.bf16.mxu0 %v9948_v52  ;;  %6020 = vmatpush1.bf16.msra.mxu0 %v8880_v36  ;;  %v8964_v36 = vld [vmem:[#allocation7 + $0xb50] ss:$48 sps:$4 sm:$0xff]  }
 0x383   : > { %6114 = vmatprep.mubr.bf16.mxu1 %v9948_v52  ;;  %6126 = vmatpush1.bf16.msra.mxu1 %v8883_v48  ;;  %v8967_v48 = vld [vmem:[#allocation7 + $0xb58] ss:$48 sps:$4 sm:$0xff]  }
 0x384   : > { %6021 = vmatprep.subr.bf16.mxu0 %v8888_v49  ;;  %6127 = vmatprep.subr.bf16.mxu1 %v8891_v63  ;;  %v8972_v49 = vld [vmem:[#allocation7 + $0xbb4] ss:$48 sps:$4 sm:$0xff]   ;;  %v8975_v63 = vld [vmem:[#allocation7 + $0xbbc] ss:$48 sps:$4 sm:$0xff]  }
 0x386   : > { %6022 = vmatpush1.bf16.msra.mxu0 %v8886_v39  ;;  %v8970_v39 = vld [vmem:[#allocation7 + $0xbb0] ss:$48 sps:$4 sm:$0xff]  }
 0x387   : > { %6128 = vmatpush1.bf16.msra.mxu1 %v8889_v54  ;;  %6023 = vmatprep.subr.bf16.mxu0 %v8894_v47  ;;  %v8973_v54 = vld [vmem:[#allocation7 + $0xbb8] ss:$48 sps:$4 sm:$0xff]   ;;  %v8978_v47 = vld [vmem:[#allocation7 + $0x24] ss:$48 sps:$4 sm:$0xff]  }
 0x388   : > { %6129 = vmatprep.subr.bf16.mxu1 %v8897_v15  ;;  %v8981_v15 = vld [vmem:[#allocation7 + $0x2c] ss:$48 sps:$4 sm:$0xff]  }
 0x389   : > { %6009 = vmatmul.mubr.bf16.gmra.mrb[36].mxu0 %v9944_v24  ;;  %6115 = vmatmul.mubr.bf16.gmra.mrb[36].mxu1 %v9944_v24 }
 0x38a   : > { %6024 = vmatpush1.bf16.msra.mxu0 %v8892_v51  ;;  %6051 = vmatprep.mubr.bf16.mxu0 %v9922_v60  ;;  %v8976_v51 = vld [vmem:[#allocation7 + $0x20] ss:$48 sps:$4 sm:$0xff]  }
 0x38b   : > { %6130 = vmatpush1.bf16.msra.mxu1 %v8895_v29  ;;  %6157 = vmatprep.mubr.bf16.mxu1 %v9922_v60  ;;  %v8979_v29 = vld [vmem:[#allocation7 + $0x28] ss:$48 sps:$4 sm:$0xff]  }
 0x38c   : > { %6025 = vmatprep.subr.bf16.mxu0 %v8900_v57  ;;  %6131 = vmatprep.subr.bf16.mxu1 %v8903_v44  ;;  %v8984_v57 = vld [vmem:[#allocation7 + $0x84] ss:$48 sps:$4 sm:$0xff]   ;;  %v8987_v44 = vld [vmem:[#allocation7 + $0x8c] ss:$48 sps:$4 sm:$0xff]  }
 0x38e   : > { %6026 = vmatpush1.bf16.msra.mxu0 %v8898_v59  ;;  %v8982_v59 = vld [vmem:[#allocation7 + $0x80] ss:$48 sps:$4 sm:$0xff]  }
 0x38f   : > { %6132 = vmatpush1.bf16.msra.mxu1 %v8901_v20  ;;  %6027 = vmatprep.subr.bf16.mxu0 %v8906_v3  ;;  %v8985_v20 = vld [vmem:[#allocation7 + $0x88] ss:$48 sps:$4 sm:$0xff]   ;;  %v8990_v3 = vld [vmem:[#allocation7 + $0xe4] ss:$48 sps:$4 sm:$0xff]  }
 0x390   : > { %6133 = vmatprep.subr.bf16.mxu1 %v8909_v61  ;;  %v8993_v61 = vld [vmem:[#allocation7 + $0xec] ss:$48 sps:$4 sm:$0xff]  }
 0x392   : > { %6028 = vmatpush1.bf16.msra.mxu0 %v8904_v62  ;;  %v8988_v62 = vld [vmem:[#allocation7 + $0xe0] ss:$48 sps:$4 sm:$0xff]  }
 0x393   : > { %6134 = vmatpush1.bf16.msra.mxu1 %v8907_v0  ;;  %6029 = vmatprep.subr.bf16.mxu0 %v8912_v1  ;;  %v8991_v0 = vld [vmem:[#allocation7 + $0xe8] ss:$48 sps:$4 sm:$0xff]   ;;  %v8996_v1 = vld [vmem:[#allocation7 + $0x144] ss:$48 sps:$4 sm:$0xff]  }
 0x394   : > { %6135 = vmatprep.subr.bf16.mxu1 %v8915_v9  ;;  %v8999_v9 = vld [vmem:[#allocation7 + $0x14c] ss:$48 sps:$4 sm:$0xff]  }
 0x396   : > { %6030 = vmatpush1.bf16.msra.mxu0 %v8910_v5  ;;  %v8994_v5 = vld [vmem:[#allocation7 + $0x140] ss:$48 sps:$4 sm:$0xff]  }
 0x397   : > { %6136 = vmatpush1.bf16.msra.mxu1 %v8913_v4  ;;  %6031 = vmatprep.subr.bf16.mxu0 %v8918_v30  ;;  %v8997_v4 = vld [vmem:[#allocation7 + $0x148] ss:$48 sps:$4 sm:$0xff]   ;;  %v9002_v30 = vld [vmem:[#allocation7 + $0x1a4] ss:$48 sps:$4 sm:$0xff]  }
 0x398   : > { %6137 = vmatprep.subr.bf16.mxu1 %v8921_v6  ;;  %v9005_v6 = vld [vmem:[#allocation7 + $0x1ac] ss:$48 sps:$4 sm:$0xff]  }
 0x39a   : > { %6032 = vmatpush1.bf16.msra.mxu0 %v8916_v23  ;;  %v9000_v23 = vld [vmem:[#allocation7 + $0x1a0] ss:$48 sps:$4 sm:$0xff]  }
 0x39b   : > { %6138 = vmatpush1.bf16.msra.mxu1 %v8919_v31  ;;  %6033 = vmatprep.subr.bf16.mxu0 %v8924_v7  ;;  %v9003_v31 = vld [vmem:[#allocation7 + $0x1a8] ss:$48 sps:$4 sm:$0xff]   ;;  %v9008_v7 = vld [vmem:[#allocation7 + $0x204] ss:$48 sps:$4 sm:$0xff]  }
 0x39c   : > { %6139 = vmatprep.subr.bf16.mxu1 %v8927_v8  ;;  %v9011_v8 = vld [vmem:[#allocation7 + $0x20c] ss:$48 sps:$4 sm:$0xff]  }
 0x39e   : > { %6034 = vmatpush1.bf16.msra.mxu0 %v8922_v10  ;;  %v9006_v10 = vld [vmem:[#allocation7 + $0x200] ss:$48 sps:$4 sm:$0xff]  }
 0x39f   : > { %6140 = vmatpush1.bf16.msra.mxu1 %v8925_v11  ;;  %6035 = vmatprep.subr.bf16.mxu0 %v8930_v14  ;;  %v9014_v11 = vld [vmem:[#allocation7 + $0x264] ss:$48 sps:$4 sm:$0xff]   ;;  %v9017_v14 = vld [vmem:[#allocation7 + $0x26c] ss:$48 sps:$4 sm:$0xff]  }
 0x3a0   : > { %6141 = vmatprep.subr.bf16.mxu1 %v8933_v50  ;;  %v9012_v50 = vld [vmem:[#allocation7 + $0x260] ss:$48 sps:$4 sm:$0xff]  }
 0x3a2   : > { %6036 = vmatpush1.bf16.msra.mxu0 %v8928_v33  ;;  %v9015_v33 = vld [vmem:[#allocation7 + $0x268] ss:$48 sps:$4 sm:$0xff]  }
 0x3a3   : > { %6142 = vmatpush1.bf16.msra.mxu1 %v8931_v45  ;;  %6037 = vmatprep.subr.bf16.mxu0 %v8936_v56  ;;  %v9020_v45 = vld [vmem:[#allocation7 + $0x2c4] ss:$48 sps:$4 sm:$0xff]   ;;  %v9023_v56 = vld [vmem:[#allocation7 + $0x2cc] ss:$48 sps:$4 sm:$0xff]  }
 0x3a4   : > { %6143 = vmatprep.subr.bf16.mxu1 %v8939_v46  ;;  %v9018_v46 = vld [vmem:[#allocation7 + $0x2c0] ss:$48 sps:$4 sm:$0xff]  }
 0x3a6   : > { %6038 = vmatpush1.bf16.msra.mxu0 %v8934_v22  ;;  %v9021_v22 = vld [vmem:[#allocation7 + $0x2c8] ss:$48 sps:$4 sm:$0xff]  }
 0x3a7   : > { %6144 = vmatpush1.bf16.msra.mxu1 %v8937_v13  ;;  %6039 = vmatprep.subr.bf16.mxu0 %v8942_v18  ;;  %v9026_v13 = vld [vmem:[#allocation7 + $0x324] ss:$48 sps:$4 sm:$0xff]   ;;  %v9029_v18 = vld [vmem:[#allocation7 + $0x32c] ss:$48 sps:$4 sm:$0xff]  }
 0x3a8   : > { %6145 = vmatprep.subr.bf16.mxu1 %v8945_v37  ;;  %v9024_v37 = vld [vmem:[#allocation7 + $0x320] ss:$48 sps:$4 sm:$0xff]  }
 0x3aa   : > { %6040 = vmatpush1.bf16.msra.mxu0 %v8940_v28  ;;  %v9027_v28 = vld [vmem:[#allocation7 + $0x328] ss:$48 sps:$4 sm:$0xff]  }
 0x3ab   : > { %6146 = vmatpush1.bf16.msra.mxu1 %v8943_v17  ;;  %6041 = vmatprep.subr.bf16.mxu0 %v8948_v21  ;;  %v9032_v17 = vld [vmem:[#allocation7 + $0x384] ss:$48 sps:$4 sm:$0xff]   ;;  %v9035_v21 = vld [vmem:[#allocation7 + $0x38c] ss:$48 sps:$4 sm:$0xff]  }
 0x3ac   : > { %6147 = vmatprep.subr.bf16.mxu1 %v8951_v26  ;;  %v9030_v26 = vld [vmem:[#allocation7 + $0x380] ss:$48 sps:$4 sm:$0xff]  }
 0x3ae   : > { %6042 = vmatpush1.bf16.msra.mxu0 %v8946_v27  ;;  %v9033_v27 = vld [vmem:[#allocation7 + $0x388] ss:$48 sps:$4 sm:$0xff]  }
 0x3af   : > { %6148 = vmatpush1.bf16.msra.mxu1 %v8949_v40  ;;  %6043 = vmatprep.subr.bf16.mxu0 %v8954_v41  ;;  %v9038_v40 = vld [vmem:[#allocation7 + $0x3e4] ss:$48 sps:$4 sm:$0xff]   ;;  %v9041_v41 = vld [vmem:[#allocation7 + $0x3ec] ss:$48 sps:$4 sm:$0xff]  }
 0x3b0   : > { %6149 = vmatprep.subr.bf16.mxu1 %v8957_v38  ;;  %v9036_v38 = vld [vmem:[#allocation7 + $0x3e0] ss:$48 sps:$4 sm:$0xff]  }
 0x3b2   : > { %6044 = vmatpush1.bf16.msra.mxu0 %v8952_v55  ;;  %v9039_v55 = vld [vmem:[#allocation7 + $0x3e8] ss:$48 sps:$4 sm:$0xff]  }
 0x3b3   : > { %6150 = vmatpush1.bf16.msra.mxu1 %v8955_v12  ;;  %6045 = vmatprep.subr.bf16.mxu0 %v8960_v19  ;;  %v9044_v12 = vld [vmem:[#allocation7 + $0x444] ss:$48 sps:$4 sm:$0xff]   ;;  %v9047_v19 = vld [vmem:[#allocation7 + $0x44c] ss:$48 sps:$4 sm:$0xff]  }
 0x3b4   : > { %6151 = vmatprep.subr.bf16.mxu1 %v8963_v35  ;;  %v9042_v35 = vld [vmem:[#allocation7 + $0x440] ss:$48 sps:$4 sm:$0xff]  }
 0x3b6   : > { %6046 = vmatpush1.bf16.msra.mxu0 %v8958_v16  ;;  %v9045_v16 = vld [vmem:[#allocation7 + $0x448] ss:$48 sps:$4 sm:$0xff]  }
 0x3b7   : > { %6152 = vmatpush1.bf16.msra.mxu1 %v8961_v42  ;;  %6047 = vmatprep.subr.bf16.mxu0 %v8966_v43  ;;  %v9050_v42 = vld [vmem:[#allocation7 + $0x4a4] ss:$48 sps:$4 sm:$0xff]   ;;  %v9053_v43 = vld [vmem:[#allocation7 + $0x4ac] ss:$48 sps:$4 sm:$0xff]  }
 0x3b8   : > { %6153 = vmatprep.subr.bf16.mxu1 %v8969_v32  ;;  %v9048_v32 = vld [vmem:[#allocation7 + $0x4a0] ss:$48 sps:$4 sm:$0xff]  }
 0x3ba   : > { %6048 = vmatpush1.bf16.msra.mxu0 %v8964_v36  ;;  %v9051_v36 = vld [vmem:[#allocation7 + $0x4a8] ss:$48 sps:$4 sm:$0xff]  }
 0x3bb   : > { %6154 = vmatpush1.bf16.msra.mxu1 %v8967_v48  ;;  %6049 = vmatprep.subr.bf16.mxu0 %v8972_v49  ;;  %v9056_v48 = vld [vmem:[#allocation7 + $0x504] ss:$48 sps:$4 sm:$0xff]   ;;  %v9059_v49 = vld [vmem:[#allocation7 + $0x50c] ss:$48 sps:$4 sm:$0xff]  }
 0x3bc   : > { %6155 = vmatprep.subr.bf16.mxu1 %v8975_v63  ;;  %v9054_v63 = vld [vmem:[#allocation7 + $0x500] ss:$48 sps:$4 sm:$0xff]  }
 0x3be   : > { %6050 = vmatpush1.bf16.msra.mxu0 %v8970_v39  ;;  %v9057_v39 = vld [vmem:[#allocation7 + $0x508] ss:$48 sps:$4 sm:$0xff]  }
 0x3bf   : > { %6156 = vmatpush1.bf16.msra.mxu1 %v8973_v54  ;;  %6178 = vmatprep.subr.bf16.mxu0 %v8978_v47  ;;  %v9062_v54 = vld [vmem:[#allocation7 + $0x564] ss:$48 sps:$4 sm:$0xff]   ;;  %v9065_v47 = vld [vmem:[#allocation7 + $0x56c] ss:$48 sps:$4 sm:$0xff]  }
 0x3c0   : > { %6284 = vmatprep.subr.bf16.mxu1 %v8981_v15  ;;  %v9060_v15 = vld [vmem:[#allocation7 + $0x560] ss:$48 sps:$4 sm:$0xff]  }
 0x3c1   : > { %6052 = vmatmul.mubr.bf16.vlgmr.msra.gmra.mrb[32].mxu0 %v9918_v34 }
 0x3c2   : > { %6158 = vmatmul.mubr.bf16.vlgmr.msra.gmra.mrb[32].mxu1 %v9918_v34  ;;  %6061 = vmatprep.mubr.bf16.mxu0 %v9950_v53 }
 0x3c3   : > { %6167 = vmatprep.mubr.bf16.mxu1 %v9950_v53  ;;  %6179 = vmatpush1.bf16.msra.mxu0 %v8976_v51  ;;  %v9063_v51 = vld [vmem:[#allocation7 + $0x568] ss:$48 sps:$4 sm:$0xff]  }
 0x3c4   : > { %6285 = vmatpush1.bf16.msra.mxu1 %v8979_v29  ;;  %6180 = vmatprep.subr.bf16.mxu0 %v8984_v57  ;;  %v9068_v29 = vld [vmem:[#allocation7 + $0x5c4] ss:$48 sps:$4 sm:$0xff]   ;;  %v9071_v57 = vld [vmem:[#allocation7 + $0x5cc] ss:$48 sps:$4 sm:$0xff]  }
 0x3c5   : > { %6286 = vmatprep.subr.bf16.mxu1 %v8987_v44  ;;  %v9066_v44 = vld [vmem:[#allocation7 + $0x5c0] ss:$48 sps:$4 sm:$0xff]  }
 0x3c7   : > { %6181 = vmatpush1.bf16.msra.mxu0 %v8982_v59  ;;  %v9069_v59 = vld [vmem:[#allocation7 + $0x5c8] ss:$48 sps:$4 sm:$0xff]  }
 0x3c8   : > { %6287 = vmatpush1.bf16.msra.mxu1 %v8985_v20  ;;  %6182 = vmatprep.subr.bf16.mxu0 %v8990_v3  ;;  %v9074_v20 = vld [vmem:[#allocation7 + $0x624] ss:$48 sps:$4 sm:$0xff]   ;;  %v9077_v3 = vld [vmem:[#allocation7 + $0x62c] ss:$48 sps:$4 sm:$0xff]  }
 0x3c9   : > { %6062 = vmatmul.mubr.bf16.gmra.mrb[36].mxu0 %v9946_v25  ;;  %6288 = vmatprep.subr.bf16.mxu1 %v8993_v61  ;;  %v9072_v61 = vld [vmem:[#allocation7 + $0x620] ss:$48 sps:$4 sm:$0xff]  }
 0x3ca   : > { %6168 = vmatmul.mubr.bf16.gmra.mrb[36].mxu1 %v9946_v25  ;;  %6210 = vmatprep.mubr.bf16.mxu0 %v9920_v2 }
 0x3cb   : > { %6183 = vmatpush1.bf16.msra.mxu0 %v8988_v62  ;;  %6316 = vmatprep.mubr.bf16.mxu1 %v9920_v2  ;;  %v9009_v2 = vld [vmem:[#allocation7 + $0x208] ss:$48 sps:$4 sm:$0xff]  }
 0x3cc   : > { %6289 = vmatpush1.bf16.msra.mxu1 %v8991_v0  ;;  %6184 = vmatprep.subr.bf16.mxu0 %v8996_v1  ;;  %v9075_v62 = vld [vmem:[#allocation7 + $0x628] ss:$48 sps:$4 sm:$0xff]   ;;  %v9080_v0 = vld [vmem:[#allocation7 + $0x684] ss:$48 sps:$4 sm:$0xff]   ;;  %v9083_v1 = vld [vmem:[#allocation7 + $0x68c] ss:$48 sps:$4 sm:$0xff]  }
 0x3cd   : > { %6290 = vmatprep.subr.bf16.mxu1 %v8999_v9  ;;  %v9078_v9 = vld [vmem:[#allocation7 + $0x680] ss:$48 sps:$4 sm:$0xff]  }
 0x3cf   : > { %6185 = vmatpush1.bf16.msra.mxu0 %v8994_v5  ;;  %v9081_v5 = vld [vmem:[#allocation7 + $0x688] ss:$48 sps:$4 sm:$0xff]  }
 0x3d0   : > { %6291 = vmatpush1.bf16.msra.mxu1 %v8997_v4  ;;  %6186 = vmatprep.subr.bf16.mxu0 %v9002_v30  ;;  %v9086_v4 = vld [vmem:[#allocation7 + $0x6e4] ss:$48 sps:$4 sm:$0xff]   ;;  %v9089_v30 = vld [vmem:[#allocation7 + $0x6ec] ss:$48 sps:$4 sm:$0xff]  }
 0x3d1   : > { %6292 = vmatprep.subr.bf16.mxu1 %v9005_v6  ;;  %v9084_v6 = vld [vmem:[#allocation7 + $0x6e0] ss:$48 sps:$4 sm:$0xff]  }
 0x3d3   : > { %6187 = vmatpush1.bf16.msra.mxu0 %v9000_v23  ;;  %v9087_v23 = vld [vmem:[#allocation7 + $0x6e8] ss:$48 sps:$4 sm:$0xff]  }
 0x3d4   : > { %6293 = vmatpush1.bf16.msra.mxu1 %v9003_v31  ;;  %6188 = vmatprep.subr.bf16.mxu0 %v9008_v7  ;;  %v9092_v31 = vld [vmem:[#allocation7 + $0x744] ss:$48 sps:$4 sm:$0xff]   ;;  %v9093_v7 = vld [vmem:[#allocation7 + $0x748] ss:$48 sps:$4 sm:$0xff]  }
 0x3d5   : > { %6294 = vmatprep.subr.bf16.mxu1 %v9011_v8  ;;  %v9098_v8 = vld [vmem:[#allocation7 + $0x7a4] ss:$48 sps:$4 sm:$0xff]  }
 0x3d7   : > { %6189 = vmatpush1.bf16.msra.mxu0 %v9006_v10  ;;  %v9101_v10 = vld [vmem:[#allocation7 + $0x7ac] ss:$48 sps:$4 sm:$0xff]  }
 0x3d8   : > { %6295 = vmatpush1.bf16.msra.mxu1 %v9009_v2  ;;  %6190 = vmatprep.subr.bf16.mxu0 %v9014_v11  ;;  %v9096_v2 = vld [vmem:[#allocation7 + $0x7a0] ss:$48 sps:$4 sm:$0xff]   ;;  %v9099_v11 = vld [vmem:[#allocation7 + $0x7a8] ss:$48 sps:$4 sm:$0xff]  }
 0x3d9   : > { %6296 = vmatprep.subr.bf16.mxu1 %v9017_v14  ;;  %v9104_v14 = vld [vmem:[#allocation7 + $0x804] ss:$48 sps:$4 sm:$0xff]  }
 0x3db   : > { %6191 = vmatpush1.bf16.msra.mxu0 %v9012_v50 }
 0x3dc   : > { %6297 = vmatpush1.bf16.msra.mxu1 %v9015_v33  ;;  %6192 = vmatprep.subr.bf16.mxu0 %v9020_v45 }
 0x3dd   : > { %6298 = vmatprep.subr.bf16.mxu1 %v9023_v56  ;;  %v9102_v56 = vld [vmem:[#allocation7 + $0x800] ss:$48 sps:$4 sm:$0xff]  }
 0x3df   : > { %6193 = vmatpush1.bf16.msra.mxu0 %v9018_v46  ;;  %v9105_v46 = vld [vmem:[#allocation7 + $0x808] ss:$48 sps:$4 sm:$0xff]  }
 0x3e0   : > { %6299 = vmatpush1.bf16.msra.mxu1 %v9021_v22  ;;  %6194 = vmatprep.subr.bf16.mxu0 %v9026_v13 }
 0x3e1   : > { %6300 = vmatprep.subr.bf16.mxu1 %v9029_v18  ;;  %v9110_v18 = vld [vmem:[#allocation7 + $0x864] ss:$48 sps:$4 sm:$0xff]  }
 0x3e3   : > { %6195 = vmatpush1.bf16.msra.mxu0 %v9024_v37  ;;  %v9113_v37 = vld [vmem:[#allocation7 + $0x86c] ss:$48 sps:$4 sm:$0xff]  }
 0x3e4   : > { %6301 = vmatpush1.bf16.msra.mxu1 %v9027_v28  ;;  %6196 = vmatprep.subr.bf16.mxu0 %v9032_v17 }
 0x3e5   : > { %6302 = vmatprep.subr.bf16.mxu1 %v9035_v21 }
 0x3e7   : > { %6197 = vmatpush1.bf16.msra.mxu0 %v9030_v26 }
 0x3e8   : > { %6303 = vmatpush1.bf16.msra.mxu1 %v9033_v27  ;;  %6198 = vmatprep.subr.bf16.mxu0 %v9038_v40 }
 0x3e9   : > { %6304 = vmatprep.subr.bf16.mxu1 %v9041_v41 }
 0x3eb   : > { %6199 = vmatpush1.bf16.msra.mxu0 %v9036_v38 }
 0x3ec   : > { %6305 = vmatpush1.bf16.msra.mxu1 %v9039_v55  ;;  %6200 = vmatprep.subr.bf16.mxu0 %v9044_v12 }
 0x3ed   : > { %6306 = vmatprep.subr.bf16.mxu1 %v9047_v19  ;;  %v9108_v19 = vld [vmem:[#allocation7 + $0x860] ss:$48 sps:$4 sm:$0xff]  }
 0x3ef   : > { %6201 = vmatpush1.bf16.msra.mxu0 %v9042_v35 }
 0x3f0   : > { %6307 = vmatpush1.bf16.msra.mxu1 %v9045_v16  ;;  %6202 = vmatprep.subr.bf16.mxu0 %v9050_v42  ;;  %v9111_v42 = vld [vmem:[#allocation7 + $0x868] ss:$48 sps:$4 sm:$0xff]  }
 0x3f1   : > { %6308 = vmatprep.subr.bf16.mxu1 %v9053_v43  ;;  %v9116_v43 = vld [vmem:[#allocation7 + $0x8c4] ss:$48 sps:$4 sm:$0xff]  }
 0x3f3   : > { %6203 = vmatpush1.bf16.msra.mxu0 %v9048_v32 }
 0x3f4   : > { %6309 = vmatpush1.bf16.msra.mxu1 %v9051_v36  ;;  %6204 = vmatprep.subr.bf16.mxu0 %v9056_v48  ;;  %v9119_v48 = vld [vmem:[#allocation7 + $0x8cc] ss:$48 sps:$4 sm:$0xff]  }
 0x3f5   : > { %6310 = vmatprep.subr.bf16.mxu1 %v9059_v49 }
 0x3f7   : > { %6205 = vmatpush1.bf16.msra.mxu0 %v9054_v63 }
 0x3f8   : > { %6311 = vmatpush1.bf16.msra.mxu1 %v9057_v39  ;;  %6206 = vmatprep.subr.bf16.mxu0 %v9062_v54 }
 0x3f9   : > { %6312 = vmatprep.subr.bf16.mxu1 %v9065_v47  ;;  %v9114_v47 = vld [vmem:[#allocation7 + $0x8c0] ss:$48 sps:$4 sm:$0xff]  }
 0x3fb   : > { %6207 = vmatpush1.bf16.msra.mxu0 %v9060_v15  ;;  %v9117_v15 = vld [vmem:[#allocation7 + $0x8c8] ss:$48 sps:$4 sm:$0xff]  }
 0x3fc   : > { %6313 = vmatpush1.bf16.msra.mxu1 %v9063_v51  ;;  %6208 = vmatprep.subr.bf16.mxu0 %v9068_v29 }
 0x3fd   : > { %6314 = vmatprep.subr.bf16.mxu1 %v9071_v57  ;;  %v9122_v57 = vld [vmem:[#allocation7 + $0x924] ss:$48 sps:$4 sm:$0xff]  }
 0x3ff   : > { %6209 = vmatpush1.bf16.msra.mxu0 %v9066_v44  ;;  %v9125_v44 = vld [vmem:[#allocation7 + $0x92c] ss:$48 sps:$4 sm:$0xff]  }
 0x400   : > { %6315 = vmatpush1.bf16.msra.mxu1 %v9069_v59  ;;  %6231 = vmatprep.subr.bf16.mxu0 %v9074_v20 }
 0x401   : > { %6337 = vmatprep.subr.bf16.mxu1 %v9077_v3 }
 0x402   : > { %6211 = vmatmul.mubr.bf16.vlgmr.msra.gmra.mrb[40].mxu0 %v9916_v58 }
 0x403   : > { %6317 = vmatmul.mubr.bf16.vlgmr.msra.gmra.mrb[40].mxu1 %v9916_v58  ;;  %6220 = vmatprep.mubr.bf16.mxu0 %v9948_v52  ;;  %v9095_v58 = vld [vmem:[#allocation7 + $0x74c] ss:$48 sps:$4 sm:$0xff]  }
 0x404   : > { %6232 = vmatpush1.bf16.msra.mxu0 %v9072_v61  ;;  %6326 = vmatprep.mubr.bf16.mxu1 %v9948_v52  ;;  %v9090_v52 = vld [vmem:[#allocation7 + $0x740] ss:$48 sps:$4 sm:$0xff]  }
 0x405   : > { %6338 = vmatpush1.bf16.msra.mxu1 %v9075_v62  ;;  %6233 = vmatprep.subr.bf16.mxu0 %v9080_v0 }
 0x406   : > { %6339 = vmatprep.subr.bf16.mxu1 %v9083_v1 }
 0x408   : > { %6234 = vmatpush1.bf16.msra.mxu0 %v9078_v9 }
 0x409   : > { %6340 = vmatpush1.bf16.msra.mxu1 %v9081_v5  ;;  %6235 = vmatprep.subr.bf16.mxu0 %v9086_v4 }
 0x40a   : > { %6221 = vmatmul.mubr.bf16.gmra.mrb[44].mxu0 %v9944_v24  ;;  %6341 = vmatprep.subr.bf16.mxu1 %v9089_v30  ;;  %v9120_v30 = vld [vmem:[#allocation7 + $0x920] ss:$48 sps:$4 sm:$0xff]  }
 0x40b   : > { %6327 = vmatmul.mubr.bf16.gmra.mrb[44].mxu1 %v9944_v24  ;;  %6263 = vmatprep.mubr.bf16.mxu0 %v9922_v60  ;;  %v9107_v24 = vld [vmem:[#allocation7 + $0x80c] ss:$48 sps:$4 sm:$0xff]  }
 0x40c   : > { %6236 = vmatpush1.bf16.msra.mxu0 %v9084_v6  ;;  %6369 = vmatprep.mubr.bf16.mxu1 %v9922_v60 }
 0x40d   : > { %6342 = vmatpush1.bf16.msra.mxu1 %v9087_v23  ;;  %6237 = vmatprep.subr.bf16.mxu0 %v9092_v31  ;;  %v9123_v31 = vld [vmem:[#allocation7 + $0x928] ss:$48 sps:$4 sm:$0xff]  }
 0x40e   : > { %6343 = vmatprep.subr.bf16.mxu1 %v9095_v58  ;;  %v9128_v58 = vld [vmem:[#allocation7 + $0x984] ss:$48 sps:$4 sm:$0xff]  }
 0x410   : > { %6238 = vmatpush1.bf16.msra.mxu0 %v9090_v52 }
 0x411   : > { %6344 = vmatpush1.bf16.msra.mxu1 %v9093_v7  ;;  %6239 = vmatprep.subr.bf16.mxu0 %v9098_v8  ;;  %v9131_v8 = vld [vmem:[#allocation7 + $0x98c] ss:$48 sps:$4 sm:$0xff]  }
 0x412   : > { %6345 = vmatprep.subr.bf16.mxu1 %v9101_v10  ;;  %v9126_v10 = vld [vmem:[#allocation7 + $0x980] ss:$48 sps:$4 sm:$0xff]  }
 0x413   : > { %v9990_v50 = vpop.f32.mrb[24].mxu0  ;;  %v9992_v33 = vpop.f32.mrb[24].mxu1 }
 0x414   : > { %6240 = vmatpush1.bf16.msra.mxu0 %v9096_v2  ;;  %v9994_v60 = vpop.f32.mrb[25].mxu0  ;;  %v9996_v45 = vpop.f32.mrb[25].mxu1  ;;  %v6406_v28 = vrot.slane %v9990_v50, 7  ;;  %v6408_v17 = vrot.slane %v9992_v33, 7  ;;  %v9129_v2 = vld [vmem:[#allocation7 + $0x988] ss:$48 sps:$4 sm:$0xff]  }
 0x415   : > { %6346 = vmatpush1.bf16.msra.mxu1 %v9099_v11  ;;  %6241 = vmatprep.subr.bf16.mxu0 %v9104_v14  ;;  %v5845_v22 = vpop.f32.mrb[26].mxu0  ;;  %v5951_v13 = vpop.f32.mrb[26].mxu1  ;;  %v6407_v41 = vrot.slane %v9994_v60, 7  ;;  %v6409_v38 = vrot.slane %v9996_v45, 7  ;;  %v9134_v11 = vld [vmem:[#allocation7 + $0x9e4] ss:$48 sps:$4 sm:$0xff]  }
 0x416   : > { %6347 = vmatprep.subr.bf16.mxu1 %v9107_v24  ;;  %v6410_v21 = vrot.slane %v5845_v22, 7  ;;  %v6414_v26 = vrot.slane %v5951_v13, 7  ;;  %v5847_v27 = vpop.f32.mrb[27].mxu0  ;;  %v5953_v40 = vpop.f32.mrb[27].mxu1  ;;  %v9137_v14 = vld [vmem:[#allocation7 + $0x9ec] ss:$48 sps:$4 sm:$0xff]  }
 0x417   : > { %v6412_v55 = vrot.slane %v5847_v27, 7  ;;  %v6416_v12 = vrot.slane %v5953_v40, 7  ;;  %v9132_v24 = vld [vmem:[#allocation7 + $0x9e0] ss:$48 sps:$4 sm:$0xff]   ;;  %v9143_v22 = vld [vmem:[#allocation7 + $0xa4c] ss:$48 sps:$4 sm:$0xff]  }
 0x418   : > { %6242 = vmatpush1.bf16.msra.mxu0 %v9102_v56  ;;  %v10005_v35 = vsel %vm3280_vm0, %v6406_v28, %v6410_v21  ;;  %v10010_v16 = vsel %vm3280_vm0, %v6408_v17, %v6414_v26  ;;  %v9135_v56 = vld [vmem:[#allocation7 + $0x9e8] ss:$48 sps:$4 sm:$0xff]   ;;  %v9138_v13 = vld [vmem:[#allocation7 + $0xa40] ss:$48 sps:$4 sm:$0xff]   ;;  %v9149_v21 = vld [vmem:[#allocation7 + $0xaac] ss:$48 sps:$4 sm:$0xff]  }
 0x419   : > { %6348 = vmatpush1.bf16.msra.mxu1 %v9105_v46  ;;  %6243 = vmatprep.subr.bf16.mxu0 %v9110_v18  ;;  %v10015_v32 = vsel %vm3280_vm0, %v6407_v41, %v6412_v55  ;;  %v10020_v36 = vsel %vm3280_vm0, %v6409_v38, %v6416_v12  ;;  %v9140_v46 = vld [vmem:[#allocation7 + $0xa44] ss:$48 sps:$4 sm:$0xff]   ;;  %v9141_v18 = vld [vmem:[#allocation7 + $0xa48] ss:$48 sps:$4 sm:$0xff]   ;;  %v9144_v26 = vld [vmem:[#allocation7 + $0xaa0] ss:$48 sps:$4 sm:$0xff]  }
 0x41a   : > { %6349 = vmatprep.subr.bf16.mxu1 %v9113_v37  ;;  %v9146_v37 = vld [vmem:[#allocation7 + $0xaa4] ss:$48 sps:$4 sm:$0xff]   ;;  %v9147_v27 = vld [vmem:[#allocation7 + $0xaa8] ss:$48 sps:$4 sm:$0xff]   ;;  %v9155_v55 = vld [vmem:[#allocation7 + $0xb0c] ss:$48 sps:$4 sm:$0xff]  }
 0x41b   : > { %v10022_v49 = vpop.f32.mrb[28].mxu0  ;;  %v10024_v63 = vpop.f32.mrb[28].mxu1  ;;  %v9152_v40 = vld [vmem:[#allocation7 + $0xb04] ss:$48 sps:$4 sm:$0xff]   ;;  %v9150_v12 = vld [vmem:[#allocation7 + $0xb00] ss:$48 sps:$4 sm:$0xff]  }
 0x41c   : > { %6244 = vmatpush1.bf16.msra.mxu0 %v9108_v19  ;;  %v10026_v39 = vpop.f32.mrb[29].mxu0  ;;  %v10028_v54 = vpop.f32.mrb[29].mxu1  ;;  %v6418_v59 = vrot.slane %v10022_v49, 7  ;;  %v6420_v20 = vrot.slane %v10024_v63, 7  ;;  %v9153_v19 = vld [vmem:[#allocation7 + $0xb08] ss:$48 sps:$4 sm:$0xff]  }
 0x41d   : > { %6350 = vmatpush1.bf16.msra.mxu1 %v9111_v42  ;;  %6245 = vmatprep.subr.bf16.mxu0 %v9116_v43  ;;  %v5855_v51 = vpop.f32.mrb[30].mxu0  ;;  %v5961_v29 = vpop.f32.mrb[30].mxu1  ;;  %v6419_v1 = vrot.slane %v10026_v39, 7  ;;  %v6421_v9 = vrot.slane %v10028_v54, 7  ;;  %v9158_v42 = vld [vmem:[#allocation7 + $0xb64] ss:$48 sps:$4 sm:$0xff]  }
 0x41e   : > { %6351 = vmatprep.subr.bf16.mxu1 %v9119_v48  ;;  %v6422_v3 = vrot.slane %v5855_v51, 7  ;;  %v6426_v61 = vrot.slane %v5961_v29, 7  ;;  %v5857_v62 = vpop.f32.mrb[31].mxu0  ;;  %v5963_v0 = vpop.f32.mrb[31].mxu1  ;;  %v9161_v43 = vld [vmem:[#allocation7 + $0xb6c] ss:$48 sps:$4 sm:$0xff]  }
 0x41f   : > { %v6424_v5 = vrot.slane %v5857_v62, 7  ;;  %v6428_v4 = vrot.slane %v5963_v0, 7  ;;  %v9156_v48 = vld [vmem:[#allocation7 + $0xb60] ss:$48 sps:$4 sm:$0xff]   ;;  %v9167_v51 = vld [vmem:[#allocation7 + $0xbcc] ss:$48 sps:$4 sm:$0xff]  }
 0x420   : > { %6246 = vmatpush1.bf16.msra.mxu0 %v9114_v47  ;;  %v10037_v6 = vsel %vm3280_vm0, %v6418_v59, %v6422_v3  ;;  %v10042_v23 = vsel %vm3280_vm0, %v6420_v20, %v6426_v61  ;;  %v9159_v47 = vld [vmem:[#allocation7 + $0xb68] ss:$48 sps:$4 sm:$0xff]   ;;  %v9162_v29 = vld [vmem:[#allocation7 + $0xbc0] ss:$48 sps:$4 sm:$0xff]   ;;  %v6446_v3 = vsel %vm3280_vm0, 0.0, %v6406_v28  ;;  %v6448_v0 = vsel %vm3280_vm0, 0.0, %v6408_v17 }
 0x421   : > { %6352 = vmatpush1.bf16.msra.mxu1 %v9117_v15  ;;  %6247 = vmatprep.subr.bf16.mxu0 %v9122_v57  ;;  %v10047_v52 = vsel %vm3280_vm0, %v6419_v1, %v6424_v5  ;;  %v10052_v7 = vsel %vm3280_vm0, %v6421_v9, %v6428_v4  ;;  %v9164_v15 = vld [vmem:[#allocation7 + $0xbc4] ss:$48 sps:$4 sm:$0xff]   ;;  %v9165_v57 = vld [vmem:[#allocation7 + $0xbc8] ss:$48 sps:$4 sm:$0xff]   ;;  %v6450_v45 = vsel %vm3280_vm0, 0.0, %v6418_v59  ;;  %v6453_v49 = vsel %vm3280_vm0, 0.0, %v6421_v9 }
 0x422   : > { %6353 = vmatprep.subr.bf16.mxu1 %v9125_v44 }
 0x424   : > { %6248 = vmatpush1.bf16.msra.mxu0 %v9120_v30 }
 0x425   : > { %6354 = vmatpush1.bf16.msra.mxu1 %v9123_v31  ;;  %6249 = vmatprep.subr.bf16.mxu0 %v9128_v58 }
 0x426   : > { %6355 = vmatprep.subr.bf16.mxu1 %v9131_v8 }
 0x428   : > { %6250 = vmatpush1.bf16.msra.mxu0 %v9126_v10 }
 0x429   : > { %6356 = vmatpush1.bf16.msra.mxu1 %v9129_v2  ;;  %6251 = vmatprep.subr.bf16.mxu0 %v9134_v11 }
 0x42a   : > { %6357 = vmatprep.subr.bf16.mxu1 %v9137_v14 }
 0x42c   : > { %6252 = vmatpush1.bf16.msra.mxu0 %v9132_v24 }
 0x42d   : > { %6358 = vmatpush1.bf16.msra.mxu1 %v9135_v56  ;;  %6253 = vmatprep.subr.bf16.mxu0 %v9140_v46 }
 0x42e   : > { %6359 = vmatprep.subr.bf16.mxu1 %v9143_v22 }
 0x430   : > { %6254 = vmatpush1.bf16.msra.mxu0 %v9138_v13 }
 0x431   : > { %6360 = vmatpush1.bf16.msra.mxu1 %v9141_v18  ;;  %6255 = vmatprep.subr.bf16.mxu0 %v9146_v37 }
 0x432   : > { %6361 = vmatprep.subr.bf16.mxu1 %v9149_v21 }
 0x434   : > { %6256 = vmatpush1.bf16.msra.mxu0 %v9144_v26 }
 0x435   : > { %6362 = vmatpush1.bf16.msra.mxu1 %v9147_v27  ;;  %6257 = vmatprep.subr.bf16.mxu0 %v9152_v40 }
 0x436   : > { %6363 = vmatprep.subr.bf16.mxu1 %v9155_v55 }
 0x438   : > { %6258 = vmatpush1.bf16.msra.mxu0 %v9150_v12 }
 0x439   : > { %6364 = vmatpush1.bf16.msra.mxu1 %v9153_v19  ;;  %6259 = vmatprep.subr.bf16.mxu0 %v9158_v42 }
 0x43a   : > { %6365 = vmatprep.subr.bf16.mxu1 %v9161_v43 }
 0x43c   : > { %6260 = vmatpush1.bf16.msra.mxu0 %v9156_v48 }
 0x43d   : > { %6366 = vmatpush1.bf16.msra.mxu1 %v9159_v47  ;;  %6261 = vmatprep.subr.bf16.mxu0 %v9164_v15 }
 0x43e   : > { %6367 = vmatprep.subr.bf16.mxu1 %v9167_v51 }
 0x440   : > { %6262 = vmatpush1.bf16.msra.mxu0 %v9162_v29 }
 0x441   : > { %6368 = vmatpush1.bf16.msra.mxu1 %v9165_v57 }
 0x443   : > { %6264 = vmatmul.mubr.bf16.vlgmr.msra.gmra.mrb[40].mxu0 %v9918_v34 }
 0x444   : > { %6370 = vmatmul.mubr.bf16.vlgmr.msra.gmra.mrb[40].mxu1 %v9918_v34  ;;  %6273 = vmatprep.mubr.bf16.mxu0 %v9950_v53 }
 0x445   : > { %6379 = vmatprep.mubr.bf16.mxu1 %v9950_v53  ;;  %v6447_v53 = vsel %vm3280_vm0, 0.0, %v6407_v41 }
 0x44b   : > { %6274 = vmatmul.mubr.bf16.gmra.mrb[44].mxu0 %v9946_v25 }
 0x44c   : > { %6380 = vmatmul.mubr.bf16.gmra.mrb[44].mxu1 %v9946_v25  ;;  %v6449_v25 = vsel %vm3280_vm0, 0.0, %v6409_v38 }
 0x494   : > { %v6053_v44 = vpop.f32.mrb[32].mxu0 }
 0x495   : > { %v6518_v61 = vadd.f32 %v6446_v3, %v6053_v44  ;;  %v6159_v62 = vpop.f32.mrb[32].mxu1  ;;  %v6055_v34 = vpop.f32.mrb[33].mxu0 }
 0x496   : > { %v6520_v5 = vadd.f32 %v6448_v0, %v6159_v62  ;;  %v6519_v4 = vadd.f32 %v6447_v53, %v6055_v34  ;;  %v6161_v30 = vpop.f32.mrb[33].mxu1  ;;  %v6057_v50 = vpop.f32.mrb[34].mxu0 }
 0x497   : > { %v6521_v28 = vadd.f32 %v6449_v25, %v6161_v30  ;;  %v6522_v31 = vadd.f32 %v10005_v35, %v6057_v50  ;;  %v6163_v58 = vpop.f32.mrb[34].mxu1  ;;  %v6059_v33 = vpop.f32.mrb[35].mxu0  ;;  %v6452_v35 = vsel %vm3280_vm0, 0.0, %v6420_v20 }
 0x498   : > { %v6524_v17 = vadd.f32 %v10010_v16, %v6163_v58  ;;  %v6523_v8 = vadd.f32 %v10015_v32, %v6059_v33  ;;  %v6165_v60 = vpop.f32.mrb[35].mxu1  ;;  %v6451_v16 = vsel %vm3280_vm0, 0.0, %v6419_v1 }
 0x499   : > { %v6525_v41 = vadd.f32 %v10020_v36, %v6165_v60 }
 0x49c   : > { %v6063_v10 = vpop.f32.mrb[36].mxu0 }
 0x49d   : > { %v10079_v2 = vadd.f32 %v6450_v45, %v6063_v10  ;;  %v6169_v38 = vpop.f32.mrb[36].mxu1  ;;  %v6065_v11 = vpop.f32.mrb[37].mxu0 }
 0x49e   : > { %v10087_v32 = vadd.f32 %v6452_v35, %v6169_v38  ;;  %v10089_v36 = vadd.f32 %v6451_v16, %v6065_v11  ;;  %v6171_v14 = vpop.f32.mrb[37].mxu1  ;;  %v6067_v59 = vpop.f32.mrb[38].mxu0 }
 0x49f   : > { %v10094_v24 = vadd.f32 %v6453_v49, %v6171_v14  ;;  %v10097_v63 = vadd.f32 %v10037_v6, %v6067_v59  ;;  %v6173_v20 = vpop.f32.mrb[38].mxu1  ;;  %v6069_v56 = vpop.f32.mrb[39].mxu0 }
 0x4a0   : > { %v10100_v39 = vadd.f32 %v10042_v23, %v6173_v20  ;;  %v10103_v1 = vadd.f32 %v10047_v52, %v6069_v56  ;;  %v6175_v46 = vpop.f32.mrb[39].mxu1 }
 0x4a1   : > { %v10106_v22 = vadd.f32 %v10052_v7, %v6175_v46 }
 0x516   : > { %v6265_v54 = vpop.f32.mrb[40].mxu0 }
 0x517   : > { %v6371_v9 = vpop.f32.mrb[40].mxu1  ;;  %v6267_v13 = vpop.f32.mrb[41].mxu0  ;;  %v6470_v21 = vrot.slane %v6265_v54, 1 }
 0x518   : > { %v6373_v18 = vpop.f32.mrb[41].mxu1  ;;  %v6269_v37 = vpop.f32.mrb[42].mxu0  ;;  %v6476_v40 = vrot.slane %v6371_v9, 1  ;;  %v6473_v55 = vrot.slane %v6267_v13, 1 }
 0x519   : > { %v6471_v6 = vrot.slane %v6269_v37, 1  ;;  %v6375_v26 = vpop.f32.mrb[42].mxu1  ;;  %v6271_v27 = vpop.f32.mrb[43].mxu0  ;;  %v6479_v52 = vrot.slane %v6373_v18, 1 }
 0x51a   : > { %v6477_v23 = vrot.slane %v6375_v26, 1  ;;  %v6474_v12 = vrot.slane %v6271_v27, 1  ;;  %v6377_v19 = vpop.f32.mrb[43].mxu1 }
 0x51b   : > { %v6472_v42 = vsel %vm3345_vm1, %v6470_v21, %v6471_v6  ;;  %v6510_v7 = vsel %vm3345_vm1, %v6471_v6, 0.0  ;;  %v6480_v43 = vrot.slane %v6377_v19, 1 }
 0x51c   : > { %v10110_v48 = vadd.f32 %v6518_v61, %v6472_v42  ;;  %v10112_v47 = vadd.f32 %v6522_v31, %v6510_v7  ;;  %v6478_v15 = vsel %vm3345_vm1, %v6476_v40, %v6477_v23  ;;  %v6512_v51 = vsel %vm3345_vm1, %v6477_v23, 0.0 }
 0x51d   : > { %v10116_v29 = vadd.f32 %v6520_v5, %v6478_v15  ;;  %v10118_v57 = vadd.f32 %v6524_v17, %v6512_v51  ;;  %v6475_v44 = vsel %vm3345_vm1, %v6473_v55, %v6474_v12  ;;  %v6511_v3 = vsel %vm3345_vm1, %v6474_v12, 0.0 }
 0x51e   : > { %v6550_v62 = vadd.f32 %v10112_v47, %v10110_v48  ;;  %v10124_v0 = vadd.f32 %v6519_v4, %v6475_v44  ;;  %v10126_v61 = vadd.f32 %v6523_v8, %v6511_v3  ;;  %v6481_v34 = vsel %vm3345_vm1, %v6479_v52, %v6480_v43  ;;  %v6275_v53 = vpop.f32.mrb[44].mxu0 }
 0x51f   : > { %v6513_v30 = vsel %vm3345_vm1, %v6480_v43, 0.0  ;;  %v10130_v5 = vadd.f32 %v6521_v28, %v6481_v34  ;;  %v6381_v25 = vpop.f32.mrb[44].mxu1  ;;  %v6277_v50 = vpop.f32.mrb[45].mxu0  ;;  %v6482_v60 = vrot.slane %v6275_v53, 1  ;;  %v6564_v51 = vadd.f32 %v10118_v57, %v10116_v29 }
 0x520   : > { %v6551_v31 = vrot.slane %v6550_v62, 4  ;;  %v6557_v58 = vadd.f32 %v10126_v61, %v10124_v0  ;;  %v10134_v33 = vadd.f32 %v6525_v41, %v6513_v30  ;;  %v6383_v17 = vpop.f32.mrb[45].mxu1  ;;  %v6279_v4 = vpop.f32.mrb[46].mxu0  ;;  %v6488_v28 = vrot.slane %v6381_v25, 1 }
 0x521   : > { %v6483_v8 = vrot.slane %v6279_v4, 1  ;;  %v6385_v10 = vpop.f32.mrb[46].mxu1  ;;  %v6281_v45 = vpop.f32.mrb[47].mxu0  ;;  %v6485_v56 = vrot.slane %v6277_v50, 1  ;;  %v6491_v18 = vrot.slane %v6383_v17, 1 }
 0x522   : > { %v6552_v38 = vadd.f32 %v6551_v31, %v6550_v62  ;;  %v6558_v35 = vrot.slane %v6557_v58, 4  ;;  %v6489_v11 = vrot.slane %v6385_v10, 1  ;;  %v6387_v16 = vpop.f32.mrb[47].mxu1  ;;  %v6486_v59 = vrot.slane %v6281_v45, 1 }
 0x523   : > { %v6484_v14 = vsel %vm3345_vm1, %v6482_v60, %v6483_v8  ;;  %v6514_v49 = vsel %vm3345_vm1, %v6483_v8, 0.0  ;;  %v6571_v45 = vadd.f32 %v10134_v33, %v10130_v5 }
 0x524   : > { %v6559_v20 = vadd.f32 %v6558_v35, %v6557_v58  ;;  %v10139_v41 = vadd.f32 %v10079_v2, %v6484_v14  ;;  %v6553_v46 = vrot.slane %v6552_v38, 2  ;;  %v10142_v54 = vadd.f32 %v10097_v63, %v6514_v49 }
 0x525   : > { %v6490_v9 = vsel %vm3345_vm1, %v6488_v28, %v6489_v11  ;;  %v6516_v13 = vsel %vm3345_vm1, %v6489_v11, 0.0  ;;  %v6487_v2 = vsel %vm3345_vm1, %v6485_v56, %v6486_v59  ;;  %v6515_v26 = vsel %vm3345_vm1, %v6486_v59, 0.0 }
 0x526   : > { %v10147_v37 = vadd.f32 %v10087_v32, %v6490_v9  ;;  %v10150_v21 = vadd.f32 %v10100_v39, %v6516_v13  ;;  %v6578_v6 = vadd.f32 %v10142_v54, %v10139_v41  ;;  %v6492_v63 = vrot.slane %v6387_v16, 1 }
 0x527   : > { %v6560_v27 = vrot.slane %v6559_v20, 2  ;;  %v10159_v55 = vadd.f32 %v10089_v36, %v6487_v2  ;;  %v10162_v32 = vadd.f32 %v10103_v1, %v6515_v26  ;;  %v6554_v19 = vadd.f32 %v6553_v46, %v6552_v38 }
 0x528   : > { %v6592_v40 = vadd.f32 %v10150_v21, %v10147_v37  ;;  %v6579_v39 = vrot.slane %v6578_v6, 4  ;;  %v6493_v23 = vsel %vm3345_vm1, %v6491_v18, %v6492_v63  ;;  %v6517_v12 = vsel %vm3345_vm1, %v6492_v63, 0.0 }
 0x529   : > { %v10167_v42 = vadd.f32 %v10094_v24, %v6493_v23  ;;  %v10170_v7 = vadd.f32 %v10106_v22, %v6517_v12  ;;  %v6585_v36 = vadd.f32 %v10162_v32, %v10159_v55  ;;  %v6555_v15 = vrot.slane %v6554_v19, 1 }
 0x52a   : > { %v6593_v52 = vrot.slane %v6592_v40, 4  ;;  %v6580_v43 = vadd.f32 %v6579_v39, %v6578_v6  ;;  %v6561_v62 = vadd.f32 %v6560_v27, %v6559_v20  ;;  %v6565_v22 = vrot.slane %v6564_v51, 4 }
 0x52b   : > { %v10176_v3 = vadd.f32 %v6555_v15, %v6554_v19  ;;  %v6586_v53 = vrot.slane %v6585_v36, 4  ;;  %v6599_v35 = vadd.f32 %v10170_v7, %v10167_v42  ;;  %v6572_v16 = vrot.slane %v6571_v45, 4 }
 0x52c   : > { %v6594_v1 = vadd.f32 %v6593_v52, %v6592_v40  ;;  %v6581_v44 = vrot.slane %v6580_v43, 2  ;;  %v6562_v30 = vrot.slane %v6561_v62, 1  ;;  %v6566_v17 = vadd.f32 %v6565_v22, %v6564_v51 }
 0x52d   : > { %6616 = vrot.lane.b32.xlu1 %v10176_v3, %s9419_s24  ;;  %6608 = vrot.lane.b32.xlu0 %v10176_v3, %s9420_s26  ;;  %v6587_v50 = vadd.f32 %v6586_v53, %v6585_v36  ;;  %v6600_v14 = vrot.slane %v6599_v35, 4  ;;  %v6573_v59 = vadd.f32 %v6572_v16, %v6571_v45 }
 0x52e   : > { %v6595_v34 = vrot.slane %v6594_v1, 2  ;;  %v6582_v24 = vadd.f32 %v6581_v44, %v6580_v43  ;;  %v6563_v4 = vadd.f32 %v6562_v30, %v6561_v62  ;;  %v6567_v10 = vrot.slane %v6566_v17, 2 }
 0x52f   : > { %v6588_v60 = vrot.slane %v6587_v50, 2  ;;  %v6601_v56 = vadd.f32 %v6600_v14, %v6599_v35  ;;  %v6574_v9 = vrot.slane %v6573_v59, 2 }
 0x530   : > { %v6583_v25 = vrot.slane %v6582_v24, 1  ;;  %v6596_v58 = vadd.f32 %v6595_v34, %v6594_v1  ;;  %v6568_v28 = vadd.f32 %v6567_v10, %v6566_v17 }
 0x531   : > { %6624 = vrot.lane.b32.xlu0 %v10176_v3, %s9421_s11  ;;  %v6589_v38 = vadd.f32 %v6588_v60, %v6587_v50  ;;  %v6602_v18 = vrot.slane %v6601_v56, 2  ;;  %v6575_v6 = vadd.f32 %v6574_v9, %v6573_v59 }
 0x532   : > { %v10184_v31 = vadd.f32 %v6583_v25, %v6582_v24  ;;  %v6597_v8 = vrot.slane %v6596_v58, 1  ;;  %v6569_v20 = vrot.slane %v6568_v28, 1 }
 0x533   : > { %v6590_v49 = vrot.slane %v6589_v38, 1  ;;  %v6603_v2 = vadd.f32 %v6602_v18, %v6601_v56  ;;  %v6576_v26 = vrot.slane %v6575_v6, 1 }
 0x534   : > { %6618 = vrot.lane.b32.xlu1 %v10184_v31, %s9419_s24  ;;  %v10196_v11 = vadd.f32 %v6597_v8, %v6596_v58  ;;  %v6570_v13 = vadd.f32 %v6569_v20, %v6568_v28 }
 0x535   : > { %6636 = vrot.lane.b32.xlu0 %v6563_v4, %s9420_s26  ;;  %v6591_v46 = vadd.f32 %v6590_v49, %v6589_v38  ;;  %v6604_v63 = vrot.slane %v6603_v2, 1  ;;  %v6577_v27 = vadd.f32 %v6576_v26, %v6575_v6 }
 0x537   : > { %v6605_v40 = vadd.f32 %v6604_v63, %v6603_v2 }
 0x538   : > { %6626 = vrot.lane.b32.xlu1 %v10184_v31, %s9421_s11 }
 0x539   : > { %6644 = vrot.lane.b32.xlu0 %v6563_v4, %s9419_s24 }
 0x53c   : > { %6666 = vrot.lane.b32.xlu1 %v10196_v11, %s9420_s26 }
 0x53d   : > { %6610 = vrot.lane.b32.xlu0 %v10184_v31, %s9420_s26 }
 0x540   : > { %6674 = vrot.lane.b32.xlu1 %v10196_v11, %s9419_s24 }
 0x541   : > { %6652 = vrot.lane.b32.xlu0 %v6563_v4, %s9421_s11 }
 0x544   : > { %6638 = vrot.lane.b32.xlu1 %v6591_v46, %s9420_s26 }
 0x545   : > { %6664 = vrot.lane.b32.xlu0 %v6570_v13, %s9420_s26 }
 0x548   : > { %6646 = vrot.lane.b32.xlu1 %v6591_v46, %s9419_s24 }
 0x549   : > { %6672 = vrot.lane.b32.xlu0 %v6570_v13, %s9419_s24 }
 0x54c   : > { %6654 = vrot.lane.b32.xlu1 %v6591_v46, %s9421_s11 }
 0x54d   : > { %6680 = vrot.lane.b32.xlu0 %v6570_v13, %s9421_s11 }
 0x550   : > { %6682 = vrot.lane.b32.xlu1 %v10196_v11, %s9421_s11 }
 0x551   : > { %6692 = vrot.lane.b32.xlu0 %v6577_v27, %s9420_s26 }
 0x554   : > { %6694 = vrot.lane.b32.xlu1 %v6605_v40, %s9420_s26 }
 0x555   : > { %6700 = vrot.lane.b32.xlu0 %v6577_v27, %s9419_s24 }
 0x558   : > { %6702 = vrot.lane.b32.xlu1 %v6605_v40, %s9419_s24 }
 0x559   : > { %6708 = vrot.lane.b32.xlu0 %v6577_v27, %s9421_s11 }
 0x55c   : > { %6710 = vrot.lane.b32.xlu1 %v6605_v40, %s9421_s11 }
 0x59f   : > { %v6609_v39 = vpop.permute.xlu0 %6608  ;;  %v6617_v12 = vpop.permute.xlu1 %6616 }
 0x5a0   : > { %v6614_v23 = vadd.f32 %v6609_v39, %v10176_v3 }
 0x5a2   : > { %v6622_v52 = vadd.f32 %v6617_v12, %v6614_v23 }
 0x5a3   : > { %v6625_v19 = vpop.permute.xlu0 %6624 }
 0x5a4   : > { %v6630_v15 = vadd.f32 %v6625_v19, %v6622_v52 }
 0x5a6   : > { %v6619_v43 = vpop.permute.xlu1 %6618  ;;  %v6632_v44 = vadd.f32 %v6630_v15, %v6563_v4 }
 0x5a7   : > { %v6637_v36 = vpop.permute.xlu0 %6636 }
 0x5a8   : > { %v6642_v53 = vadd.f32 %v6637_v36, %v6632_v44 }
 0x5aa   : > { %v6627_v1 = vpop.permute.xlu1 %6626 }
 0x5ab   : > { %v6645_v51 = vpop.permute.xlu0 %6644 }
 0x5ac   : > { %v6650_v30 = vadd.f32 %v6645_v51, %v6642_v53 }
 0x5ae   : > { %v6667_v62 = vpop.permute.xlu1 %6666 }
 0x5af   : > { %v6611_v34 = vpop.permute.xlu0 %6610 }
 0x5b0   : > { %v6615_v24 = vadd.f32 %v6611_v34, %v10184_v31 }
 0x5b2   : > { %v6675_v22 = vpop.permute.xlu1 %6674  ;;  %v6623_v25 = vadd.f32 %v6619_v43, %v6615_v24 }
 0x5b3   : > { %v6653_v50 = vpop.permute.xlu0 %6652 }
 0x5b4   : > { %v6658_v58 = vadd.f32 %v6653_v50, %v6650_v30  ;;  %v6631_v3 = vadd.f32 %v6627_v1, %v6623_v25  ;;  %v6738_v50 = vld [vmem:[#allocation10] sm:$0xf] }
 0x5b6   : > { %v6639_v17 = vpop.permute.xlu1 %6638  ;;  %v6633_v60 = vadd.f32 %v6631_v3, %v6591_v46  ;;  %v6660_v10 = vadd.f32 %v6658_v58, %v6570_v13  ;;  %v6719_v46 = vlaneseq }
 0x5b7   : > { %v6665_v8 = vpop.permute.xlu0 %6664 }
 0x5b8   : > { %v6643_v38 = vadd.f32 %v6639_v17, %v6633_v60  ;;  %v6670_v16 = vadd.f32 %v6665_v8, %v6660_v10  ;;  %v10222_v12 = vshrl.u32 %v6719_v46, 7 }
 0x5ba   : > { %v6647_v45 = vpop.permute.xlu1 %6646  ;;  %v10225_v15 = vsub.s32 0, %v10222_v12 }
 0x5bb   : > { %v6673_v35 = vpop.permute.xlu0 %6672  ;;  %v6651_v4 = vadd.f32 %v6647_v45, %v6643_v38 }
 0x5bc   : > { %v6678_v14 = vadd.f32 %v6673_v35, %v6670_v16 }
 0x5be   : > { %v6655_v28 = vpop.permute.xlu1 %6654 }
 0x5bf   : > { %v6659_v49 = vadd.f32 %v6655_v28, %v6651_v4  ;;  %v6681_v59 = vpop.permute.xlu0 %6680 }
 0x5c0   : > { %v6686_v31 = vadd.f32 %v6681_v59, %v6678_v14 }
 0x5c1   : > { %v6661_v20 = vadd.f32 %v6659_v49, %v10196_v11 }
 0x5c2   : > { %v6683_v56 = vpop.permute.xlu1 %6682  ;;  %v6688_v6 = vadd.f32 %v6686_v31, %v6577_v27 }
 0x5c3   : > { %v6671_v9 = vadd.f32 %v6667_v62, %v6661_v20  ;;  %v6693_v18 = vpop.permute.xlu0 %6692  ;;  %v6718_v62 = vld [vmem:[#allocation8] sm:$0xf] }
 0x5c4   : > { %v6698_v39 = vadd.f32 %v6693_v18, %v6688_v6 }
 0x5c5   : > { %v6679_v2 = vadd.f32 %v6675_v22, %v6671_v9 }
 0x5c6   : > { %v6695_v26 = vpop.permute.xlu1 %6694 }
 0x5c7   : > { %v6687_v13 = vadd.f32 %v6683_v56, %v6679_v2  ;;  %v6701_v63 = vpop.permute.xlu0 %6700 }
 0x5c8   : > { %v6706_v52 = vadd.f32 %v6701_v63, %v6698_v39 }
 0x5c9   : > { %v6689_v23 = vadd.f32 %v6687_v13, %v6605_v40 }
 0x5ca   : > { %v6703_v19 = vpop.permute.xlu1 %6702 }
 0x5cb   : > { %v6699_v43 = vadd.f32 %v6695_v26, %v6689_v23  ;;  %v6709_v36 = vpop.permute.xlu0 %6708 }
 0x5cc   : > { %v6714_v11 = vadd.f32 %v6709_v36, %v6706_v52  ;;  %v9422_v52 = vmov 1966171168  }
 0x5cd   : > { %v6707_v1 = vadd.f32 %v6703_v19, %v6699_v43  ;;  %v6790_v43 = vunpack.c.l.s4 %v9422_v52 }
 0x5ce   : > { %v6711_v51 = vpop.permute.xlu1 %6710  ;;  %v6716_v27 = vmul.f32 0.00390625, %v6714_v11 }
 0x5cf   : > { %v6715_v44 = vadd.f32 %v6711_v51, %v6707_v1  ;;  %v6791_v11 = vunpack.c.0.s8 %v6790_v43  ;;  %v9187_v43 = vld [vmem:[%s9678_s30 + $0x58] sm:$0xff] }
 0x5d0   : > { %v6722_v34 = vrot.slane %v6716_v27, %v10225_v15 }
 0x5d1   : > { %v6717_v53 = vmul.f32 0.00390625, %v6715_v44  ;;  %v6794_v44 = vsub.s32 %v6791_v11, %v10222_v12  ;;  %v9188_v11 = vld [vmem:[%s9678_s30 + $0x60] sm:$0xff] }
 0x5d2   : > { %v6727_v24 = vmul.f32 %v6722_v34, %v6718_v62 }
 0x5d3   : > { %v6726_v40 = vrot.slane %v6717_v53, %v10225_v15 }
 0x5d4   : > { %v6730_v22 = vsel %vm6729_vm2, %v6727_v24, 0.0  ;;  %v6818_v24 = vsub.s32 1, %v10222_v12 }
 0x5d5   : > { %v6728_v30 = vmul.f32 %v6726_v40, %v6718_v62  ;;  %6731 = vadd.xlane.f32.xlu0 %v6730_v22  ;;  %v6822_v22 = vsub.s32 2, %v10222_v12 }
 0x5d7   : > { %v6733_v25 = vsel %vm6729_vm2, %v6728_v30, 0.0  ;;  %v6826_v30 = vsub.s32 3, %v10222_v12 }
 0x5d8   : > { %6734 = vadd.xlane.f32.xlu1 %v6733_v25 }
 0x662   : > { %v6732_v58 = vpop.xlane.xlu0 %6731 }
 0x663   : > { %v6736_v3 = vmax.f32 %v6732_v58, 0.0 }
 0x665   : > { %v6735_v17 = vpop.xlane.xlu1 %6734  ;;  %v6739_v60 = vmul.f32 %v6738_v50, %v6736_v3 }
 0x666   : > { %v6737_v8 = vmax.f32 %v6735_v17, 0.0 }
 0x667   : > { %v6741_v10 = vsel %vm6729_vm2, %v6739_v60, 0.0 }
 0x668   : > { %v6740_v45 = vmul.f32 %v6738_v50, %v6737_v8  ;;  %v6742_v38 = vrot.slane %v6741_v10, 4 }
 0x66a   : > { %v6748_v35 = vsel %vm6729_vm2, %v6740_v45, 0.0  ;;  %v6743_v16 = vadd.f32 %v6742_v38, %v6741_v10 }
 0x66b   : > { %v6749_v4 = vrot.slane %v6748_v35, 4 }
 0x66c   : > { %v6744_v28 = vrot.slane %v6743_v16, 2 }
 0x66d   : > { %v6750_v14 = vadd.f32 %v6749_v4, %v6748_v35 }
 0x66e   : > { %v6745_v49 = vadd.f32 %v6744_v28, %v6743_v16 }
 0x66f   : > { %v6751_v59 = vrot.slane %v6750_v14, 2 }
 0x670   : > { %v6746_v31 = vrot.slane %v6745_v49, 1 }
 0x671   : > { %v6752_v20 = vadd.f32 %v6751_v59, %v6750_v14 }
 0x672   : > { %v6747_v56 = vadd.f32 %v6746_v31, %v6745_v49 }
 0x673   : > { %v6753_v9 = vrot.slane %v6752_v20, 1 }
 0x674   : > { %v7812_v18 = vmul.f32 -1.442695, %v6747_v56  ;;  %v9178_v56 = vld [vmem:[%s9678_s30 + $0x10] sm:$0xff] }
 0x675   : > { %v6754_v6 = vadd.f32 %v6753_v9, %v6752_v20  ;;  %v9177_v20 = vld [vmem:[%s9678_s30 + $0x8] sm:$0xff]  ;;  %v9179_v9 = vld [vmem:[%s9678_s30 + $0x18] sm:$0xff] }
 0x676   : > { %9168 = vpow2.f32 %v7812_v18 }
 0x677   : > { %v7813_v2 = vmul.f32 -1.442695, %v6754_v6  ;;  %v9182_v6 = vld [vmem:[%s9678_s30 + $0x30] sm:$0xff] }
 0x679   : > { %9170 = vpow2.f32 %v7813_v2 }
 0x680   : > { %v9169_v46 = vpop.eup %9168 }
 0x681   : > { %v6761_v26 = vadd.f32 1.0, %v9169_v46  ;;  %v9183_v46 = vld [vmem:[%s9678_s30 + $0x38] sm:$0xff] }
 0x683   : > { %v9171_v13 = vpop.eup %9170  ;;  %9172 = vrcp.f32 %v6761_v26 }
 0x684   : > { %v6762_v63 = vadd.f32 1.0, %v9171_v13  ;;  %v9184_v13 = vld [vmem:[%s9678_s30 + $0x40] sm:$0xff] }
 0x686   : > { %9174 = vrcp.f32 %v6762_v63 }
 0x68d   : > { %v9173_v39 = vpop.eup %9172 }
 0x690   : > { %v9175_v23 = vpop.eup %9174 }
 0x691   : > { %v6770_v19 = vsel %vm6769_vm3, %v9175_v23, %v9173_v39  ;;  %v9185_v39 = vld [vmem:[%s9678_s30 + $0x48] sm:$0xff] }
 0x692   : > { %6775 = vrot.lane.b32.xlu1 %v6770_v19, %s9419_s24  ;;  %6772 = vrot.lane.b32.xlu0 %v6770_v19, %s9421_s11 }
 0x696   : > { %6778 = vrot.lane.b32.xlu0 %v6770_v19, %s9420_s26 }
 0x704   : > { %v6773_v36 = vpop.permute.xlu0 %6772  ;;  %v6776_v1 = vpop.permute.xlu1 %6775 }
 0x705   : > { %v6782_v51 = vsel %vm6781_vm4, %v6770_v19, %v6773_v36  ;;  %v9186_v19 = vld [vmem:[%s9678_s30 + $0x50] sm:$0xff] }
 0x706   : > { %v6784_v27 = vsel %vm6783_vm5, %v6782_v51, %v6776_v1  ;;  %v9189_v51 = vld [vmem:[%s9678_s30 + $0x68] sm:$0xff] }
 0x708   : > { %v6779_v62 = vpop.permute.xlu0 %6778 }
 0x709   : > { %v6786_v34 = vsel %vm6785_vm6, %v6784_v27, %v6779_v62 }
 0x70a   : > { %v6788_v53 = vcombine.low %v6786_v34, %v6786_v34  ;;  %v9191_v34 = vld [vmem:[%s9678_s30 + $0x78] sm:$0xff] }
 0x70c   : > { %v6795_v40 = vrot.slane %v6788_v53, %v6794_v44 }
 0x70e   : > { %v6796_v25 = vcombine.low %v6795_v40, %v6795_v40  ;;  %v6797_v50 = vcombine.high %v6795_v40, %v6795_v40 }
 0x710   : > { %v6804_v58 = vrot.slane %v6796_v25, %v6794_v44  ;;  %v6811_v3 = vrot.slane %v6797_v50, %v6794_v44  ;;  %v9190_v44 = vld [vmem:[%s9678_s30 + $0x70] sm:$0xff] }
 0x712   : > { %v6815_v17 = vrot.slane %v6804_v58, %v10225_v15  ;;  %v6819_v60 = vrot.slane %v6804_v58, %v6818_v24  ;;  %v6823_v8 = vrot.slane %v6804_v58, %v6822_v22  ;;  %v6827_v10 = vrot.slane %v6804_v58, %v6826_v30 }
 0x713   : > { %v6831_v45 = vrot.slane %v6811_v3, %v10225_v15  ;;  %v6835_v38 = vrot.slane %v6811_v3, %v6818_v24  ;;  %v6839_v35 = vrot.slane %v6811_v3, %v6822_v22  ;;  %v6843_v16 = vrot.slane %v6811_v3, %v6826_v30 }
 0x714   : > { %v6852_v4 = vmul.f32 %v6815_v17, %v10110_v48  ;;  %v6853_v28 = vmul.f32 %v6819_v60, %v10124_v0  ;;  %v6854_v12 = vmul.f32 %v6823_v8, %v10116_v29  ;;  %v6855_v14 = vmul.f32 %v6827_v10, %v10130_v5 }
 0x715   : > { %v6856_v49 = vmul.f32 %v6815_v17, %v10112_v47  ;;  %v6857_v59 = vmul.f32 %v6819_v60, %v10126_v61  ;;  %v6858_v15 = vmul.f32 %v6823_v8, %v10118_v57  ;;  %v6859_v31 = vmul.f32 %v6827_v10, %v10134_v33 }
 0x716   : > { %v6860_v48 = vmul.f32 %v6831_v45, %v10139_v41  ;;  %v6861_v0 = vmul.f32 %v6835_v38, %v10159_v55  ;;  %v6862_v29 = vmul.f32 %v6839_v35, %v10147_v37  ;;  %v6863_v5 = vmul.f32 %v6843_v16, %v10167_v42  ;;  %v9176_v41 = vld [vmem:[%s9678_s30] sm:$0xff] }
 0x717   : > { %v6864_v47 = vmul.f32 %v6831_v45, %v10142_v54  ;;  %v6865_v61 = vmul.f32 %v6835_v38, %v10162_v32  ;;  %v6866_v57 = vmul.f32 %v6839_v35, %v10150_v21  ;;  %v6867_v33 = vmul.f32 %v6843_v16, %v10170_v7  ;;  %v9180_v21 = vld [vmem:[%s9678_s30 + $0x20] sm:$0xff]  ;;  %v9181_v7 = vld [vmem:[%s9678_s30 + $0x28] sm:$0xff] }
 0x718   : > { %v6868_v55 = vadd.f32 %v9176_v41, %v6852_v4  ;;  %v6869_v37 = vadd.f32 %v9177_v20, %v6853_v28  ;;  %v6870_v42 = vadd.f32 %v9178_v56, %v6854_v12  ;;  %v6871_v54 = vadd.f32 %v9179_v9, %v6855_v14 }
 0x719   : > { %v6872_v32 = vadd.f32 %v9180_v21, %v6856_v49  ;;  %v6873_v18 = vadd.f32 %v9181_v7, %v6857_v59  ;;  %v6874_v2 = vadd.f32 %v9182_v6, %v6858_v15  ;;  %v6875_v26 = vadd.f32 %v9183_v46, %v6859_v31 }
 0x71a   : > { %v6876_v63 = vadd.f32 %v9184_v13, %v6860_v48  ;;  %v6877_v23 = vadd.f32 %v9185_v39, %v6861_v0  ;;  %v6878_v52 = vadd.f32 %v9186_v19, %v6862_v29  ;;  %v6879_v36 = vadd.f32 %v9187_v43, %v6863_v5  ;;  %6884 = vst [vmem:[%s10265_s15] sm:$0xff] %v6868_v55 }
 0x71b   : > { %6885 = vst [vmem:[%s10265_s15 + $0x8] sm:$0xff] %v6869_v37  ;;  %6886 = vst [vmem:[%s10265_s15 + $0x10] sm:$0xff] %v6870_v42  ;;  %v6880_v1 = vadd.f32 %v9188_v11, %v6864_v47  ;;  %v6881_v27 = vadd.f32 %v9189_v51, %v6865_v61  ;;  %v6882_v62 = vadd.f32 %v9190_v44, %v6866_v57 }
 0x71c   : > { %6887 = vst [vmem:[%s10265_s15 + $0x18] sm:$0xff] %v6871_v54  ;;  %v6883_v53 = vadd.f32 %v9191_v34, %v6867_v33  ;;  %6888 = vst [vmem:[%s10265_s15 + $0x20] sm:$0xff] %v6872_v32 }
 0x71d   : > { %6889 = vst [vmem:[%s10265_s15 + $0x28] sm:$0xff] %v6873_v18  ;;  %6890 = vst [vmem:[%s10265_s15 + $0x30] sm:$0xff] %v6874_v2 }
 0x71e   : > { %6891 = vst [vmem:[%s10265_s15 + $0x38] sm:$0xff] %v6875_v26  ;;  %6892 = vst [vmem:[%s10265_s15 + $0x40] sm:$0xff] %v6876_v63 }
 0x71f   : > { %6893 = vst [vmem:[%s10265_s15 + $0x48] sm:$0xff] %v6877_v23  ;;  %6894 = vst [vmem:[%s10265_s15 + $0x50] sm:$0xff] %v6878_v52 }
 0x720   : > { %6895 = vst [vmem:[%s10265_s15 + $0x58] sm:$0xff] %v6879_v36  ;;  %6896 = vst [vmem:[%s10265_s15 + $0x60] sm:$0xff] %v6880_v1 }
 0x721   : > { %6897 = vst [vmem:[%s10265_s15 + $0x68] sm:$0xff] %v6881_v27  ;;  %6898 = vst [vmem:[%s10265_s15 + $0x70] sm:$0xff] %v6882_v62 }
 0x722   : > { %6899 = vst [vmem:[%s10265_s15 + $0x78] sm:$0xff] %v6883_v53 }
 0x723   : > { %9347 = shalt.err (!%p9344_p13)
}
 0x724   : > { %s9348_s7 = scalar_lea.hbm %s10285_s10, 2048  ;;  %s9352_s26 = scalar_lea.hbm %s10355_s5, 4096 }
 0x725   : > { %p9349_p9 = scmp.ne.s32.totalorder %s10285_s10, %s9348_s7  ;;  %p9353_p4 = scmp.lt.u32.totalorder %s10285_s10, %s10355_s5 }
 0x726   : > { %p9354_p8 = scmp.lt.u32.totalorder %s9352_s26, %s9348_s7  ;;  %p9356_p3 = scmp.lt.u32.totalorder %s9348_s7, %s10285_s10 }
 0x727   : > { %p9350_p0 = pnand %p9349_p9, %p9620_p10 }
 0x728   : > { %p9355_p6 = por %p9354_p8, %p9353_p4 }
 0x729   : > { %p9351_p11 = pneg %p9350_p0 }
 0x72a   : > { %p9357_p5 = por %p9356_p3, %p9355_p6 }
 0x72c   : > { %p9358_p7 = pnand %p9357_p5, %p9351_p11 }
 0x72e   : > { %9361 = shalt.err (!%p9358_p7)
}
 0x72f   : > { %s9424_s17 = smov 512  }
 0x730   : > { %7938 = dma.vmem_to_hbm [thread:$0]  (%p9620_p10), %s10297_s8, 2048, %s10285_s10, %s6901_s22, %s9424_s17, %s9424_s17, %s9421_s11  }
 0x731 PF: > { %s6930_s9 = sand.u32 1, %s9396_s18   ;;  %p10373_p12 = scmp.ne.s32.totalorder %s10360_s25, 0 }
 0x732   : > { %p10374_p1 = scmp.ge.s32.totalorder %s9408_s21, 2  ;;  %s6931_s12 = scalar_lea.sflag [#allocation4], %s6930_s9 }
 0x734   : > { %p7958_p2 = pnand %p10374_p1, %p10373_p12 }
 0x736   : > { %9391 = dma.done.wait (!%p7958_p2), %s6931_s12, 2048  }
 0x737   : > { %9393 = vsyncadd (!%p7958_p2), %s6931_s12, 4294965248  ;;  %p20_p13 = scmp.ge.s32.totalorder %s9610_s14, 4   ;;  %s10375_s18 = smov %s9400_s19 }
 0x738   : > { %s10376_s19 = smov %s9404_s20  ;;  %s10377_s20 = smov %s9626_s28 }
 0x739   : > { %s10378_s21 = smov %s9610_s14  ;;  %22 = sbr.rel (!%p20_p13) target bundleno = 7 (0x7), region = 101 }
 0x740   :  { %6936 = vsyncpa [#allocation3], 1 }
 0x741   :  { %6938 = vsyncpa [#allocation3 + $0x1], 1 }
 0x742   :  { %6939 = vsyncpa [#allocation6], 1 }
 0x743   :  { %6940 = vsyncpa [#allocation9], 1 }
 0x744   :  { %6941 = vsyncpa [#allocation4], 1 }
 0x745   :  { %6943 = vsyncpa [#allocation4 + $0x1], 1 }

</bundles_post_ra>
